<compile_context>
chip_gen: v7x
topology: tpu7x:2x2x1
jax: 0.10.0
libtpu: 0.0.40
codegen_flags: <defaults>
</compile_context>

<pallas_src>
import functools
import math

import jax
import jax.numpy as jnp
from jax.experimental import pallas as pl
from jax.experimental.pallas import tpu as pltpu

# ---------------- configuration ----------------
B = 8
C = 1
IMG = 16
PATCH = 8
GRID_HW = IMG // PATCH                     # 2
NUM_PATCHES = GRID_HW * GRID_HW            # 4
N = NUM_PATCHES + 1                        # 5 (cls token)
PATCH_DIM = PATCH * PATCH * C              # 64
DIM = 32
DEPTH = 2
HEADS = 4
DIM_HEAD = 8
INNER = HEADS * DIM_HEAD                   # 32
MLP_DIM = 32
NUM_CLASSES = 10
LN_EPS = 1e-5
SCALE = DIM_HEAD ** -0.5
INV_SQRT2 = 1.0 / math.sqrt(2.0)
LANES = 128

# ----- packed weight-slab row layout (static offsets) -----
# vector slab: every LN gamma/beta, bias, cls and pos row padded to 128 lanes
V_PLN1_G, V_PLN1_B = 0, 1
V_PATCH_B, V_PLN2_G, V_PLN2_B = 2, 3, 4
V_CLS = 5
V_POS = 6                                  # N rows (6..10)
V_FLN_G = V_POS + N                        # 11
V_FLN_B = V_FLN_G + 1                      # 12
V_HEAD_B = V_FLN_B + 1                     # 13
V_LAYER = V_HEAD_B + 1                     # 14
V_STRIDE = 7                               # attn_g, attn_b, b_out, ff_g, ff_b, b1, b2
VROWS_RAW = V_LAYER + DEPTH * V_STRIDE     # 28
VROWS = ((VROWS_RAW + 7) // 8) * 8         # 32

# matrix slab: every weight matrix padded to 128 lanes, stacked along rows
M_PATCH_W = 0                              # PATCH_DIM rows
M_HEAD_W = M_PATCH_W + PATCH_DIM           # 64, DIM rows
M_LAYER = M_HEAD_W + DIM                   # 96
ML_QKV = 0                                 # DIM rows, 3*INNER cols (q cols pre-scaled)
ML_OUT = ML_QKV + DIM                      # INNER rows
ML_W1 = ML_OUT + INNER                     # DIM rows
ML_W2 = ML_W1 + DIM                        # MLP_DIM rows
M_STRIDE = ML_W2 + MLP_DIM                 # 128
MROWS = M_LAYER + DEPTH * M_STRIDE         # 352


# ---------------- fused Pallas kernel ----------------
def _layernorm(x, g, b):
    mean = jnp.mean(x, axis=-1, keepdims=True)
    var = jnp.mean((x - mean) ** 2, axis=-1, keepdims=True)
    return (x - mean) * jax.lax.rsqrt(var + LN_EPS) * g + b


def vit_fused_kernel(bc, patches_ref, vecs_ref, mats_ref, logits_ref, attn_ref):
    """One grid step == one chunk of `bc` images, tokens flattened to (bc*N, DIM)."""
    f32 = jnp.float32
    Z = bc * HEADS

    def vrow(r, width):                    # (1, width) slice of the vector slab
        return vecs_ref[r:r + 1, 0:width]

    def mslab(r, rows, cols):              # (rows, cols) slice of the matrix slab
        return mats_ref[r:r + rows, 0:cols]

    # ---- to_patch_embedding: LayerNorm -> Linear -> LayerNorm ----
    p = patches_ref[...].astype(f32)                                   # (bc*n, PATCH_DIM)
    e = _layernorm(p, vrow(V_PLN1_G, PATCH_DIM), vrow(V_PLN1_B, PATCH_DIM))
    e = jnp.dot(e, mslab(M_PATCH_W, PATCH_DIM, DIM), preferred_element_type=f32)
    e = e + vrow(V_PATCH_B, DIM)
    e = _layernorm(e, vrow(V_PLN2_G, DIM), vrow(V_PLN2_B, DIM))        # (bc*n, DIM)

    # ---- prepend cls token + positional embedding (emb dropout == identity) ----
    pos = vecs_ref[V_POS:V_POS + N, 0:DIM]                             # (N, DIM)
    cls_row = vrow(V_CLS, DIM) + pos[0:1, :]                           # (1, DIM)
    pos_rest = pos[1:N, :]                                             # (n, DIM)
    pieces = []
    for b in range(bc):
        pieces.append(cls_row)
        pieces.append(e[b * NUM_PATCHES:(b + 1) * NUM_PATCHES, :] + pos_rest)
    t = jnp.concatenate(pieces, axis=0)                                # (bc*N, DIM)

    # ---- transformer layers (DEPTH is small & static -> fully unrolled) ----
    for l in range(DEPTH):
        vr = V_LAYER + l * V_STRIDE
        mr = M_LAYER + l * M_STRIDE

        # --- pre-norm attention + residual ---
        xn = _layernorm(t, vrow(vr + 0, DIM), vrow(vr + 1, DIM))
        qkv = jnp.dot(xn, mslab(mr + ML_QKV, DIM, 3 * INNER),
                      preferred_element_type=f32)                      # (bc*N, 3*INNER)

        def head_stack(col0):
            # (bc*HEADS, N, DIM_HEAD), batch index z = b*HEADS + h
            return jnp.stack(
                [qkv[b * N:(b + 1) * N,
                     col0 + h * DIM_HEAD: col0 + (h + 1) * DIM_HEAD]
                 for b in range(bc) for h in range(HEADS)], axis=0)

        q_s = head_stack(0)               # 1/sqrt(dh) already folded into W_qkv
        k_s = head_stack(INNER)
        v_s = head_stack(2 * INNER)

        s = jnp.einsum('znd,zmd->znm', q_s, k_s,
                       preferred_element_type=f32)                     # (Z, N, N)
        s = s - jnp.max(s, axis=-1, keepdims=True)
        pexp = jnp.exp(s)
        attn = pexp * pl.reciprocal(jnp.sum(pexp, axis=-1, keepdims=True), approx=True)

        # Recorder hook: ONE store per layer per chunk
        attn_ref[0, l * Z:(l + 1) * Z] = attn.astype(attn_ref.dtype)

        o_s = jnp.einsum('znm,zmd->znd', attn, v_s,
                         preferred_element_type=f32)                   # (Z, N, dh)
        # head merge 'b h n d -> (b n) (h d)' via static slices + concat (no transpose)
        o = jnp.concatenate(
            [jnp.concatenate([o_s[b * HEADS + h] for h in range(HEADS)], axis=1)
             for b in range(bc)], axis=0)                              # (bc*N, INNER)

        o = jnp.dot(o, mslab(mr + ML_OUT, INNER, DIM), preferred_element_type=f32)
        t = t + o + vrow(vr + 2, DIM)

        # --- pre-norm FeedForward (Linear -> exact erf GELU -> Linear) + residual ---
        xn = _layernorm(t, vrow(vr + 3, DIM), vrow(vr + 4, DIM))
        h1 = jnp.dot(xn, mslab(mr + ML_W1, DIM, MLP_DIM), preferred_element_type=f32)
        h1 = h1 + vrow(vr + 5, MLP_DIM)
        h1 = 0.5 * h1 * (1.0 + jax.lax.erf(h1 * INV_SQRT2))
        h2 = jnp.dot(h1, mslab(mr + ML_W2, MLP_DIM, DIM), preferred_element_type=f32)
        t = t + h2 + vrow(vr + 6, DIM)

    # ---- final transformer LayerNorm, cls pooling, classifier head ----
    t = _layernorm(t, vrow(V_FLN_G, DIM), vrow(V_FLN_B, DIM))
    cls_out = jnp.concatenate([t[b * N:b * N + 1, :] for b in range(bc)], axis=0)  # (bc, DIM)
    logits = jnp.dot(cls_out, mslab(M_HEAD_W, DIM, NUM_CLASSES),
                     preferred_element_type=f32) + vrow(V_HEAD_B, NUM_CLASSES)
    logits_ref[0] = logits.astype(logits_ref.dtype)


# ---------------- parameters ----------------
def init_params(key, dtype=jnp.float32):
    ks = iter(jax.random.split(key, 16))

    def randn(shape, scale=0.02):
        return (scale * jax.random.normal(next(ks), shape)).astype(dtype)

    return {
        'patch_ln1_g': jnp.ones((1, PATCH_DIM), dtype),
        'patch_ln1_b': jnp.zeros((1, PATCH_DIM), dtype),
        'patch_w': randn((PATCH_DIM, DIM)),
        'patch_b': jnp.zeros((1, DIM), dtype),
        'patch_ln2_g': jnp.ones((1, DIM), dtype),
        'patch_ln2_b': jnp.zeros((1, DIM), dtype),
        'cls_token': randn((1, DIM), scale=1.0),
        'pos_emb': randn((N, DIM), scale=1.0),
        'final_ln_g': jnp.ones((1, DIM), dtype),
        'final_ln_b': jnp.zeros((1, DIM), dtype),
        'head_w': randn((DIM, NUM_CLASSES)),
        'head_b': jnp.zeros((1, NUM_CLASSES), dtype),
        # per-layer params stacked along a leading DEPTH axis
        'attn_ln_g': jnp.ones((DEPTH, 1, DIM), dtype),
        'attn_ln_b': jnp.zeros((DEPTH, 1, DIM), dtype),
        'w_qkv': randn((DEPTH, DIM, 3 * INNER)),        # to_qkv has no bias
        'w_out': randn((DEPTH, INNER, DIM)),
        'b_out': jnp.zeros((DEPTH, 1, DIM), dtype),
        'ff_ln_g': jnp.ones((DEPTH, 1, DIM), dtype),
        'ff_ln_b': jnp.zeros((DEPTH, 1, DIM), dtype),
        'w1': randn((DEPTH, DIM, MLP_DIM)),
        'b1': jnp.zeros((DEPTH, 1, MLP_DIM), dtype),
        'w2': randn((DEPTH, MLP_DIM, DIM)),
        'b2': jnp.zeros((DEPTH, 1, DIM), dtype),
    }


def pack_params(params):
    """Pack all weights into two lane-dense (rows, 128) f32 slabs (one-time, host side)."""
    def pad_row(v):
        v = jnp.asarray(v, jnp.float32).reshape(1, -1)
        return jnp.pad(v, ((0, 0), (0, LANES - v.shape[1])))

    def pad_mat(m):
        m = jnp.asarray(m, jnp.float32)
        return jnp.pad(m, ((0, 0), (0, LANES - m.shape[1])))

    vec_rows = [
        pad_row(params['patch_ln1_g']), pad_row(params['patch_ln1_b']),
        pad_row(params['patch_b']), pad_row(params['patch_ln2_g']),
        pad_row(params['patch_ln2_b']), pad_row(params['cls_token']),
    ]
    vec_rows += [pad_row(params['pos_emb'][i]) for i in range(N)]
    vec_rows += [pad_row(params['final_ln_g']), pad_row(params['final_ln_b']),
                 pad_row(params['head_b'])]
    for l in range(DEPTH):
        vec_rows += [pad_row(params['attn_ln_g'][l]), pad_row(params['attn_ln_b'][l]),
                     pad_row(params['b_out'][l]), pad_row(params['ff_ln_g'][l]),
                     pad_row(params['ff_ln_b'][l]), pad_row(params['b1'][l]),
                     pad_row(params['b2'][l])]
    vecs = jnp.concatenate(vec_rows, axis=0)
    vecs = jnp.pad(vecs, ((0, VROWS - vecs.shape[0]), (0, 0)))

    mat_rows = [pad_mat(params['patch_w']), pad_mat(params['head_w'])]
    for l in range(DEPTH):
        w_qkv = params['w_qkv'][l].astype(jnp.float32)
        w_qkv = w_qkv.at[:, :INNER].multiply(SCALE)       # fold 1/sqrt(dh) into q cols
        mat_rows += [pad_mat(w_qkv), pad_mat(params['w_out'][l]),
                     pad_mat(params['w1'][l]), pad_mat(params['w2'][l])]
    mats = jnp.concatenate(mat_rows, axis=0)
    assert vecs.shape == (VROWS, LANES) and mats.shape == (MROWS, LANES)
    return vecs, mats


# ---------------- wrapper: one pallas_call per forward ----------------
@jax.jit
def basic_vit_forward(x, vecs, mats):
    Bb, Cc, Hh, Ww = x.shape
    hh, ww = Hh // PATCH, Ww // PATCH
    n = hh * ww

    # Layout glue: 'b c (h p1) (w p2) -> (b h w) (p1 p2 c)'
    patches = x.reshape(Bb, Cc, hh, PATCH, ww, PATCH)
    patches = jnp.transpose(patches, (0, 2, 4, 3, 5, 1))
    patches = patches.reshape(Bb * n, PATCH * PATCH * Cc).astype(jnp.float32)

    # 2 chunks when possible (both v7x TCs get half the batch), else 1.
    nchunk = 2 if (Bb % 2 == 0 and ((Bb // 2) * n) % 8 == 0) else 1
    bc = Bb // nchunk
    Z = bc * HEADS

    kernel = functools.partial(vit_fused_kernel, bc)

    out_shape = (
        jax.ShapeDtypeStruct((nchunk, bc, NUM_CLASSES), jnp.float32),
        jax.ShapeDtypeStruct((nchunk, DEPTH * Z, N, N), jnp.float32),
    )
    in_specs = [
        pl.BlockSpec((bc * n, PATCH_DIM), lambda c: (c, 0)),
        pl.BlockSpec((VROWS, LANES), lambda c: (0, 0)),    # grid-invariant -> VMEM-resident
        pl.BlockSpec((MROWS, LANES), lambda c: (0, 0)),
    ]
    out_specs = (
        pl.BlockSpec((1, bc, NUM_CLASSES), lambda c: (c, 0, 0)),
        pl.BlockSpec((1, DEPTH * Z, N, N), lambda c: (c, 0, 0, 0)),
    )

    logits3, attn_raw = pl.pallas_call(
        kernel,
        grid=(nchunk,),
        out_shape=out_shape,
        in_specs=in_specs,
        out_specs=out_specs,
        compiler_params=pltpu.CompilerParams(
            dimension_semantics=("parallel",),
        ),
    )(patches, vecs, mats)

    logits = logits3.reshape(Bb, NUM_CLASSES).astype(x.dtype)
    # chunk-packed (l, b, h) -> Recorder layout (b, depth, heads, n, n)
    attns = attn_raw.reshape(nchunk, DEPTH, bc, HEADS, N, N)
    attns = jnp.transpose(attns, (0, 2, 1, 3, 4, 5)).reshape(Bb, DEPTH, HEADS, N, N)
    return logits, attns.astype(x.dtype)


if __name__ == "__main__":
    key = jax.random.PRNGKey(0)
    k_params, k_x = jax.random.split(key)
    params = init_params(k_params)
    vecs, mats = pack_params(params)
    x = jax.random.normal(k_x, (B, C, IMG, IMG), dtype=jnp.float32)   # NCHW

    logits, attns = basic_vit_forward(x, vecs, mats)
    jax.block_until_ready((logits, attns))

    assert logits.shape == (B, NUM_CLASSES)
    assert attns.shape == (B, DEPTH, HEADS, N, N)
    print("KERNEL_OK")
</pallas_src>

<mosaic_0001>
module attributes {stable_mosaic.version = 11 : i64} {
  func.func @vit_fused_kernel(%arg0: i32, %arg1: memref<16x64xf32, #tpu.memory_space<vmem>>, %arg2: memref<32x128xf32, #tpu.memory_space<vmem>>, %arg3: memref<352x128xf32, #tpu.memory_space<vmem>>, %arg4: memref<1x4x10xf32, #tpu.memory_space<vmem>>, %arg5: memref<1x32x5x5xf32, #tpu.memory_space<vmem>>) attributes {dimension_semantics = [#tpu.dimension_semantics<parallel>], iteration_bounds = array<i64: 2>, scalar_prefetch = 0 : i64, scratch_operands = 0 : i64, tpu.core_type = #tpu.core_type<tc>, window_params = [{transform_indices = @transform_0, window_bounds = array<i64: 16, 64>}, {pipeline_mode = #tpu.pipeline_mode<synchronous>, transform_indices = @transform_1, window_bounds = array<i64: 32, 128>}, {pipeline_mode = #tpu.pipeline_mode<synchronous>, transform_indices = @transform_2, window_bounds = array<i64: 352, 128>}, {transform_indices = @transform_3, window_bounds = array<i64: 1, 4, 10>}, {transform_indices = @transform_4, window_bounds = array<i64: 1, 32, 5, 5>}]} {
    %c0 = arith.constant 0 : index
    %c0_0 = arith.constant 0 : index
    %0 = vector.load %arg1[%c0, %c0_0] : memref<16x64xf32, #tpu.memory_space<vmem>>, vector<16x64xf32>
    %c0_1 = arith.constant 0 : index
    %c0_2 = arith.constant 0 : index
    %1 = vector.load %arg2[%c0_1, %c0_2] : memref<32x128xf32, #tpu.memory_space<vmem>>, vector<1x64xf32>
    %c1 = arith.constant 1 : index
    %c0_3 = arith.constant 0 : index
    %2 = vector.load %arg2[%c1, %c0_3] : memref<32x128xf32, #tpu.memory_space<vmem>>, vector<1x64xf32>
    %cst = arith.constant dense<0.000000e+00> : vector<16xf32>
    %3 = vector.multi_reduction <add>, %0, %cst [1] : vector<16x64xf32> to vector<16xf32>
    %4 = vector.shape_cast %3 : vector<16xf32> to vector<16x1xf32>
    %cst_4 = arith.constant 6.400000e+01 : f32
    %5 = vector.broadcast %cst_4 : f32 to vector<16x1xf32>
    %6 = arith.divf %4, %5 : vector<16x1xf32>
    %7 = vector.broadcast %6 : vector<16x1xf32> to vector<16x64xf32>
    %8 = arith.subf %0, %7 : vector<16x64xf32>
    %9 = arith.mulf %8, %8 : vector<16x64xf32>
    %cst_5 = arith.constant dense<0.000000e+00> : vector<16xf32>
    %10 = vector.multi_reduction <add>, %9, %cst_5 [1] : vector<16x64xf32> to vector<16xf32>
    %11 = vector.shape_cast %10 : vector<16xf32> to vector<16x1xf32>
    %cst_6 = arith.constant 6.400000e+01 : f32
    %12 = vector.broadcast %cst_6 : f32 to vector<16x1xf32>
    %13 = arith.divf %11, %12 : vector<16x1xf32>
    %14 = vector.broadcast %6 : vector<16x1xf32> to vector<16x64xf32>
    %15 = arith.subf %0, %14 : vector<16x64xf32>
    %cst_7 = arith.constant 9.99999974E-6 : f32
    %16 = vector.broadcast %cst_7 : f32 to vector<16x1xf32>
    %17 = arith.addf %13, %16 : vector<16x1xf32>
    %18 = math.rsqrt %17 : vector<16x1xf32>
    %19 = vector.broadcast %18 : vector<16x1xf32> to vector<16x64xf32>
    %20 = arith.mulf %15, %19 : vector<16x64xf32>
    %21 = vector.broadcast %1 : vector<1x64xf32> to vector<16x64xf32>
    %22 = arith.mulf %20, %21 : vector<16x64xf32>
    %23 = vector.broadcast %2 : vector<1x64xf32> to vector<16x64xf32>
    %24 = arith.addf %22, %23 : vector<16x64xf32>
    %c0_8 = arith.constant 0 : index
    %c0_9 = arith.constant 0 : index
    %25 = vector.load %arg3[%c0_8, %c0_9] : memref<352x128xf32, #tpu.memory_space<vmem>>, vector<64x32xf32>
    %cst_10 = arith.constant dense<0.000000e+00> : vector<16x32xf32>
    %26 = tpu.matmul %24, %25, %cst_10 {dimension_numbers = #tpu.dot_dimension_numbers<[1], [0], [0], [1], [0, 0, 1, 1], [], []>} : vector<16x64xf32>, vector<64x32xf32>, vector<16x32xf32> -> vector<16x32xf32>
    %c2 = arith.constant 2 : index
    %c0_11 = arith.constant 0 : index
    %27 = vector.load %arg2[%c2, %c0_11] : memref<32x128xf32, #tpu.memory_space<vmem>>, vector<1x32xf32>
    %28 = vector.broadcast %27 : vector<1x32xf32> to vector<16x32xf32>
    %29 = arith.addf %26, %28 : vector<16x32xf32>
    %c3 = arith.constant 3 : index
    %c0_12 = arith.constant 0 : index
    %30 = vector.load %arg2[%c3, %c0_12] : memref<32x128xf32, #tpu.memory_space<vmem>>, vector<1x32xf32>
    %c4 = arith.constant 4 : index
    %c0_13 = arith.constant 0 : index
    %31 = vector.load %arg2[%c4, %c0_13] : memref<32x128xf32, #tpu.memory_space<vmem>>, vector<1x32xf32>
    %cst_14 = arith.constant dense<0.000000e+00> : vector<16xf32>
    %32 = vector.multi_reduction <add>, %29, %cst_14 [1] : vector<16x32xf32> to vector<16xf32>
    %33 = vector.shape_cast %32 : vector<16xf32> to vector<16x1xf32>
    %cst_15 = arith.constant 3.200000e+01 : f32
    %34 = vector.broadcast %cst_15 : f32 to vector<16x1xf32>
    %35 = arith.divf %33, %34 : vector<16x1xf32>
    %36 = vector.broadcast %35 : vector<16x1xf32> to vector<16x32xf32>
    %37 = arith.subf %29, %36 : vector<16x32xf32>
    %38 = arith.mulf %37, %37 : vector<16x32xf32>
    %cst_16 = arith.constant dense<0.000000e+00> : vector<16xf32>
    %39 = vector.multi_reduction <add>, %38, %cst_16 [1] : vector<16x32xf32> to vector<16xf32>
    %40 = vector.shape_cast %39 : vector<16xf32> to vector<16x1xf32>
    %cst_17 = arith.constant 3.200000e+01 : f32
    %41 = vector.broadcast %cst_17 : f32 to vector<16x1xf32>
    %42 = arith.divf %40, %41 : vector<16x1xf32>
    %43 = vector.broadcast %35 : vector<16x1xf32> to vector<16x32xf32>
    %44 = arith.subf %29, %43 : vector<16x32xf32>
    %cst_18 = arith.constant 9.99999974E-6 : f32
    %45 = vector.broadcast %cst_18 : f32 to vector<16x1xf32>
    %46 = arith.addf %42, %45 : vector<16x1xf32>
    %47 = math.rsqrt %46 : vector<16x1xf32>
    %48 = vector.broadcast %47 : vector<16x1xf32> to vector<16x32xf32>
    %49 = arith.mulf %44, %48 : vector<16x32xf32>
    %50 = vector.broadcast %30 : vector<1x32xf32> to vector<16x32xf32>
    %51 = arith.mulf %49, %50 : vector<16x32xf32>
    %52 = vector.broadcast %31 : vector<1x32xf32> to vector<16x32xf32>
    %53 = arith.addf %51, %52 : vector<16x32xf32>
    %c6 = arith.constant 6 : index
    %c0_19 = arith.constant 0 : index
    %54 = vector.load %arg2[%c6, %c0_19] : memref<32x128xf32, #tpu.memory_space<vmem>>, vector<5x32xf32>
    %c5 = arith.constant 5 : index
    %c0_20 = arith.constant 0 : index
    %55 = vector.load %arg2[%c5, %c0_20] : memref<32x128xf32, #tpu.memory_space<vmem>>, vector<1x32xf32>
    %56 = vector.extract_strided_slice %54 {offsets = [0, 0], sizes = [1, 32], strides = [1, 1]} : vector<5x32xf32> to vector<1x32xf32>
    %57 = arith.addf %55, %56 : vector<1x32xf32>
    %58 = vector.extract_strided_slice %54 {offsets = [1, 0], sizes = [4, 32], strides = [1, 1]} : vector<5x32xf32> to vector<4x32xf32>
    %59 = vector.extract_strided_slice %53 {offsets = [0, 0], sizes = [4, 32], strides = [1, 1]} : vector<16x32xf32> to vector<4x32xf32>
    %60 = arith.addf %59, %58 : vector<4x32xf32>
    %61 = vector.extract_strided_slice %53 {offsets = [4, 0], sizes = [4, 32], strides = [1, 1]} : vector<16x32xf32> to vector<4x32xf32>
    %62 = arith.addf %61, %58 : vector<4x32xf32>
    %63 = vector.extract_strided_slice %53 {offsets = [8, 0], sizes = [4, 32], strides = [1, 1]} : vector<16x32xf32> to vector<4x32xf32>
    %64 = arith.addf %63, %58 : vector<4x32xf32>
    %65 = vector.extract_strided_slice %53 {offsets = [12, 0], sizes = [4, 32], strides = [1, 1]} : vector<16x32xf32> to vector<4x32xf32>
    %66 = arith.addf %65, %58 : vector<4x32xf32>
    %67 = tpu.concatenate %57, %60, %57, %62, %57, %64, %57, %66 in 0 : vector<1x32xf32>, vector<4x32xf32>, vector<1x32xf32>, vector<4x32xf32>, vector<1x32xf32>, vector<4x32xf32>, vector<1x32xf32>, vector<4x32xf32> -> vector<20x32xf32>
    %c14 = arith.constant 14 : index
    %c0_21 = arith.constant 0 : index
    %68 = vector.load %arg2[%c14, %c0_21] : memref<32x128xf32, #tpu.memory_space<vmem>>, vector<1x32xf32>
    %c15 = arith.constant 15 : index
    %c0_22 = arith.constant 0 : index
    %69 = vector.load %arg2[%c15, %c0_22] : memref<32x128xf32, #tpu.memory_space<vmem>>, vector<1x32xf32>
    %cst_23 = arith.constant dense<0.000000e+00> : vector<20xf32>
    %70 = vector.multi_reduction <add>, %67, %cst_23 [1] : vector<20x32xf32> to vector<20xf32>
    %71 = vector.shape_cast %70 : vector<20xf32> to vector<20x1xf32>
    %cst_24 = arith.constant 3.200000e+01 : f32
    %72 = vector.broadcast %cst_24 : f32 to vector<20x1xf32>
    %73 = arith.divf %71, %72 : vector<20x1xf32>
    %74 = vector.broadcast %73 : vector<20x1xf32> to vector<20x32xf32>
    %75 = arith.subf %67, %74 : vector<20x32xf32>
    %76 = arith.mulf %75, %75 : vector<20x32xf32>
    %cst_25 = arith.constant dense<0.000000e+00> : vector<20xf32>
    %77 = vector.multi_reduction <add>, %76, %cst_25 [1] : vector<20x32xf32> to vector<20xf32>
    %78 = vector.shape_cast %77 : vector<20xf32> to vector<20x1xf32>
    %cst_26 = arith.constant 3.200000e+01 : f32
    %79 = vector.broadcast %cst_26 : f32 to vector<20x1xf32>
    %80 = arith.divf %78, %79 : vector<20x1xf32>
    %81 = vector.broadcast %73 : vector<20x1xf32> to vector<20x32xf32>
    %82 = arith.subf %67, %81 : vector<20x32xf32>
    %cst_27 = arith.constant 9.99999974E-6 : f32
    %83 = vector.broadcast %cst_27 : f32 to vector<20x1xf32>
    %84 = arith.addf %80, %83 : vector<20x1xf32>
    %85 = math.rsqrt %84 : vector<20x1xf32>
    %86 = vector.broadcast %85 : vector<20x1xf32> to vector<20x32xf32>
    %87 = arith.mulf %82, %86 : vector<20x32xf32>
    %88 = vector.broadcast %68 : vector<1x32xf32> to vector<20x32xf32>
    %89 = arith.mulf %87, %88 : vector<20x32xf32>
    %90 = vector.broadcast %69 : vector<1x32xf32> to vector<20x32xf32>
    %91 = arith.addf %89, %90 : vector<20x32xf32>
    %c96 = arith.constant 96 : index
    %c0_28 = arith.constant 0 : index
    %92 = vector.load %arg3[%c96, %c0_28] : memref<352x128xf32, #tpu.memory_space<vmem>>, vector<32x96xf32>
    %cst_29 = arith.constant dense<0.000000e+00> : vector<20x96xf32>
    %93 = tpu.matmul %91, %92, %cst_29 {dimension_numbers = #tpu.dot_dimension_numbers<[1], [0], [0], [1], [0, 0, 1, 1], [], []>} : vector<20x32xf32>, vector<32x96xf32>, vector<20x96xf32> -> vector<20x96xf32>
    %94 = vector.extract_strided_slice %93 {offsets = [0, 0], sizes = [5, 8], strides = [1, 1]} : vector<20x96xf32> to vector<5x8xf32>
    %95 = vector.extract_strided_slice %93 {offsets = [0, 8], sizes = [5, 8], strides = [1, 1]} : vector<20x96xf32> to vector<5x8xf32>
    %96 = vector.extract_strided_slice %93 {offsets = [0, 16], sizes = [5, 8], strides = [1, 1]} : vector<20x96xf32> to vector<5x8xf32>
    %97 = vector.extract_strided_slice %93 {offsets = [0, 24], sizes = [5, 8], strides = [1, 1]} : vector<20x96xf32> to vector<5x8xf32>
    %98 = vector.extract_strided_slice %93 {offsets = [5, 0], sizes = [5, 8], strides = [1, 1]} : vector<20x96xf32> to vector<5x8xf32>
    %99 = vector.extract_strided_slice %93 {offsets = [5, 8], sizes = [5, 8], strides = [1, 1]} : vector<20x96xf32> to vector<5x8xf32>
    %100 = vector.extract_strided_slice %93 {offsets = [5, 16], sizes = [5, 8], strides = [1, 1]} : vector<20x96xf32> to vector<5x8xf32>
    %101 = vector.extract_strided_slice %93 {offsets = [5, 24], sizes = [5, 8], strides = [1, 1]} : vector<20x96xf32> to vector<5x8xf32>
    %102 = vector.extract_strided_slice %93 {offsets = [10, 0], sizes = [5, 8], strides = [1, 1]} : vector<20x96xf32> to vector<5x8xf32>
    %103 = vector.extract_strided_slice %93 {offsets = [10, 8], sizes = [5, 8], strides = [1, 1]} : vector<20x96xf32> to vector<5x8xf32>
    %104 = vector.extract_strided_slice %93 {offsets = [10, 16], sizes = [5, 8], strides = [1, 1]} : vector<20x96xf32> to vector<5x8xf32>
    %105 = vector.extract_strided_slice %93 {offsets = [10, 24], sizes = [5, 8], strides = [1, 1]} : vector<20x96xf32> to vector<5x8xf32>
    %106 = vector.extract_strided_slice %93 {offsets = [15, 0], sizes = [5, 8], strides = [1, 1]} : vector<20x96xf32> to vector<5x8xf32>
    %107 = vector.extract_strided_slice %93 {offsets = [15, 8], sizes = [5, 8], strides = [1, 1]} : vector<20x96xf32> to vector<5x8xf32>
    %108 = vector.extract_strided_slice %93 {offsets = [15, 16], sizes = [5, 8], strides = [1, 1]} : vector<20x96xf32> to vector<5x8xf32>
    %109 = vector.extract_strided_slice %93 {offsets = [15, 24], sizes = [5, 8], strides = [1, 1]} : vector<20x96xf32> to vector<5x8xf32>
    %110 = vector.shape_cast %94 : vector<5x8xf32> to vector<1x5x8xf32>
    %111 = vector.shape_cast %95 : vector<5x8xf32> to vector<1x5x8xf32>
    %112 = vector.shape_cast %96 : vector<5x8xf32> to vector<1x5x8xf32>
    %113 = vector.shape_cast %97 : vector<5x8xf32> to vector<1x5x8xf32>
    %114 = vector.shape_cast %98 : vector<5x8xf32> to vector<1x5x8xf32>
    %115 = vector.shape_cast %99 : vector<5x8xf32> to vector<1x5x8xf32>
    %116 = vector.shape_cast %100 : vector<5x8xf32> to vector<1x5x8xf32>
    %117 = vector.shape_cast %101 : vector<5x8xf32> to vector<1x5x8xf32>
    %118 = vector.shape_cast %102 : vector<5x8xf32> to vector<1x5x8xf32>
    %119 = vector.shape_cast %103 : vector<5x8xf32> to vector<1x5x8xf32>
    %120 = vector.shape_cast %104 : vector<5x8xf32> to vector<1x5x8xf32>
    %121 = vector.shape_cast %105 : vector<5x8xf32> to vector<1x5x8xf32>
    %122 = vector.shape_cast %106 : vector<5x8xf32> to vector<1x5x8xf32>
    %123 = vector.shape_cast %107 : vector<5x8xf32> to vector<1x5x8xf32>
    %124 = vector.shape_cast %108 : vector<5x8xf32> to vector<1x5x8xf32>
    %125 = vector.shape_cast %109 : vector<5x8xf32> to vector<1x5x8xf32>
    %126 = tpu.concatenate %110, %111, %112, %113, %114, %115, %116, %117, %118, %119, %120, %121, %122, %123, %124, %125 in 0 : vector<1x5x8xf32>, vector<1x5x8xf32>, vector<1x5x8xf32>, vector<1x5x8xf32>, vector<1x5x8xf32>, vector<1x5x8xf32>, vector<1x5x8xf32>, vector<1x5x8xf32>, vector<1x5x8xf32>, vector<1x5x8xf32>, vector<1x5x8xf32>, vector<1x5x8xf32>, vector<1x5x8xf32>, vector<1x5x8xf32>, vector<1x5x8xf32>, vector<1x5x8xf32> -> vector<16x5x8xf32>
    %127 = vector.extract_strided_slice %93 {offsets = [0, 32], sizes = [5, 8], strides = [1, 1]} : vector<20x96xf32> to vector<5x8xf32>
    %128 = vector.extract_strided_slice %93 {offsets = [0, 40], sizes = [5, 8], strides = [1, 1]} : vector<20x96xf32> to vector<5x8xf32>
    %129 = vector.extract_strided_slice %93 {offsets = [0, 48], sizes = [5, 8], strides = [1, 1]} : vector<20x96xf32> to vector<5x8xf32>
    %130 = vector.extract_strided_slice %93 {offsets = [0, 56], sizes = [5, 8], strides = [1, 1]} : vector<20x96xf32> to vector<5x8xf32>
    %131 = vector.extract_strided_slice %93 {offsets = [5, 32], sizes = [5, 8], strides = [1, 1]} : vector<20x96xf32> to vector<5x8xf32>
    %132 = vector.extract_strided_slice %93 {offsets = [5, 40], sizes = [5, 8], strides = [1, 1]} : vector<20x96xf32> to vector<5x8xf32>
    %133 = vector.extract_strided_slice %93 {offsets = [5, 48], sizes = [5, 8], strides = [1, 1]} : vector<20x96xf32> to vector<5x8xf32>
    %134 = vector.extract_strided_slice %93 {offsets = [5, 56], sizes = [5, 8], strides = [1, 1]} : vector<20x96xf32> to vector<5x8xf32>
    %135 = vector.extract_strided_slice %93 {offsets = [10, 32], sizes = [5, 8], strides = [1, 1]} : vector<20x96xf32> to vector<5x8xf32>
    %136 = vector.extract_strided_slice %93 {offsets = [10, 40], sizes = [5, 8], strides = [1, 1]} : vector<20x96xf32> to vector<5x8xf32>
    %137 = vector.extract_strided_slice %93 {offsets = [10, 48], sizes = [5, 8], strides = [1, 1]} : vector<20x96xf32> to vector<5x8xf32>
    %138 = vector.extract_strided_slice %93 {offsets = [10, 56], sizes = [5, 8], strides = [1, 1]} : vector<20x96xf32> to vector<5x8xf32>
    %139 = vector.extract_strided_slice %93 {offsets = [15, 32], sizes = [5, 8], strides = [1, 1]} : vector<20x96xf32> to vector<5x8xf32>
    %140 = vector.extract_strided_slice %93 {offsets = [15, 40], sizes = [5, 8], strides = [1, 1]} : vector<20x96xf32> to vector<5x8xf32>
    %141 = vector.extract_strided_slice %93 {offsets = [15, 48], sizes = [5, 8], strides = [1, 1]} : vector<20x96xf32> to vector<5x8xf32>
    %142 = vector.extract_strided_slice %93 {offsets = [15, 56], sizes = [5, 8], strides = [1, 1]} : vector<20x96xf32> to vector<5x8xf32>
    %143 = vector.shape_cast %127 : vector<5x8xf32> to vector<1x5x8xf32>
    %144 = vector.shape_cast %128 : vector<5x8xf32> to vector<1x5x8xf32>
    %145 = vector.shape_cast %129 : vector<5x8xf32> to vector<1x5x8xf32>
    %146 = vector.shape_cast %130 : vector<5x8xf32> to vector<1x5x8xf32>
    %147 = vector.shape_cast %131 : vector<5x8xf32> to vector<1x5x8xf32>
    %148 = vector.shape_cast %132 : vector<5x8xf32> to vector<1x5x8xf32>
    %149 = vector.shape_cast %133 : vector<5x8xf32> to vector<1x5x8xf32>
    %150 = vector.shape_cast %134 : vector<5x8xf32> to vector<1x5x8xf32>
    %151 = vector.shape_cast %135 : vector<5x8xf32> to vector<1x5x8xf32>
    %152 = vector.shape_cast %136 : vector<5x8xf32> to vector<1x5x8xf32>
    %153 = vector.shape_cast %137 : vector<5x8xf32> to vector<1x5x8xf32>
    %154 = vector.shape_cast %138 : vector<5x8xf32> to vector<1x5x8xf32>
    %155 = vector.shape_cast %139 : vector<5x8xf32> to vector<1x5x8xf32>
    %156 = vector.shape_cast %140 : vector<5x8xf32> to vector<1x5x8xf32>
    %157 = vector.shape_cast %141 : vector<5x8xf32> to vector<1x5x8xf32>
    %158 = vector.shape_cast %142 : vector<5x8xf32> to vector<1x5x8xf32>
    %159 = tpu.concatenate %143, %144, %145, %146, %147, %148, %149, %150, %151, %152, %153, %154, %155, %156, %157, %158 in 0 : vector<1x5x8xf32>, vector<1x5x8xf32>, vector<1x5x8xf32>, vector<1x5x8xf32>, vector<1x5x8xf32>, vector<1x5x8xf32>, vector<1x5x8xf32>, vector<1x5x8xf32>, vector<1x5x8xf32>, vector<1x5x8xf32>, vector<1x5x8xf32>, vector<1x5x8xf32>, vector<1x5x8xf32>, vector<1x5x8xf32>, vector<1x5x8xf32>, vector<1x5x8xf32> -> vector<16x5x8xf32>
    %160 = vector.extract_strided_slice %93 {offsets = [0, 64], sizes = [5, 8], strides = [1, 1]} : vector<20x96xf32> to vector<5x8xf32>
    %161 = vector.extract_strided_slice %93 {offsets = [0, 72], sizes = [5, 8], strides = [1, 1]} : vector<20x96xf32> to vector<5x8xf32>
    %162 = vector.extract_strided_slice %93 {offsets = [0, 80], sizes = [5, 8], strides = [1, 1]} : vector<20x96xf32> to vector<5x8xf32>
    %163 = vector.extract_strided_slice %93 {offsets = [0, 88], sizes = [5, 8], strides = [1, 1]} : vector<20x96xf32> to vector<5x8xf32>
    %164 = vector.extract_strided_slice %93 {offsets = [5, 64], sizes = [5, 8], strides = [1, 1]} : vector<20x96xf32> to vector<5x8xf32>
    %165 = vector.extract_strided_slice %93 {offsets = [5, 72], sizes = [5, 8], strides = [1, 1]} : vector<20x96xf32> to vector<5x8xf32>
    %166 = vector.extract_strided_slice %93 {offsets = [5, 80], sizes = [5, 8], strides = [1, 1]} : vector<20x96xf32> to vector<5x8xf32>
    %167 = vector.extract_strided_slice %93 {offsets = [5, 88], sizes = [5, 8], strides = [1, 1]} : vector<20x96xf32> to vector<5x8xf32>
    %168 = vector.extract_strided_slice %93 {offsets = [10, 64], sizes = [5, 8], strides = [1, 1]} : vector<20x96xf32> to vector<5x8xf32>
    %169 = vector.extract_strided_slice %93 {offsets = [10, 72], sizes = [5, 8], strides = [1, 1]} : vector<20x96xf32> to vector<5x8xf32>
    %170 = vector.extract_strided_slice %93 {offsets = [10, 80], sizes = [5, 8], strides = [1, 1]} : vector<20x96xf32> to vector<5x8xf32>
    %171 = vector.extract_strided_slice %93 {offsets = [10, 88], sizes = [5, 8], strides = [1, 1]} : vector<20x96xf32> to vector<5x8xf32>
    %172 = vector.extract_strided_slice %93 {offsets = [15, 64], sizes = [5, 8], strides = [1, 1]} : vector<20x96xf32> to vector<5x8xf32>
    %173 = vector.extract_strided_slice %93 {offsets = [15, 72], sizes = [5, 8], strides = [1, 1]} : vector<20x96xf32> to vector<5x8xf32>
    %174 = vector.extract_strided_slice %93 {offsets = [15, 80], sizes = [5, 8], strides = [1, 1]} : vector<20x96xf32> to vector<5x8xf32>
    %175 = vector.extract_strided_slice %93 {offsets = [15, 88], sizes = [5, 8], strides = [1, 1]} : vector<20x96xf32> to vector<5x8xf32>
    %176 = vector.shape_cast %160 : vector<5x8xf32> to vector<1x5x8xf32>
    %177 = vector.shape_cast %161 : vector<5x8xf32> to vector<1x5x8xf32>
    %178 = vector.shape_cast %162 : vector<5x8xf32> to vector<1x5x8xf32>
    %179 = vector.shape_cast %163 : vector<5x8xf32> to vector<1x5x8xf32>
    %180 = vector.shape_cast %164 : vector<5x8xf32> to vector<1x5x8xf32>
    %181 = vector.shape_cast %165 : vector<5x8xf32> to vector<1x5x8xf32>
    %182 = vector.shape_cast %166 : vector<5x8xf32> to vector<1x5x8xf32>
    %183 = vector.shape_cast %167 : vector<5x8xf32> to vector<1x5x8xf32>
    %184 = vector.shape_cast %168 : vector<5x8xf32> to vector<1x5x8xf32>
    %185 = vector.shape_cast %169 : vector<5x8xf32> to vector<1x5x8xf32>
    %186 = vector.shape_cast %170 : vector<5x8xf32> to vector<1x5x8xf32>
    %187 = vector.shape_cast %171 : vector<5x8xf32> to vector<1x5x8xf32>
    %188 = vector.shape_cast %172 : vector<5x8xf32> to vector<1x5x8xf32>
    %189 = vector.shape_cast %173 : vector<5x8xf32> to vector<1x5x8xf32>
    %190 = vector.shape_cast %174 : vector<5x8xf32> to vector<1x5x8xf32>
    %191 = vector.shape_cast %175 : vector<5x8xf32> to vector<1x5x8xf32>
    %192 = tpu.concatenate %176, %177, %178, %179, %180, %181, %182, %183, %184, %185, %186, %187, %188, %189, %190, %191 in 0 : vector<1x5x8xf32>, vector<1x5x8xf32>, vector<1x5x8xf32>, vector<1x5x8xf32>, vector<1x5x8xf32>, vector<1x5x8xf32>, vector<1x5x8xf32>, vector<1x5x8xf32>, vector<1x5x8xf32>, vector<1x5x8xf32>, vector<1x5x8xf32>, vector<1x5x8xf32>, vector<1x5x8xf32>, vector<1x5x8xf32>, vector<1x5x8xf32>, vector<1x5x8xf32> -> vector<16x5x8xf32>
    "tpu.trace_start"() <{level = 10 : i32, message = "znd,zmd->znm"}> : () -> ()
    %cst_30 = arith.constant dense<0.000000e+00> : vector<16x5x5xf32>
    %193 = tpu.matmul %126, %159, %cst_30 {dimension_numbers = #tpu.dot_dimension_numbers<[2], [2], [1], [1], [0, 0, 0, 1, 1, 1], [0], [0]>} : vector<16x5x8xf32>, vector<16x5x8xf32>, vector<16x5x5xf32> -> vector<16x5x5xf32>
    "tpu.trace_stop"() : () -> ()
    %cst_31 = arith.constant dense<0xFF800000> : vector<16x5xf32>
    %194 = vector.multi_reduction <maximumf>, %193, %cst_31 [2] : vector<16x5x5xf32> to vector<16x5xf32>
    %195 = vector.shape_cast %194 : vector<16x5xf32> to vector<16x5x1xf32>
    %196 = vector.broadcast %195 : vector<16x5x1xf32> to vector<16x5x5xf32>
    %197 = arith.subf %193, %196 : vector<16x5x5xf32>
    %198 = math.exp %197 : vector<16x5x5xf32>
    %cst_32 = arith.constant dense<0.000000e+00> : vector<16x5xf32>
    %199 = vector.multi_reduction <add>, %198, %cst_32 [2] : vector<16x5x5xf32> to vector<16x5xf32>
    %200 = vector.shape_cast %199 : vector<16x5xf32> to vector<16x5x1xf32>
    %201 = tpu.reciprocal %200 {approx = true} : vector<16x5x1xf32> -> vector<16x5x1xf32>
    %202 = vector.broadcast %201 : vector<16x5x1xf32> to vector<16x5x5xf32>
    %203 = arith.mulf %198, %202 : vector<16x5x5xf32>
    %c0_33 = arith.constant 0 : index
    %c0_34 = arith.constant 0 : index
    %c0_35 = arith.constant 0 : index
    %c0_36 = arith.constant 0 : index
    %204 = vector.load %arg5[%c0_33, %c0_34, %c0_35, %c0_36] : memref<1x32x5x5xf32, #tpu.memory_space<vmem>>, vector<1x16x5x5xf32>
    %205 = vector.shape_cast %204 : vector<1x16x5x5xf32> to vector<16x5x5xf32>
    %206 = vector.shape_cast %203 : vector<16x5x5xf32> to vector<1x16x5x5xf32>
    tpu.vector_store %arg5[%c0_33, %c0_34, %c0_35, %c0_36], %206 {strides = array<i32>} : memref<1x32x5x5xf32, #tpu.memory_space<vmem>>, vector<1x16x5x5xf32>,
    "tpu.trace_start"() <{level = 10 : i32, message = "znm,zmd->znd"}> : () -> ()
    %cst_37 = arith.constant dense<0.000000e+00> : vector<16x5x8xf32>
    %207 = tpu.matmul %203, %192, %cst_37 {dimension_numbers = #tpu.dot_dimension_numbers<[2], [1], [1], [2], [0, 0, 0, 1, 1, 2], [0], [0]>} : vector<16x5x5xf32>, vector<16x5x8xf32>, vector<16x5x8xf32> -> vector<16x5x8xf32>
    "tpu.trace_stop"() : () -> ()
    %208 = vector.extract_strided_slice %207 {offsets = [0, 0, 0], sizes = [1, 5, 8], strides = [1, 1, 1]} : vector<16x5x8xf32> to vector<1x5x8xf32>
    %209 = vector.shape_cast %208 : vector<1x5x8xf32> to vector<5x8xf32>
    %210 = vector.extract_strided_slice %207 {offsets = [1, 0, 0], sizes = [1, 5, 8], strides = [1, 1, 1]} : vector<16x5x8xf32> to vector<1x5x8xf32>
    %211 = vector.shape_cast %210 : vector<1x5x8xf32> to vector<5x8xf32>
    %212 = vector.extract_strided_slice %207 {offsets = [2, 0, 0], sizes = [1, 5, 8], strides = [1, 1, 1]} : vector<16x5x8xf32> to vector<1x5x8xf32>
    %213 = vector.shape_cast %212 : vector<1x5x8xf32> to vector<5x8xf32>
    %214 = vector.extract_strided_slice %207 {offsets = [3, 0, 0], sizes = [1, 5, 8], strides = [1, 1, 1]} : vector<16x5x8xf32> to vector<1x5x8xf32>
    %215 = vector.shape_cast %214 : vector<1x5x8xf32> to vector<5x8xf32>
    %216 = tpu.concatenate %209, %211, %213, %215 in 1 : vector<5x8xf32>, vector<5x8xf32>, vector<5x8xf32>, vector<5x8xf32> -> vector<5x32xf32>
    %217 = vector.extract_strided_slice %207 {offsets = [4, 0, 0], sizes = [1, 5, 8], strides = [1, 1, 1]} : vector<16x5x8xf32> to vector<1x5x8xf32>
    %218 = vector.shape_cast %217 : vector<1x5x8xf32> to vector<5x8xf32>
    %219 = vector.extract_strided_slice %207 {offsets = [5, 0, 0], sizes = [1, 5, 8], strides = [1, 1, 1]} : vector<16x5x8xf32> to vector<1x5x8xf32>
    %220 = vector.shape_cast %219 : vector<1x5x8xf32> to vector<5x8xf32>
    %221 = vector.extract_strided_slice %207 {offsets = [6, 0, 0], sizes = [1, 5, 8], strides = [1, 1, 1]} : vector<16x5x8xf32> to vector<1x5x8xf32>
    %222 = vector.shape_cast %221 : vector<1x5x8xf32> to vector<5x8xf32>
    %223 = vector.extract_strided_slice %207 {offsets = [7, 0, 0], sizes = [1, 5, 8], strides = [1, 1, 1]} : vector<16x5x8xf32> to vector<1x5x8xf32>
    %224 = vector.shape_cast %223 : vector<1x5x8xf32> to vector<5x8xf32>
    %225 = tpu.concatenate %218, %220, %222, %224 in 1 : vector<5x8xf32>, vector<5x8xf32>, vector<5x8xf32>, vector<5x8xf32> -> vector<5x32xf32>
    %226 = vector.extract_strided_slice %207 {offsets = [8, 0, 0], sizes = [1, 5, 8], strides = [1, 1, 1]} : vector<16x5x8xf32> to vector<1x5x8xf32>
    %227 = vector.shape_cast %226 : vector<1x5x8xf32> to vector<5x8xf32>
    %228 = vector.extract_strided_slice %207 {offsets = [9, 0, 0], sizes = [1, 5, 8], strides = [1, 1, 1]} : vector<16x5x8xf32> to vector<1x5x8xf32>
    %229 = vector.shape_cast %228 : vector<1x5x8xf32> to vector<5x8xf32>
    %230 = vector.extract_strided_slice %207 {offsets = [10, 0, 0], sizes = [1, 5, 8], strides = [1, 1, 1]} : vector<16x5x8xf32> to vector<1x5x8xf32>
    %231 = vector.shape_cast %230 : vector<1x5x8xf32> to vector<5x8xf32>
    %232 = vector.extract_strided_slice %207 {offsets = [11, 0, 0], sizes = [1, 5, 8], strides = [1, 1, 1]} : vector<16x5x8xf32> to vector<1x5x8xf32>
    %233 = vector.shape_cast %232 : vector<1x5x8xf32> to vector<5x8xf32>
    %234 = tpu.concatenate %227, %229, %231, %233 in 1 : vector<5x8xf32>, vector<5x8xf32>, vector<5x8xf32>, vector<5x8xf32> -> vector<5x32xf32>
    %235 = vector.extract_strided_slice %207 {offsets = [12, 0, 0], sizes = [1, 5, 8], strides = [1, 1, 1]} : vector<16x5x8xf32> to vector<1x5x8xf32>
    %236 = vector.shape_cast %235 : vector<1x5x8xf32> to vector<5x8xf32>
    %237 = vector.extract_strided_slice %207 {offsets = [13, 0, 0], sizes = [1, 5, 8], strides = [1, 1, 1]} : vector<16x5x8xf32> to vector<1x5x8xf32>
    %238 = vector.shape_cast %237 : vector<1x5x8xf32> to vector<5x8xf32>
    %239 = vector.extract_strided_slice %207 {offsets = [14, 0, 0], sizes = [1, 5, 8], strides = [1, 1, 1]} : vector<16x5x8xf32> to vector<1x5x8xf32>
    %240 = vector.shape_cast %239 : vector<1x5x8xf32> to vector<5x8xf32>
    %241 = vector.extract_strided_slice %207 {offsets = [15, 0, 0], sizes = [1, 5, 8], strides = [1, 1, 1]} : vector<16x5x8xf32> to vector<1x5x8xf32>
    %242 = vector.shape_cast %241 : vector<1x5x8xf32> to vector<5x8xf32>
    %243 = tpu.concatenate %236, %238, %240, %242 in 1 : vector<5x8xf32>, vector<5x8xf32>, vector<5x8xf32>, vector<5x8xf32> -> vector<5x32xf32>
    %244 = tpu.concatenate %216, %225, %234, %243 in 0 : vector<5x32xf32>, vector<5x32xf32>, vector<5x32xf32>, vector<5x32xf32> -> vector<20x32xf32>
    %c128 = arith.constant 128 : index
    %c0_38 = arith.constant 0 : index
    %245 = vector.load %arg3[%c128, %c0_38] : memref<352x128xf32, #tpu.memory_space<vmem>>, vector<32x32xf32>
    %cst_39 = arith.constant dense<0.000000e+00> : vector<20x32xf32>
    %246 = tpu.matmul %244, %245, %cst_39 {dimension_numbers = #tpu.dot_dimension_numbers<[1], [0], [0], [1], [0, 0, 1, 1], [], []>} : vector<20x32xf32>, vector<32x32xf32>, vector<20x32xf32> -> vector<20x32xf32>
    %247 = arith.addf %67, %246 : vector<20x32xf32>
    %c16 = arith.constant 16 : index
    %c0_40 = arith.constant 0 : index
    %248 = vector.load %arg2[%c16, %c0_40] : memref<32x128xf32, #tpu.memory_space<vmem>>, vector<1x32xf32>
    %249 = vector.broadcast %248 : vector<1x32xf32> to vector<20x32xf32>
    %250 = arith.addf %247, %249 : vector<20x32xf32>
    %c17 = arith.constant 17 : index
    %c0_41 = arith.constant 0 : index
    %251 = vector.load %arg2[%c17, %c0_41] : memref<32x128xf32, #tpu.memory_space<vmem>>, vector<1x32xf32>
    %c18 = arith.constant 18 : index
    %c0_42 = arith.constant 0 : index
    %252 = vector.load %arg2[%c18, %c0_42] : memref<32x128xf32, #tpu.memory_space<vmem>>, vector<1x32xf32>
    %cst_43 = arith.constant dense<0.000000e+00> : vector<20xf32>
    %253 = vector.multi_reduction <add>, %250, %cst_43 [1] : vector<20x32xf32> to vector<20xf32>
    %254 = vector.shape_cast %253 : vector<20xf32> to vector<20x1xf32>
    %cst_44 = arith.constant 3.200000e+01 : f32
    %255 = vector.broadcast %cst_44 : f32 to vector<20x1xf32>
    %256 = arith.divf %254, %255 : vector<20x1xf32>
    %257 = vector.broadcast %256 : vector<20x1xf32> to vector<20x32xf32>
    %258 = arith.subf %250, %257 : vector<20x32xf32>
    %259 = arith.mulf %258, %258 : vector<20x32xf32>
    %cst_45 = arith.constant dense<0.000000e+00> : vector<20xf32>
    %260 = vector.multi_reduction <add>, %259, %cst_45 [1] : vector<20x32xf32> to vector<20xf32>
    %261 = vector.shape_cast %260 : vector<20xf32> to vector<20x1xf32>
    %cst_46 = arith.constant 3.200000e+01 : f32
    %262 = vector.broadcast %cst_46 : f32 to vector<20x1xf32>
    %263 = arith.divf %261, %262 : vector<20x1xf32>
    %264 = vector.broadcast %256 : vector<20x1xf32> to vector<20x32xf32>
    %265 = arith.subf %250, %264 : vector<20x32xf32>
    %cst_47 = arith.constant 9.99999974E-6 : f32
    %266 = vector.broadcast %cst_47 : f32 to vector<20x1xf32>
    %267 = arith.addf %263, %266 : vector<20x1xf32>
    %268 = math.rsqrt %267 : vector<20x1xf32>
    %269 = vector.broadcast %268 : vector<20x1xf32> to vector<20x32xf32>
    %270 = arith.mulf %265, %269 : vector<20x32xf32>
    %271 = vector.broadcast %251 : vector<1x32xf32> to vector<20x32xf32>
    %272 = arith.mulf %270, %271 : vector<20x32xf32>
    %273 = vector.broadcast %252 : vector<1x32xf32> to vector<20x32xf32>
    %274 = arith.addf %272, %273 : vector<20x32xf32>
    %c160 = arith.constant 160 : index
    %c0_48 = arith.constant 0 : index
    %275 = vector.load %arg3[%c160, %c0_48] : memref<352x128xf32, #tpu.memory_space<vmem>>, vector<32x32xf32>
    %cst_49 = arith.constant dense<0.000000e+00> : vector<20x32xf32>
    %276 = tpu.matmul %274, %275, %cst_49 {dimension_numbers = #tpu.dot_dimension_numbers<[1], [0], [0], [1], [0, 0, 1, 1], [], []>} : vector<20x32xf32>, vector<32x32xf32>, vector<20x32xf32> -> vector<20x32xf32>
    %c19 = arith.constant 19 : index
    %c0_50 = arith.constant 0 : index
    %277 = vector.load %arg2[%c19, %c0_50] : memref<32x128xf32, #tpu.memory_space<vmem>>, vector<1x32xf32>
    %278 = vector.broadcast %277 : vector<1x32xf32> to vector<20x32xf32>
    %279 = arith.addf %276, %278 : vector<20x32xf32>
    %cst_51 = arith.constant 5.000000e-01 : f32
    %280 = vector.broadcast %cst_51 : f32 to vector<20x32xf32>
    %281 = arith.mulf %280, %279 : vector<20x32xf32>
    %cst_52 = arith.constant 0.707106769 : f32
    %282 = vector.broadcast %cst_52 : f32 to vector<20x32xf32>
    %283 = arith.mulf %279, %282 : vector<20x32xf32>
    %284 = math.erf %283 : vector<20x32xf32>
    %cst_53 = arith.constant 1.000000e+00 : f32
    %285 = vector.broadcast %cst_53 : f32 to vector<20x32xf32>
    %286 = arith.addf %285, %284 : vector<20x32xf32>
    %287 = arith.mulf %281, %286 : vector<20x32xf32>
    %c192 = arith.constant 192 : index
    %c0_54 = arith.constant 0 : index
    %288 = vector.load %arg3[%c192, %c0_54] : memref<352x128xf32, #tpu.memory_space<vmem>>, vector<32x32xf32>
    %cst_55 = arith.constant dense<0.000000e+00> : vector<20x32xf32>
    %289 = tpu.matmul %287, %288, %cst_55 {dimension_numbers = #tpu.dot_dimension_numbers<[1], [0], [0], [1], [0, 0, 1, 1], [], []>} : vector<20x32xf32>, vector<32x32xf32>, vector<20x32xf32> -> vector<20x32xf32>
    %290 = arith.addf %250, %289 : vector<20x32xf32>
    %c20 = arith.constant 20 : index
    %c0_56 = arith.constant 0 : index
    %291 = vector.load %arg2[%c20, %c0_56] : memref<32x128xf32, #tpu.memory_space<vmem>>, vector<1x32xf32>
    %292 = vector.broadcast %291 : vector<1x32xf32> to vector<20x32xf32>
    %293 = arith.addf %290, %292 : vector<20x32xf32>
    %c21 = arith.constant 21 : index
    %c0_57 = arith.constant 0 : index
    %294 = vector.load %arg2[%c21, %c0_57] : memref<32x128xf32, #tpu.memory_space<vmem>>, vector<1x32xf32>
    %c22 = arith.constant 22 : index
    %c0_58 = arith.constant 0 : index
    %295 = vector.load %arg2[%c22, %c0_58] : memref<32x128xf32, #tpu.memory_space<vmem>>, vector<1x32xf32>
    %cst_59 = arith.constant dense<0.000000e+00> : vector<20xf32>
    %296 = vector.multi_reduction <add>, %293, %cst_59 [1] : vector<20x32xf32> to vector<20xf32>
    %297 = vector.shape_cast %296 : vector<20xf32> to vector<20x1xf32>
    %cst_60 = arith.constant 3.200000e+01 : f32
    %298 = vector.broadcast %cst_60 : f32 to vector<20x1xf32>
    %299 = arith.divf %297, %298 : vector<20x1xf32>
    %300 = vector.broadcast %299 : vector<20x1xf32> to vector<20x32xf32>
    %301 = arith.subf %293, %300 : vector<20x32xf32>
    %302 = arith.mulf %301, %301 : vector<20x32xf32>
    %cst_61 = arith.constant dense<0.000000e+00> : vector<20xf32>
    %303 = vector.multi_reduction <add>, %302, %cst_61 [1] : vector<20x32xf32> to vector<20xf32>
    %304 = vector.shape_cast %303 : vector<20xf32> to vector<20x1xf32>
    %cst_62 = arith.constant 3.200000e+01 : f32
    %305 = vector.broadcast %cst_62 : f32 to vector<20x1xf32>
    %306 = arith.divf %304, %305 : vector<20x1xf32>
    %307 = vector.broadcast %299 : vector<20x1xf32> to vector<20x32xf32>
    %308 = arith.subf %293, %307 : vector<20x32xf32>
    %cst_63 = arith.constant 9.99999974E-6 : f32
    %309 = vector.broadcast %cst_63 : f32 to vector<20x1xf32>
    %310 = arith.addf %306, %309 : vector<20x1xf32>
    %311 = math.rsqrt %310 : vector<20x1xf32>
    %312 = vector.broadcast %311 : vector<20x1xf32> to vector<20x32xf32>
    %313 = arith.mulf %308, %312 : vector<20x32xf32>
    %314 = vector.broadcast %294 : vector<1x32xf32> to vector<20x32xf32>
    %315 = arith.mulf %313, %314 : vector<20x32xf32>
    %316 = vector.broadcast %295 : vector<1x32xf32> to vector<20x32xf32>
    %317 = arith.addf %315, %316 : vector<20x32xf32>
    %c224 = arith.constant 224 : index
    %c0_64 = arith.constant 0 : index
    %318 = vector.load %arg3[%c224, %c0_64] : memref<352x128xf32, #tpu.memory_space<vmem>>, vector<32x96xf32>
    %cst_65 = arith.constant dense<0.000000e+00> : vector<20x96xf32>
    %319 = tpu.matmul %317, %318, %cst_65 {dimension_numbers = #tpu.dot_dimension_numbers<[1], [0], [0], [1], [0, 0, 1, 1], [], []>} : vector<20x32xf32>, vector<32x96xf32>, vector<20x96xf32> -> vector<20x96xf32>
    %320 = vector.extract_strided_slice %319 {offsets = [0, 0], sizes = [5, 8], strides = [1, 1]} : vector<20x96xf32> to vector<5x8xf32>
    %321 = vector.extract_strided_slice %319 {offsets = [0, 8], sizes = [5, 8], strides = [1, 1]} : vector<20x96xf32> to vector<5x8xf32>
    %322 = vector.extract_strided_slice %319 {offsets = [0, 16], sizes = [5, 8], strides = [1, 1]} : vector<20x96xf32> to vector<5x8xf32>
    %323 = vector.extract_strided_slice %319 {offsets = [0, 24], sizes = [5, 8], strides = [1, 1]} : vector<20x96xf32> to vector<5x8xf32>
    %324 = vector.extract_strided_slice %319 {offsets = [5, 0], sizes = [5, 8], strides = [1, 1]} : vector<20x96xf32> to vector<5x8xf32>
    %325 = vector.extract_strided_slice %319 {offsets = [5, 8], sizes = [5, 8], strides = [1, 1]} : vector<20x96xf32> to vector<5x8xf32>
    %326 = vector.extract_strided_slice %319 {offsets = [5, 16], sizes = [5, 8], strides = [1, 1]} : vector<20x96xf32> to vector<5x8xf32>
    %327 = vector.extract_strided_slice %319 {offsets = [5, 24], sizes = [5, 8], strides = [1, 1]} : vector<20x96xf32> to vector<5x8xf32>
    %328 = vector.extract_strided_slice %319 {offsets = [10, 0], sizes = [5, 8], strides = [1, 1]} : vector<20x96xf32> to vector<5x8xf32>
    %329 = vector.extract_strided_slice %319 {offsets = [10, 8], sizes = [5, 8], strides = [1, 1]} : vector<20x96xf32> to vector<5x8xf32>
    %330 = vector.extract_strided_slice %319 {offsets = [10, 16], sizes = [5, 8], strides = [1, 1]} : vector<20x96xf32> to vector<5x8xf32>
    %331 = vector.extract_strided_slice %319 {offsets = [10, 24], sizes = [5, 8], strides = [1, 1]} : vector<20x96xf32> to vector<5x8xf32>
    %332 = vector.extract_strided_slice %319 {offsets = [15, 0], sizes = [5, 8], strides = [1, 1]} : vector<20x96xf32> to vector<5x8xf32>
    %333 = vector.extract_strided_slice %319 {offsets = [15, 8], sizes = [5, 8], strides = [1, 1]} : vector<20x96xf32> to vector<5x8xf32>
    %334 = vector.extract_strided_slice %319 {offsets = [15, 16], sizes = [5, 8], strides = [1, 1]} : vector<20x96xf32> to vector<5x8xf32>
    %335 = vector.extract_strided_slice %319 {offsets = [15, 24], sizes = [5, 8], strides = [1, 1]} : vector<20x96xf32> to vector<5x8xf32>
    %336 = vector.shape_cast %320 : vector<5x8xf32> to vector<1x5x8xf32>
    %337 = vector.shape_cast %321 : vector<5x8xf32> to vector<1x5x8xf32>
    %338 = vector.shape_cast %322 : vector<5x8xf32> to vector<1x5x8xf32>
    %339 = vector.shape_cast %323 : vector<5x8xf32> to vector<1x5x8xf32>
    %340 = vector.shape_cast %324 : vector<5x8xf32> to vector<1x5x8xf32>
    %341 = vector.shape_cast %325 : vector<5x8xf32> to vector<1x5x8xf32>
    %342 = vector.shape_cast %326 : vector<5x8xf32> to vector<1x5x8xf32>
    %343 = vector.shape_cast %327 : vector<5x8xf32> to vector<1x5x8xf32>
    %344 = vector.shape_cast %328 : vector<5x8xf32> to vector<1x5x8xf32>
    %345 = vector.shape_cast %329 : vector<5x8xf32> to vector<1x5x8xf32>
    %346 = vector.shape_cast %330 : vector<5x8xf32> to vector<1x5x8xf32>
    %347 = vector.shape_cast %331 : vector<5x8xf32> to vector<1x5x8xf32>
    %348 = vector.shape_cast %332 : vector<5x8xf32> to vector<1x5x8xf32>
    %349 = vector.shape_cast %333 : vector<5x8xf32> to vector<1x5x8xf32>
    %350 = vector.shape_cast %334 : vector<5x8xf32> to vector<1x5x8xf32>
    %351 = vector.shape_cast %335 : vector<5x8xf32> to vector<1x5x8xf32>
    %352 = tpu.concatenate %336, %337, %338, %339, %340, %341, %342, %343, %344, %345, %346, %347, %348, %349, %350, %351 in 0 : vector<1x5x8xf32>, vector<1x5x8xf32>, vector<1x5x8xf32>, vector<1x5x8xf32>, vector<1x5x8xf32>, vector<1x5x8xf32>, vector<1x5x8xf32>, vector<1x5x8xf32>, vector<1x5x8xf32>, vector<1x5x8xf32>, vector<1x5x8xf32>, vector<1x5x8xf32>, vector<1x5x8xf32>, vector<1x5x8xf32>, vector<1x5x8xf32>, vector<1x5x8xf32> -> vector<16x5x8xf32>
    %353 = vector.extract_strided_slice %319 {offsets = [0, 32], sizes = [5, 8], strides = [1, 1]} : vector<20x96xf32> to vector<5x8xf32>
    %354 = vector.extract_strided_slice %319 {offsets = [0, 40], sizes = [5, 8], strides = [1, 1]} : vector<20x96xf32> to vector<5x8xf32>
    %355 = vector.extract_strided_slice %319 {offsets = [0, 48], sizes = [5, 8], strides = [1, 1]} : vector<20x96xf32> to vector<5x8xf32>
    %356 = vector.extract_strided_slice %319 {offsets = [0, 56], sizes = [5, 8], strides = [1, 1]} : vector<20x96xf32> to vector<5x8xf32>
    %357 = vector.extract_strided_slice %319 {offsets = [5, 32], sizes = [5, 8], strides = [1, 1]} : vector<20x96xf32> to vector<5x8xf32>
    %358 = vector.extract_strided_slice %319 {offsets = [5, 40], sizes = [5, 8], strides = [1, 1]} : vector<20x96xf32> to vector<5x8xf32>
    %359 = vector.extract_strided_slice %319 {offsets = [5, 48], sizes = [5, 8], strides = [1, 1]} : vector<20x96xf32> to vector<5x8xf32>
    %360 = vector.extract_strided_slice %319 {offsets = [5, 56], sizes = [5, 8], strides = [1, 1]} : vector<20x96xf32> to vector<5x8xf32>
    %361 = vector.extract_strided_slice %319 {offsets = [10, 32], sizes = [5, 8], strides = [1, 1]} : vector<20x96xf32> to vector<5x8xf32>
    %362 = vector.extract_strided_slice %319 {offsets = [10, 40], sizes = [5, 8], strides = [1, 1]} : vector<20x96xf32> to vector<5x8xf32>
    %363 = vector.extract_strided_slice %319 {offsets = [10, 48], sizes = [5, 8], strides = [1, 1]} : vector<20x96xf32> to vector<5x8xf32>
    %364 = vector.extract_strided_slice %319 {offsets = [10, 56], sizes = [5, 8], strides = [1, 1]} : vector<20x96xf32> to vector<5x8xf32>
    %365 = vector.extract_strided_slice %319 {offsets = [15, 32], sizes = [5, 8], strides = [1, 1]} : vector<20x96xf32> to vector<5x8xf32>
    %366 = vector.extract_strided_slice %319 {offsets = [15, 40], sizes = [5, 8], strides = [1, 1]} : vector<20x96xf32> to vector<5x8xf32>
    %367 = vector.extract_strided_slice %319 {offsets = [15, 48], sizes = [5, 8], strides = [1, 1]} : vector<20x96xf32> to vector<5x8xf32>
    %368 = vector.extract_strided_slice %319 {offsets = [15, 56], sizes = [5, 8], strides = [1, 1]} : vector<20x96xf32> to vector<5x8xf32>
    %369 = vector.shape_cast %353 : vector<5x8xf32> to vector<1x5x8xf32>
    %370 = vector.shape_cast %354 : vector<5x8xf32> to vector<1x5x8xf32>
    %371 = vector.shape_cast %355 : vector<5x8xf32> to vector<1x5x8xf32>
    %372 = vector.shape_cast %356 : vector<5x8xf32> to vector<1x5x8xf32>
    %373 = vector.shape_cast %357 : vector<5x8xf32> to vector<1x5x8xf32>
    %374 = vector.shape_cast %358 : vector<5x8xf32> to vector<1x5x8xf32>
    %375 = vector.shape_cast %359 : vector<5x8xf32> to vector<1x5x8xf32>
    %376 = vector.shape_cast %360 : vector<5x8xf32> to vector<1x5x8xf32>
    %377 = vector.shape_cast %361 : vector<5x8xf32> to vector<1x5x8xf32>
    %378 = vector.shape_cast %362 : vector<5x8xf32> to vector<1x5x8xf32>
    %379 = vector.shape_cast %363 : vector<5x8xf32> to vector<1x5x8xf32>
    %380 = vector.shape_cast %364 : vector<5x8xf32> to vector<1x5x8xf32>
    %381 = vector.shape_cast %365 : vector<5x8xf32> to vector<1x5x8xf32>
    %382 = vector.shape_cast %366 : vector<5x8xf32> to vector<1x5x8xf32>
    %383 = vector.shape_cast %367 : vector<5x8xf32> to vector<1x5x8xf32>
    %384 = vector.shape_cast %368 : vector<5x8xf32> to vector<1x5x8xf32>
    %385 = tpu.concatenate %369, %370, %371, %372, %373, %374, %375, %376, %377, %378, %379, %380, %381, %382, %383, %384 in 0 : vector<1x5x8xf32>, vector<1x5x8xf32>, vector<1x5x8xf32>, vector<1x5x8xf32>, vector<1x5x8xf32>, vector<1x5x8xf32>, vector<1x5x8xf32>, vector<1x5x8xf32>, vector<1x5x8xf32>, vector<1x5x8xf32>, vector<1x5x8xf32>, vector<1x5x8xf32>, vector<1x5x8xf32>, vector<1x5x8xf32>, vector<1x5x8xf32>, vector<1x5x8xf32> -> vector<16x5x8xf32>
    %386 = vector.extract_strided_slice %319 {offsets = [0, 64], sizes = [5, 8], strides = [1, 1]} : vector<20x96xf32> to vector<5x8xf32>
    %387 = vector.extract_strided_slice %319 {offsets = [0, 72], sizes = [5, 8], strides = [1, 1]} : vector<20x96xf32> to vector<5x8xf32>
    %388 = vector.extract_strided_slice %319 {offsets = [0, 80], sizes = [5, 8], strides = [1, 1]} : vector<20x96xf32> to vector<5x8xf32>
    %389 = vector.extract_strided_slice %319 {offsets = [0, 88], sizes = [5, 8], strides = [1, 1]} : vector<20x96xf32> to vector<5x8xf32>
    %390 = vector.extract_strided_slice %319 {offsets = [5, 64], sizes = [5, 8], strides = [1, 1]} : vector<20x96xf32> to vector<5x8xf32>
    %391 = vector.extract_strided_slice %319 {offsets = [5, 72], sizes = [5, 8], strides = [1, 1]} : vector<20x96xf32> to vector<5x8xf32>
    %392 = vector.extract_strided_slice %319 {offsets = [5, 80], sizes = [5, 8], strides = [1, 1]} : vector<20x96xf32> to vector<5x8xf32>
    %393 = vector.extract_strided_slice %319 {offsets = [5, 88], sizes = [5, 8], strides = [1, 1]} : vector<20x96xf32> to vector<5x8xf32>
    %394 = vector.extract_strided_slice %319 {offsets = [10, 64], sizes = [5, 8], strides = [1, 1]} : vector<20x96xf32> to vector<5x8xf32>
    %395 = vector.extract_strided_slice %319 {offsets = [10, 72], sizes = [5, 8], strides = [1, 1]} : vector<20x96xf32> to vector<5x8xf32>
    %396 = vector.extract_strided_slice %319 {offsets = [10, 80], sizes = [5, 8], strides = [1, 1]} : vector<20x96xf32> to vector<5x8xf32>
    %397 = vector.extract_strided_slice %319 {offsets = [10, 88], sizes = [5, 8], strides = [1, 1]} : vector<20x96xf32> to vector<5x8xf32>
    %398 = vector.extract_strided_slice %319 {offsets = [15, 64], sizes = [5, 8], strides = [1, 1]} : vector<20x96xf32> to vector<5x8xf32>
    %399 = vector.extract_strided_slice %319 {offsets = [15, 72], sizes = [5, 8], strides = [1, 1]} : vector<20x96xf32> to vector<5x8xf32>
    %400 = vector.extract_strided_slice %319 {offsets = [15, 80], sizes = [5, 8], strides = [1, 1]} : vector<20x96xf32> to vector<5x8xf32>
    %401 = vector.extract_strided_slice %319 {offsets = [15, 88], sizes = [5, 8], strides = [1, 1]} : vector<20x96xf32> to vector<5x8xf32>
    %402 = vector.shape_cast %386 : vector<5x8xf32> to vector<1x5x8xf32>
    %403 = vector.shape_cast %387 : vector<5x8xf32> to vector<1x5x8xf32>
    %404 = vector.shape_cast %388 : vector<5x8xf32> to vector<1x5x8xf32>
    %405 = vector.shape_cast %389 : vector<5x8xf32> to vector<1x5x8xf32>
    %406 = vector.shape_cast %390 : vector<5x8xf32> to vector<1x5x8xf32>
    %407 = vector.shape_cast %391 : vector<5x8xf32> to vector<1x5x8xf32>
    %408 = vector.shape_cast %392 : vector<5x8xf32> to vector<1x5x8xf32>
    %409 = vector.shape_cast %393 : vector<5x8xf32> to vector<1x5x8xf32>
    %410 = vector.shape_cast %394 : vector<5x8xf32> to vector<1x5x8xf32>
    %411 = vector.shape_cast %395 : vector<5x8xf32> to vector<1x5x8xf32>
    %412 = vector.shape_cast %396 : vector<5x8xf32> to vector<1x5x8xf32>
    %413 = vector.shape_cast %397 : vector<5x8xf32> to vector<1x5x8xf32>
    %414 = vector.shape_cast %398 : vector<5x8xf32> to vector<1x5x8xf32>
    %415 = vector.shape_cast %399 : vector<5x8xf32> to vector<1x5x8xf32>
    %416 = vector.shape_cast %400 : vector<5x8xf32> to vector<1x5x8xf32>
    %417 = vector.shape_cast %401 : vector<5x8xf32> to vector<1x5x8xf32>
    %418 = tpu.concatenate %402, %403, %404, %405, %406, %407, %408, %409, %410, %411, %412, %413, %414, %415, %416, %417 in 0 : vector<1x5x8xf32>, vector<1x5x8xf32>, vector<1x5x8xf32>, vector<1x5x8xf32>, vector<1x5x8xf32>, vector<1x5x8xf32>, vector<1x5x8xf32>, vector<1x5x8xf32>, vector<1x5x8xf32>, vector<1x5x8xf32>, vector<1x5x8xf32>, vector<1x5x8xf32>, vector<1x5x8xf32>, vector<1x5x8xf32>, vector<1x5x8xf32>, vector<1x5x8xf32> -> vector<16x5x8xf32>
    "tpu.trace_start"() <{level = 10 : i32, message = "znd,zmd->znm"}> : () -> ()
    %cst_66 = arith.constant dense<0.000000e+00> : vector<16x5x5xf32>
    %419 = tpu.matmul %352, %385, %cst_66 {dimension_numbers = #tpu.dot_dimension_numbers<[2], [2], [1], [1], [0, 0, 0, 1, 1, 1], [0], [0]>} : vector<16x5x8xf32>, vector<16x5x8xf32>, vector<16x5x5xf32> -> vector<16x5x5xf32>
    "tpu.trace_stop"() : () -> ()
    %cst_67 = arith.constant dense<0xFF800000> : vector<16x5xf32>
    %420 = vector.multi_reduction <maximumf>, %419, %cst_67 [2] : vector<16x5x5xf32> to vector<16x5xf32>
    %421 = vector.shape_cast %420 : vector<16x5xf32> to vector<16x5x1xf32>
    %422 = vector.broadcast %421 : vector<16x5x1xf32> to vector<16x5x5xf32>
    %423 = arith.subf %419, %422 : vector<16x5x5xf32>
    %424 = math.exp %423 : vector<16x5x5xf32>
    %cst_68 = arith.constant dense<0.000000e+00> : vector<16x5xf32>
    %425 = vector.multi_reduction <add>, %424, %cst_68 [2] : vector<16x5x5xf32> to vector<16x5xf32>
    %426 = vector.shape_cast %425 : vector<16x5xf32> to vector<16x5x1xf32>
    %427 = tpu.reciprocal %426 {approx = true} : vector<16x5x1xf32> -> vector<16x5x1xf32>
    %428 = vector.broadcast %427 : vector<16x5x1xf32> to vector<16x5x5xf32>
    %429 = arith.mulf %424, %428 : vector<16x5x5xf32>
    %c0_69 = arith.constant 0 : index
    %c16_70 = arith.constant 16 : index
    %c0_71 = arith.constant 0 : index
    %c0_72 = arith.constant 0 : index
    %430 = vector.load %arg5[%c0_69, %c16_70, %c0_71, %c0_72] : memref<1x32x5x5xf32, #tpu.memory_space<vmem>>, vector<1x16x5x5xf32>
    %431 = vector.shape_cast %430 : vector<1x16x5x5xf32> to vector<16x5x5xf32>
    %432 = vector.shape_cast %429 : vector<16x5x5xf32> to vector<1x16x5x5xf32>
    tpu.vector_store %arg5[%c0_69, %c16_70, %c0_71, %c0_72], %432 {strides = array<i32>} : memref<1x32x5x5xf32, #tpu.memory_space<vmem>>, vector<1x16x5x5xf32>,
    "tpu.trace_start"() <{level = 10 : i32, message = "znm,zmd->znd"}> : () -> ()
    %cst_73 = arith.constant dense<0.000000e+00> : vector<16x5x8xf32>
    %433 = tpu.matmul %429, %418, %cst_73 {dimension_numbers = #tpu.dot_dimension_numbers<[2], [1], [1], [2], [0, 0, 0, 1, 1, 2], [0], [0]>} : vector<16x5x5xf32>, vector<16x5x8xf32>, vector<16x5x8xf32> -> vector<16x5x8xf32>
    "tpu.trace_stop"() : () -> ()
    %434 = vector.extract_strided_slice %433 {offsets = [0, 0, 0], sizes = [1, 5, 8], strides = [1, 1, 1]} : vector<16x5x8xf32> to vector<1x5x8xf32>
    %435 = vector.shape_cast %434 : vector<1x5x8xf32> to vector<5x8xf32>
    %436 = vector.extract_strided_slice %433 {offsets = [1, 0, 0], sizes = [1, 5, 8], strides = [1, 1, 1]} : vector<16x5x8xf32> to vector<1x5x8xf32>
    %437 = vector.shape_cast %436 : vector<1x5x8xf32> to vector<5x8xf32>
    %438 = vector.extract_strided_slice %433 {offsets = [2, 0, 0], sizes = [1, 5, 8], strides = [1, 1, 1]} : vector<16x5x8xf32> to vector<1x5x8xf32>
    %439 = vector.shape_cast %438 : vector<1x5x8xf32> to vector<5x8xf32>
    %440 = vector.extract_strided_slice %433 {offsets = [3, 0, 0], sizes = [1, 5, 8], strides = [1, 1, 1]} : vector<16x5x8xf32> to vector<1x5x8xf32>
    %441 = vector.shape_cast %440 : vector<1x5x8xf32> to vector<5x8xf32>
    %442 = tpu.concatenate %435, %437, %439, %441 in 1 : vector<5x8xf32>, vector<5x8xf32>, vector<5x8xf32>, vector<5x8xf32> -> vector<5x32xf32>
    %443 = vector.extract_strided_slice %433 {offsets = [4, 0, 0], sizes = [1, 5, 8], strides = [1, 1, 1]} : vector<16x5x8xf32> to vector<1x5x8xf32>
    %444 = vector.shape_cast %443 : vector<1x5x8xf32> to vector<5x8xf32>
    %445 = vector.extract_strided_slice %433 {offsets = [5, 0, 0], sizes = [1, 5, 8], strides = [1, 1, 1]} : vector<16x5x8xf32> to vector<1x5x8xf32>
    %446 = vector.shape_cast %445 : vector<1x5x8xf32> to vector<5x8xf32>
    %447 = vector.extract_strided_slice %433 {offsets = [6, 0, 0], sizes = [1, 5, 8], strides = [1, 1, 1]} : vector<16x5x8xf32> to vector<1x5x8xf32>
    %448 = vector.shape_cast %447 : vector<1x5x8xf32> to vector<5x8xf32>
    %449 = vector.extract_strided_slice %433 {offsets = [7, 0, 0], sizes = [1, 5, 8], strides = [1, 1, 1]} : vector<16x5x8xf32> to vector<1x5x8xf32>
    %450 = vector.shape_cast %449 : vector<1x5x8xf32> to vector<5x8xf32>
    %451 = tpu.concatenate %444, %446, %448, %450 in 1 : vector<5x8xf32>, vector<5x8xf32>, vector<5x8xf32>, vector<5x8xf32> -> vector<5x32xf32>
    %452 = vector.extract_strided_slice %433 {offsets = [8, 0, 0], sizes = [1, 5, 8], strides = [1, 1, 1]} : vector<16x5x8xf32> to vector<1x5x8xf32>
    %453 = vector.shape_cast %452 : vector<1x5x8xf32> to vector<5x8xf32>
    %454 = vector.extract_strided_slice %433 {offsets = [9, 0, 0], sizes = [1, 5, 8], strides = [1, 1, 1]} : vector<16x5x8xf32> to vector<1x5x8xf32>
    %455 = vector.shape_cast %454 : vector<1x5x8xf32> to vector<5x8xf32>
    %456 = vector.extract_strided_slice %433 {offsets = [10, 0, 0], sizes = [1, 5, 8], strides = [1, 1, 1]} : vector<16x5x8xf32> to vector<1x5x8xf32>
    %457 = vector.shape_cast %456 : vector<1x5x8xf32> to vector<5x8xf32>
    %458 = vector.extract_strided_slice %433 {offsets = [11, 0, 0], sizes = [1, 5, 8], strides = [1, 1, 1]} : vector<16x5x8xf32> to vector<1x5x8xf32>
    %459 = vector.shape_cast %458 : vector<1x5x8xf32> to vector<5x8xf32>
    %460 = tpu.concatenate %453, %455, %457, %459 in 1 : vector<5x8xf32>, vector<5x8xf32>, vector<5x8xf32>, vector<5x8xf32> -> vector<5x32xf32>
    %461 = vector.extract_strided_slice %433 {offsets = [12, 0, 0], sizes = [1, 5, 8], strides = [1, 1, 1]} : vector<16x5x8xf32> to vector<1x5x8xf32>
    %462 = vector.shape_cast %461 : vector<1x5x8xf32> to vector<5x8xf32>
    %463 = vector.extract_strided_slice %433 {offsets = [13, 0, 0], sizes = [1, 5, 8], strides = [1, 1, 1]} : vector<16x5x8xf32> to vector<1x5x8xf32>
    %464 = vector.shape_cast %463 : vector<1x5x8xf32> to vector<5x8xf32>
    %465 = vector.extract_strided_slice %433 {offsets = [14, 0, 0], sizes = [1, 5, 8], strides = [1, 1, 1]} : vector<16x5x8xf32> to vector<1x5x8xf32>
    %466 = vector.shape_cast %465 : vector<1x5x8xf32> to vector<5x8xf32>
    %467 = vector.extract_strided_slice %433 {offsets = [15, 0, 0], sizes = [1, 5, 8], strides = [1, 1, 1]} : vector<16x5x8xf32> to vector<1x5x8xf32>
    %468 = vector.shape_cast %467 : vector<1x5x8xf32> to vector<5x8xf32>
    %469 = tpu.concatenate %462, %464, %466, %468 in 1 : vector<5x8xf32>, vector<5x8xf32>, vector<5x8xf32>, vector<5x8xf32> -> vector<5x32xf32>
    %470 = tpu.concatenate %442, %451, %460, %469 in 0 : vector<5x32xf32>, vector<5x32xf32>, vector<5x32xf32>, vector<5x32xf32> -> vector<20x32xf32>
    %c256 = arith.constant 256 : index
    %c0_74 = arith.constant 0 : index
    %471 = vector.load %arg3[%c256, %c0_74] : memref<352x128xf32, #tpu.memory_space<vmem>>, vector<32x32xf32>
    %cst_75 = arith.constant dense<0.000000e+00> : vector<20x32xf32>
    %472 = tpu.matmul %470, %471, %cst_75 {dimension_numbers = #tpu.dot_dimension_numbers<[1], [0], [0], [1], [0, 0, 1, 1], [], []>} : vector<20x32xf32>, vector<32x32xf32>, vector<20x32xf32> -> vector<20x32xf32>
    %473 = arith.addf %293, %472 : vector<20x32xf32>
    %c23 = arith.constant 23 : index
    %c0_76 = arith.constant 0 : index
    %474 = vector.load %arg2[%c23, %c0_76] : memref<32x128xf32, #tpu.memory_space<vmem>>, vector<1x32xf32>
    %475 = vector.broadcast %474 : vector<1x32xf32> to vector<20x32xf32>
    %476 = arith.addf %473, %475 : vector<20x32xf32>
    %c24 = arith.constant 24 : index
    %c0_77 = arith.constant 0 : index
    %477 = vector.load %arg2[%c24, %c0_77] : memref<32x128xf32, #tpu.memory_space<vmem>>, vector<1x32xf32>
    %c25 = arith.constant 25 : index
    %c0_78 = arith.constant 0 : index
    %478 = vector.load %arg2[%c25, %c0_78] : memref<32x128xf32, #tpu.memory_space<vmem>>, vector<1x32xf32>
    %cst_79 = arith.constant dense<0.000000e+00> : vector<20xf32>
    %479 = vector.multi_reduction <add>, %476, %cst_79 [1] : vector<20x32xf32> to vector<20xf32>
    %480 = vector.shape_cast %479 : vector<20xf32> to vector<20x1xf32>
    %cst_80 = arith.constant 3.200000e+01 : f32
    %481 = vector.broadcast %cst_80 : f32 to vector<20x1xf32>
    %482 = arith.divf %480, %481 : vector<20x1xf32>
    %483 = vector.broadcast %482 : vector<20x1xf32> to vector<20x32xf32>
    %484 = arith.subf %476, %483 : vector<20x32xf32>
    %485 = arith.mulf %484, %484 : vector<20x32xf32>
    %cst_81 = arith.constant dense<0.000000e+00> : vector<20xf32>
    %486 = vector.multi_reduction <add>, %485, %cst_81 [1] : vector<20x32xf32> to vector<20xf32>
    %487 = vector.shape_cast %486 : vector<20xf32> to vector<20x1xf32>
    %cst_82 = arith.constant 3.200000e+01 : f32
    %488 = vector.broadcast %cst_82 : f32 to vector<20x1xf32>
    %489 = arith.divf %487, %488 : vector<20x1xf32>
    %490 = vector.broadcast %482 : vector<20x1xf32> to vector<20x32xf32>
    %491 = arith.subf %476, %490 : vector<20x32xf32>
    %cst_83 = arith.constant 9.99999974E-6 : f32
    %492 = vector.broadcast %cst_83 : f32 to vector<20x1xf32>
    %493 = arith.addf %489, %492 : vector<20x1xf32>
    %494 = math.rsqrt %493 : vector<20x1xf32>
    %495 = vector.broadcast %494 : vector<20x1xf32> to vector<20x32xf32>
    %496 = arith.mulf %491, %495 : vector<20x32xf32>
    %497 = vector.broadcast %477 : vector<1x32xf32> to vector<20x32xf32>
    %498 = arith.mulf %496, %497 : vector<20x32xf32>
    %499 = vector.broadcast %478 : vector<1x32xf32> to vector<20x32xf32>
    %500 = arith.addf %498, %499 : vector<20x32xf32>
    %c288 = arith.constant 288 : index
    %c0_84 = arith.constant 0 : index
    %501 = vector.load %arg3[%c288, %c0_84] : memref<352x128xf32, #tpu.memory_space<vmem>>, vector<32x32xf32>
    %cst_85 = arith.constant dense<0.000000e+00> : vector<20x32xf32>
    %502 = tpu.matmul %500, %501, %cst_85 {dimension_numbers = #tpu.dot_dimension_numbers<[1], [0], [0], [1], [0, 0, 1, 1], [], []>} : vector<20x32xf32>, vector<32x32xf32>, vector<20x32xf32> -> vector<20x32xf32>
    %c26 = arith.constant 26 : index
    %c0_86 = arith.constant 0 : index
    %503 = vector.load %arg2[%c26, %c0_86] : memref<32x128xf32, #tpu.memory_space<vmem>>, vector<1x32xf32>
    %504 = vector.broadcast %503 : vector<1x32xf32> to vector<20x32xf32>
    %505 = arith.addf %502, %504 : vector<20x32xf32>
    %cst_87 = arith.constant 5.000000e-01 : f32
    %506 = vector.broadcast %cst_87 : f32 to vector<20x32xf32>
    %507 = arith.mulf %506, %505 : vector<20x32xf32>
    %cst_88 = arith.constant 0.707106769 : f32
    %508 = vector.broadcast %cst_88 : f32 to vector<20x32xf32>
    %509 = arith.mulf %505, %508 : vector<20x32xf32>
    %510 = math.erf %509 : vector<20x32xf32>
    %cst_89 = arith.constant 1.000000e+00 : f32
    %511 = vector.broadcast %cst_89 : f32 to vector<20x32xf32>
    %512 = arith.addf %511, %510 : vector<20x32xf32>
    %513 = arith.mulf %507, %512 : vector<20x32xf32>
    %c320 = arith.constant 320 : index
    %c0_90 = arith.constant 0 : index
    %514 = vector.load %arg3[%c320, %c0_90] : memref<352x128xf32, #tpu.memory_space<vmem>>, vector<32x32xf32>
    %cst_91 = arith.constant dense<0.000000e+00> : vector<20x32xf32>
    %515 = tpu.matmul %513, %514, %cst_91 {dimension_numbers = #tpu.dot_dimension_numbers<[1], [0], [0], [1], [0, 0, 1, 1], [], []>} : vector<20x32xf32>, vector<32x32xf32>, vector<20x32xf32> -> vector<20x32xf32>
    %516 = arith.addf %476, %515 : vector<20x32xf32>
    %c27 = arith.constant 27 : index
    %c0_92 = arith.constant 0 : index
    %517 = vector.load %arg2[%c27, %c0_92] : memref<32x128xf32, #tpu.memory_space<vmem>>, vector<1x32xf32>
    %518 = vector.broadcast %517 : vector<1x32xf32> to vector<20x32xf32>
    %519 = arith.addf %516, %518 : vector<20x32xf32>
    %c11 = arith.constant 11 : index
    %c0_93 = arith.constant 0 : index
    %520 = vector.load %arg2[%c11, %c0_93] : memref<32x128xf32, #tpu.memory_space<vmem>>, vector<1x32xf32>
    %c12 = arith.constant 12 : index
    %c0_94 = arith.constant 0 : index
    %521 = vector.load %arg2[%c12, %c0_94] : memref<32x128xf32, #tpu.memory_space<vmem>>, vector<1x32xf32>
    %cst_95 = arith.constant dense<0.000000e+00> : vector<20xf32>
    %522 = vector.multi_reduction <add>, %519, %cst_95 [1] : vector<20x32xf32> to vector<20xf32>
    %523 = vector.shape_cast %522 : vector<20xf32> to vector<20x1xf32>
    %cst_96 = arith.constant 3.200000e+01 : f32
    %524 = vector.broadcast %cst_96 : f32 to vector<20x1xf32>
    %525 = arith.divf %523, %524 : vector<20x1xf32>
    %526 = vector.broadcast %525 : vector<20x1xf32> to vector<20x32xf32>
    %527 = arith.subf %519, %526 : vector<20x32xf32>
    %528 = arith.mulf %527, %527 : vector<20x32xf32>
    %cst_97 = arith.constant dense<0.000000e+00> : vector<20xf32>
    %529 = vector.multi_reduction <add>, %528, %cst_97 [1] : vector<20x32xf32> to vector<20xf32>
    %530 = vector.shape_cast %529 : vector<20xf32> to vector<20x1xf32>
    %cst_98 = arith.constant 3.200000e+01 : f32
    %531 = vector.broadcast %cst_98 : f32 to vector<20x1xf32>
    %532 = arith.divf %530, %531 : vector<20x1xf32>
    %533 = vector.broadcast %525 : vector<20x1xf32> to vector<20x32xf32>
    %534 = arith.subf %519, %533 : vector<20x32xf32>
    %cst_99 = arith.constant 9.99999974E-6 : f32
    %535 = vector.broadcast %cst_99 : f32 to vector<20x1xf32>
    %536 = arith.addf %532, %535 : vector<20x1xf32>
    %537 = math.rsqrt %536 : vector<20x1xf32>
    %538 = vector.broadcast %537 : vector<20x1xf32> to vector<20x32xf32>
    %539 = arith.mulf %534, %538 : vector<20x32xf32>
    %540 = vector.broadcast %520 : vector<1x32xf32> to vector<20x32xf32>
    %541 = arith.mulf %539, %540 : vector<20x32xf32>
    %542 = vector.broadcast %521 : vector<1x32xf32> to vector<20x32xf32>
    %543 = arith.addf %541, %542 : vector<20x32xf32>
    %544 = vector.extract_strided_slice %543 {offsets = [0, 0], sizes = [1, 32], strides = [1, 1]} : vector<20x32xf32> to vector<1x32xf32>
    %545 = vector.extract_strided_slice %543 {offsets = [5, 0], sizes = [1, 32], strides = [1, 1]} : vector<20x32xf32> to vector<1x32xf32>
    %546 = vector.extract_strided_slice %543 {offsets = [10, 0], sizes = [1, 32], strides = [1, 1]} : vector<20x32xf32> to vector<1x32xf32>
    %547 = vector.extract_strided_slice %543 {offsets = [15, 0], sizes = [1, 32], strides = [1, 1]} : vector<20x32xf32> to vector<1x32xf32>
    %548 = tpu.concatenate %544, %545, %546, %547 in 0 : vector<1x32xf32>, vector<1x32xf32>, vector<1x32xf32>, vector<1x32xf32> -> vector<4x32xf32>
    %c64 = arith.constant 64 : index
    %c0_100 = arith.constant 0 : index
    %549 = vector.load %arg3[%c64, %c0_100] : memref<352x128xf32, #tpu.memory_space<vmem>>, vector<32x10xf32>
    %cst_101 = arith.constant dense<0.000000e+00> : vector<4x10xf32>
    %550 = tpu.matmul %548, %549, %cst_101 {dimension_numbers = #tpu.dot_dimension_numbers<[1], [0], [0], [1], [0, 0, 1, 1], [], []>} : vector<4x32xf32>, vector<32x10xf32>, vector<4x10xf32> -> vector<4x10xf32>
    %c13 = arith.constant 13 : index
    %c0_102 = arith.constant 0 : index
    %551 = vector.load %arg2[%c13, %c0_102] : memref<32x128xf32, #tpu.memory_space<vmem>>, vector<1x10xf32>
    %552 = vector.broadcast %551 : vector<1x10xf32> to vector<4x10xf32>
    %553 = arith.addf %550, %552 : vector<4x10xf32>
    %c0_103 = arith.constant 0 : index
    %c0_104 = arith.constant 0 : index
    %c0_105 = arith.constant 0 : index
    %554 = vector.load %arg4[%c0_103, %c0_104, %c0_105] : memref<1x4x10xf32, #tpu.memory_space<vmem>>, vector<1x4x10xf32>
    %555 = vector.shape_cast %554 : vector<1x4x10xf32> to vector<4x10xf32>
    %556 = vector.shape_cast %553 : vector<4x10xf32> to vector<1x4x10xf32>
    tpu.vector_store %arg4[%c0_103, %c0_104, %c0_105], %556 {strides = array<i32>} : memref<1x4x10xf32, #tpu.memory_space<vmem>>, vector<1x4x10xf32>,
    return
  }
  func.func @transform_0(%arg0: i32) -> (i32, i32) {
    %c0_i32 = arith.constant 0 : i32
    %c0_i32_0 = arith.constant 0 : i32
    return %arg0, %c0_i32 : i32, i32
  }
  func.func @transform_1(%arg0: i32) -> (i32, i32) {
    %c0_i32 = arith.constant 0 : i32
    %c0_i32_0 = arith.constant 0 : i32
    %c0_i32_1 = arith.constant 0 : i32
    return %c0_i32, %c0_i32_0 : i32, i32
  }
  func.func @transform_2(%arg0: i32) -> (i32, i32) {
    %c0_i32 = arith.constant 0 : i32
    %c0_i32_0 = arith.constant 0 : i32
    %c0_i32_1 = arith.constant 0 : i32
    return %c0_i32, %c0_i32_0 : i32, i32
  }
  func.func @transform_3(%arg0: i32) -> (i32, i32, i32) {
    %c0_i32 = arith.constant 0 : i32
    %c0_i32_0 = arith.constant 0 : i32
    %c0_i32_1 = arith.constant 0 : i32
    return %arg0, %c0_i32, %c0_i32_0 : i32, i32, i32
  }
  func.func @transform_4(%arg0: i32) -> (i32, i32, i32, i32) {
    %c0_i32 = arith.constant 0 : i32
    %c0_i32_0 = arith.constant 0 : i32
    %c0_i32_1 = arith.constant 0 : i32
    %c0_i32_2 = arith.constant 0 : i32
    return %arg0, %c0_i32, %c0_i32_0, %c0_i32_1 : i32, i32, i32, i32
  }
}

</mosaic_0001>

<bundles_post_ra>
// kernel: basic_vit_forward.1
= control target key start
LH: loop header
LB: loop body
LE: loop exit
PB: predicated region body
PF: predicated region fallthrough
CT: control target
= control target key end

     0   :  { %10 = vsyncpa [#allocation3], 0  ;;  %s10073_s0 = inlined_call_operand.vmem [shape: f32[32,64], index: 0, kind: input, shape index: {}]   ;;  %s10074_s1 = inlined_call_operand.vmem [shape: f32[32,128], index: 1, kind: input, shape index: {}]   ;;  %s10075_s2 = inlined_call_operand.vmem [shape: f32[352,128], index: 2, kind: input, shape index: {}]   ;;  %s10076_s3 = inlined_call_operand.hbm [shape: f32[2,4,10], index: 3, kind: output, shape index: {0}]   ;;  %s10077_s4 = inlined_call_operand.vmem [shape: f32[2,32,5,5], index: 4, kind: output, shape index: {1}]  }
   0x1   :  { %12 = vsyncpa [#allocation3 + $0x1], 0  ;;  %s8504_s15 = smov 0   ;;  %s8506_s16 = smov 0  }
   0x2   :  { %s8508_s17 = smov 0   ;;  %s8510_s18 = smov 0  }
   0x3 LB: > { %s8525_s19 = sadd.s32 4294967295, %s8465_s18   ;;  %s7215_s20 = sadd.s32 4294967294, %s8465_s18   ;;  %s8465_s18 = sphi %s8510_s18, %s10083_s18   ;;  %s8461_s17 = sphi %s8508_s17, %s10082_s17   ;;  %s8457_s16 = sphi %s8506_s16, %s10081_s16   ;;  %s8453_s15 = sphi %s8504_s15, %s10080_s15  }
   0x4   : > { %s8529_s21 = sadd.s32 1, %s8465_s18   ;;  %s93_s22 = sadd.s32 1, %s8461_s17 }
   0x5   : > { %s90_s23 = ssub.s32 %s8465_s18, %s8529_s21  ;;  %p103_p0 = scmp.ne.s32.totalorder %s8461_s17, %s8457_s16 }
   0x6   : > { %p91_p1 = scmp.eq.s32.totalorder %s90_s23, 0  ;;  %p104_p2 = scmp.eq.s32.totalorder %s8525_s19, 1 }
   0x7   : > { %p109_p3 = scmp.ne.s32.totalorder %s8457_s16, %s8453_s15  ;;  %p110_p4 = scmp.eq.s32.totalorder %s7215_s20, 1 }
   0x8   : > { %s8540_s24 = scalar_select %p91_p1, %s8461_s17, %s93_s22  }
   0x9   : > { %p8542_p5 = por %p104_p2, %p103_p0  ;;  %p8546_p6 = por %p110_p4, %p109_p3 }
   0xa   : > { %p7218_p7 = scmp.ge.s32.totalorder %s8465_s18, 1  ;;  %p169_p8 = scmp.lt.s32.totalorder %s8465_s18, 3 }
   0xc   : > { %p170_p9 = pnand %p7218_p7, %p169_p8 }
   0xd   : > { %s7220_s27 = sshll.u32 (!%p170_p9), %s8525_s19, 1  ;;  %vm215_vm0 = vcmask (!%p170_p9), 523264   ;;  %v255_v14 = vld [vmem:[%s10075_s2] sm:$0xff] (!%p170_p9)  ;;  %v256_v15 = vld [vmem:[%s10075_s2 + $0x8] sm:$0xff] (!%p170_p9)  ;;  %v257_v17 = vld [vmem:[%s10075_s2 + $0x10] sm:$0xff] (!%p170_p9)  ;;  %vm351_vm1 = vcmask (!%p170_p9), 261120  }
   0xe   : > { %173 = sbr.rel (%p170_p9) target bundleno = 6752 (0x1a60), region = 32  ;;  %p201_p10 = scmp.lt.s32.totalorder (!%p170_p9), %s7220_s27, 3  ;;  %v8107_v16 = vpack.c.bf16 (!%p170_p9), %v256_v15, %v255_v14  ;;  %v258_v18 = vld [vmem:[%s10075_s2 + $0x18] sm:$0xff] (!%p170_p9)  ;;  %v259_v19 = vld [vmem:[%s10075_s2 + $0x20] sm:$0xff] (!%p170_p9)  ;;  %v260_v21 = vld [vmem:[%s10075_s2 + $0x28] sm:$0xff] (!%p170_p9)  ;;  %vm428_vm2 = vcmask (!%p170_p9), 1041408  }
   0xf   : > { %v8111_v20 = vpack.c.bf16 (!%p170_p9), %v258_v18, %v257_v17  ;;  %v8115_v22 = vpack.c.bf16 (!%p170_p9), %v260_v21, %v259_v19  ;;  %v261_v23 = vld [vmem:[%s10075_s2 + $0x30] sm:$0xff] (!%p170_p9)  ;;  %v262_v24 = vld [vmem:[%s10075_s2 + $0x38] sm:$0xff] (!%p170_p9)  ;;  %v7224_v33 = vld [vmem:[%s10074_s1] ss:$0 sm:$0xff] (!%p170_p9)  ;;  %vm422_vm3 = vcmask (!%p170_p9), 1040384   ;;  %vm430_vm4 = vcmask (!%p170_p9), 1042432  }
  0x10   : > { %8108 = vmatprep.subr.bf16.mxu0 (!%p170_p9), %v8107_v16  ;;  %v8119_v25 = vpack.c.bf16 (!%p170_p9), %v262_v24, %v261_v23  ;;  %v7225_v35 = vld [vmem:[%s10074_s1 + $0x1] ss:$0 sm:$0xff] (!%p170_p9)  ;;  %v7226_v42 = vld [vmem:[%s10074_s1 + $0x2] ss:$0 sm:$0xff] (!%p170_p9)  ;;  %vm424_vm5 = vcmask (!%p170_p9), 1044480   ;;  %vm432_vm6 = vcmask (!%p170_p9), 1046528  }
  0x11   : > { %8110 = vmatpush3.bf16.msra.mxu0 (!%p170_p9), %v8107_v16  ;;  %vm426_vm7 = vcmask (!%p170_p9), 1045504   ;;  %vm442_vm8 = vcmask (!%p170_p9), 257024   ;;  %vm8468_vm9 = vmmov (!%p170_p9), 0   ;;  %s8470_s14 = smov (!%p170_p9), 120   ;;  %s8471_s20 = smov (!%p170_p9), 112   ;;  %vm619_vm10 = vcmask (!%p170_p9), 64512  }
  0x12   : > { %8112 = vmatprep.subr.bf16.mxu0 (!%p170_p9), %v8111_v20  ;;  %s8472_s22 = smov (!%p170_p9), 104   ;;  %s8473_s23 = smov (!%p170_p9), 96   ;;  %vm1834_vm11 = vcmask (!%p170_p9), 36864   ;;  %vm2029_vm12 = vcmask (!%p170_p9), 39936   ;;  %vm3273_vm13 = vcmask (!%p170_p9), 130048   ;;  %vm3275_vm14 = vcmask (!%p170_p9), 195584  }
  0x13   : > { %p206_p11 = scmp.lt.s32.totalorder (!%p170_p9), %s8525_s19, 1  ;;  %s8475_s11 = smov (!%p170_p9), 8   ;;  %vm7107_vm15 = vcmask (!%p170_p9), 76800  }
  0x14   : > { %s8476_s30 = smov (!%p170_p9), 24   ;;  %s190_s8 = sand.u32 (!%p170_p9), 1, %s8457_s16  }
  0x15   : > { %s10085_s27 = smov (!%p201_p10, %s7220_s27), 3  ;;  %8114 = vmatpush3.bf16.msra.mxu0 %v8111_v20  ;;  %s7219_s9 = sshll.u32 %s190_s8, 2 }
  0x16   : > { %s7221_s28 = sshll.u32 %s10085_s27, 3  ;;  %8116 = vmatprep.subr.bf16.mxu0 %v8115_v22  ;;  %s8474_s27 = smov 64  }
  0x17   : > { %s204_s5 = scalar_lea.vmem %s10073_s0, %s7221_s28  ;;  %s7418_s13 = sshll.u32 %s8525_s19, 6 }
  0x18   : > { %v211_v0 = vld [vmem:[%s204_s5] sm:$0xff]  ;;  %v212_v1 = vld [vmem:[%s204_s5 + $0x8] sm:$0xff]  ;;  %s207_s28 = scalar_select %p206_p11, %s8525_s19, 1 }
  0x19   : > { %v216_v2 = vsel %vm215_vm0, %v211_v0, 0.0  ;;  %v219_v3 = vsel %vm215_vm0, %v212_v1, 0.0  ;;  %8118 = vmatpush3.bf16.msra.mxu0 %v8115_v22  ;;  %s8477_s5 = smov 16   ;;  %s8478_s19 = smov [#allocation2]  }
  0x1a   : > { %217 = vadd.xlane.f32.xlu0 %v216_v2  ;;  %8120 = vmatprep.subr.bf16.mxu0 %v8119_v25  ;;  %v7229_v2 = vld [vmem:[%s10074_s1 + $0x3] ss:$0 sm:$0xff]  ;;  %s7421_s29 = sshll.u32 %s207_s28, 8 }
  0x1b   : > { %s9046_s6 = scalar_lea.vmem %s10077_s4, %s7421_s29  ;;  %s8407_s29 = sshll.u32 %s8478_s19, 4  ;;  %s8408_s29 = int_to_ptr.vmem [resolvable:$false] %s8407_s29 }
  0x1d   : > { %8122 = vmatpush3.bf16.msra.mxu0 %v8119_v25 }
  0x1e   : > { %220 = vadd.xlane.f32.xlu0 %v219_v3  ;;  %v391_v3 = vld [vmem:[%s10074_s1 + $0x6] sm:$0x1f] }
  0xa7   : > { %v218_v4 = vpop.xlane.xlu0 %217 }
  0xa8   : > { %v223_v5 = vmul.f32 0.015625, %v218_v4 }
  0xaa   : > { %v225_v6 = vsub.f32 %v211_v0, %v223_v5 }
  0xab   : > { %v221_v7 = vpop.xlane.xlu0 %220 }
  0xac   : > { %v224_v8 = vmul.f32 0.015625, %v221_v7  ;;  %v227_v9 = vmul.f32 %v225_v6, %v225_v6 }
  0xae   : > { %v226_v10 = vsub.f32 %v212_v1, %v224_v8  ;;  %v229_v11 = vsel %vm215_vm0, %v227_v9, 0.0  ;;  %v7230_v8 = vld [vmem:[%s10074_s1 + $0x4] ss:$0 sm:$0xff] }
  0xaf   : > { %230 = vadd.xlane.f32.xlu1 %v229_v11 }
  0xb0   : > { %v228_v12 = vmul.f32 %v226_v10, %v226_v10 }
  0xb2   : > { %v232_v13 = vsel %vm215_vm0, %v228_v12, 0.0 }
  0xb3   : > { %233 = vadd.xlane.f32.xlu1 %v232_v13  ;;  %v398_v13 = vrot.slane %v391_v3, 5 }
 0x13c   : > { %v231_v26 = vpop.xlane.xlu1 %230 }
 0x13d   : > { %v235_v27 = vmul.f32 0.015625, %v231_v26 }
 0x13f   : > { %v237_v28 = vadd.f32 1e-05, %v235_v27 }
 0x140   : > { %v234_v29 = vpop.xlane.xlu1 %233 }
 0x141   : > { %8227 = vrsqrt.f32 %v237_v28  ;;  %v236_v30 = vmul.f32 0.015625, %v234_v29 }
 0x143   : > { %v238_v31 = vadd.f32 1e-05, %v236_v30 }
 0x145   : > { %8229 = vrsqrt.f32 %v238_v31 }
 0x14b   : > { %v8228_v32 = vpop.eup %8227 }
 0x14c   : > { %v241_v34 = vmul.f32 %v8228_v32, %v225_v6  ;;  %v392_v6 = vld [vmem:[%s10074_s1 + $0x5] sm:$0x1] }
 0x14d   : > { %v393_v12 = vadd.f32 %v392_v6, %v391_v3 }
 0x14e   : > { %v247_v36 = vmul.f32 %v7224_v33, %v241_v34 }
 0x14f   : > { %v8230_v37 = vpop.eup %8229  ;;  %v412_v18 = vrot.slane %v393_v12, 6  ;;  %v417_v20 = vrot.slane %v393_v12, 1  ;;  %v407_v21 = vrot.slane %v393_v12, 3 }
 0x150   : > { %v242_v38 = vmul.f32 %v8230_v37, %v226_v10  ;;  %v253_v39 = vadd.f32 %v7225_v35, %v247_v36  ;;  %v395_v10 = vrot.slane %v391_v3, 1 }
 0x152   : > { %v248_v40 = vmul.f32 %v7224_v33, %v242_v38  ;;  %7637 = vmatprep.mubr.msk.f32.mxu0 %vm215_vm0, %v253_v39 }
 0x154   : > { %v254_v41 = vadd.f32 %v7225_v35, %v248_v40 }
 0x156   : > { %7638 = vmatmul.mubr.msk.f32.vlgmr.msra.gmra.mrb[0].mxu0 %vm215_vm0, %v254_v41 }
 0x229   : > { %v7639_v43 = vpop.f32.mrb[0].mxu0 }
 0x22a   : > { %v346_v44 = vadd.f32 %v7639_v43, %v7226_v42  ;;  %v340_v45 = vpop.f32.mrb[1].mxu0 }
 0x22b   : > { %v341_v46 = vadd.f32 %v7226_v42, %v340_v45 }
 0x22c   : > { %v355_v47 = vsel %vm351_vm1, %v346_v44, 0.0 }
 0x22d   : > { %356 = vadd.xlane.f32.xlu1 %v355_v47  ;;  %v352_v48 = vsel %vm351_vm1, %v341_v46, 0.0 }
 0x22e   : > { %353 = vadd.xlane.f32.xlu0 %v352_v48 }
 0x2ba   : > { %v357_v49 = vpop.xlane.xlu1 %356 }
 0x2bb   : > { %v360_v50 = vmul.f32 0.03125, %v357_v49  ;;  %v354_v51 = vpop.xlane.xlu0 %353 }
 0x2bc   : > { %v359_v52 = vmul.f32 0.03125, %v354_v51  ;;  %v490_v51 = vld [vmem:[%s10075_s2 + $0x60] sm:$0xff] }
 0x2bd   : > { %v362_v53 = vsub.f32 %v346_v44, %v360_v50 }
 0x2be   : > { %v361_v54 = vsub.f32 %v341_v46, %v359_v52  ;;  %v491_v52 = vld [vmem:[%s10075_s2 + $0x68] sm:$0xff] }
 0x2bf   : > { %v364_v55 = vmul.f32 %v362_v53, %v362_v53 }
 0x2c0   : > { %v363_v56 = vmul.f32 %v361_v54, %v361_v54 }
 0x2c1   : > { %v368_v57 = vsel %vm351_vm1, %v364_v55, 0.0  ;;  %v8124_v55 = vpack.c.bf16 %v491_v52, %v490_v51 }
 0x2c2   : > { %369 = vadd.xlane.f32.xlu1 %v368_v57  ;;  %v365_v58 = vsel %vm351_vm1, %v363_v56, 0.0  ;;  %v493_v56 = vld [vmem:[%s10075_s2 + $0x78] sm:$0xff]  ;;  %v8469_v57 = vmov 0.0  }
 0x2c3   : > { %366 = vadd.xlane.f32.xlu0 %v365_v58  ;;  %7648 = vmatprep.mubr.msk.f32.mxu1 %vm8468_vm9, %v8469_v57 }
 0x2c4   : > { %7667 = vmatprep.subr.mxu0 %v8469_v57  ;;  %7669 = vmatprep.mubr.msk.f32.mxu0 %vm8468_vm9, %v8469_v57 }
 0x34f   : > { %v370_v59 = vpop.xlane.xlu1 %369 }
 0x350   : > { %v372_v60 = vmul.f32 0.03125, %v370_v59  ;;  %v367_v61 = vpop.xlane.xlu0 %366 }
 0x351   : > { %v371_v62 = vmul.f32 0.03125, %v367_v61 }
 0x352   : > { %v374_v63 = vadd.f32 1e-05, %v372_v60 }
 0x353   : > { %v373_v0 = vadd.f32 1e-05, %v371_v62 }
 0x354   : > { %8231 = vrsqrt.f32 %v374_v63 }
 0x355   : > { %8233 = vrsqrt.f32 %v373_v0 }
 0x35e   : > { %v8232_v1 = vpop.eup %8231 }
 0x35f   : > { %v8234_v4 = vpop.eup %8233  ;;  %v378_v5 = vmul.f32 %v8232_v1, %v362_v53  ;;  %v492_v53 = vld [vmem:[%s10075_s2 + $0x70] sm:$0xff] }
 0x360   : > { %v377_v7 = vmul.f32 %v8234_v4, %v361_v54  ;;  %v8467_v54 = vmov 0.0|0.0   ;;  %v8127_v58 = vpack.c.bf16 %v493_v56, %v492_v53 }
 0x361   : > { %v384_v9 = vmul.f32 %v7229_v2, %v378_v5  ;;  %8123 = vmatprep.subr.bf16.mxu1 %v8467_v54  ;;  %v7231_v5 = vld [vmem:[%s10074_s1 + $0xe] ss:$0 sm:$0xff] }
 0x362   : > { %v383_v11 = vmul.f32 %v7229_v2, %v377_v7  ;;  %8125 = vmatpush3.bf16.msra.mxu1 %v8124_v55 }
 0x363   : > { %v390_v14 = vadd.f32 %v7230_v8, %v384_v9  ;;  %8126 = vmatprep.subr.bf16.mxu1 %v8467_v54 }
 0x364   : > { %v389_v15 = vadd.f32 %v7230_v8, %v383_v11  ;;  %v7232_v8 = vld [vmem:[%s10074_s1 + $0xf] ss:$0 sm:$0xff] }
 0x365   : > { %v401_v16 = vadd.f32 %v395_v10, %v390_v14  ;;  %v402_v25 = vadd.f32 %v398_v13, %v390_v14 }
 0x366   : > { %v400_v17 = vadd.f32 %v398_v13, %v389_v15  ;;  %v397_v19 = vadd.f32 %v395_v10, %v389_v15  ;;  %8128 = vmatpush3.bf16.msra.mxu1 %v8127_v58 }
 0x367   : > { %v415_v24 = vrot.slane %v401_v16, 5  ;;  %v8624_v34 = vrot.slane %v402_v25, 4  ;;  %7657 = vmatprep.subr.mxu1 %v8469_v57 }
 0x368   : > { %v410_v22 = vrot.slane %v400_v17, 6  ;;  %v404_v23 = vrot.slane %v397_v19, 7 }
 0x369   : > { %v443_v35 = vsel %vm442_vm8, %v8624_v34, 0.0 }
 0x36a   : > { %v429_v26 = vsel %vm428_vm2, %v410_v22, %v412_v18  ;;  %v423_v27 = vsel %vm422_vm3, %v393_v12, %v404_v23 }
 0x36b   : > { %v431_v28 = vsel %vm430_vm4, %v429_v26, %v415_v24  ;;  %v425_v29 = vsel %vm424_vm5, %v423_v27, %v407_v21 }
 0x36c   : > { %v8616_v30 = vsel %vm432_vm6, %v431_v28, %v417_v20  ;;  %v8618_v31 = vsel %vm426_vm7, %v425_v29, %v410_v22 }
 0x36d   : > { %v439_v32 = vsel %vm351_vm1, %v8616_v30, 0.0  ;;  %v436_v33 = vsel %vm351_vm1, %v8618_v31, 0.0 }
 0x36e   : > { %440 = vadd.xlane.f32.xlu1 %v439_v32  ;;  %437 = vadd.xlane.f32.xlu0 %v436_v33 }
 0x372   : > { %444 = vadd.xlane.f32.xlu0 %v443_v35 }
 0x3fb   : > { %v441_v36 = vpop.xlane.xlu1 %440  ;;  %v438_v37 = vpop.xlane.xlu0 %437 }
 0x3fc   : > { %v447_v38 = vmul.f32 0.03125, %v441_v36  ;;  %v446_v39 = vmul.f32 0.03125, %v438_v37 }
 0x3fe   : > { %v450_v40 = vsub.f32 %v8616_v30, %v447_v38  ;;  %v449_v41 = vsub.f32 %v8618_v31, %v446_v39 }
 0x3ff   : > { %v445_v42 = vpop.xlane.xlu0 %444 }
 0x400   : > { %v448_v43 = vmul.f32 0.03125, %v445_v42  ;;  %v453_v44 = vmul.f32 %v450_v40, %v450_v40  ;;  %v452_v45 = vmul.f32 %v449_v41, %v449_v41 }
 0x402   : > { %v451_v46 = vsub.f32 %v8624_v34, %v448_v43  ;;  %v458_v47 = vsel %vm351_vm1, %v453_v44, 0.0  ;;  %v455_v48 = vsel %vm351_vm1, %v452_v45, 0.0 }
 0x403   : > { %459 = vadd.xlane.f32.xlu0 %v458_v47  ;;  %456 = vadd.xlane.f32.xlu1 %v455_v48 }
 0x404   : > { %v454_v49 = vmul.f32 %v451_v46, %v451_v46 }
 0x406   : > { %v461_v50 = vsel %vm442_vm8, %v454_v49, 0.0 }
 0x407   : > { %462 = vadd.xlane.f32.xlu1 %v461_v50 }
 0x490   : > { %v457_v59 = vpop.xlane.xlu1 %456  ;;  %v460_v60 = vpop.xlane.xlu0 %459 }
 0x491   : > { %v464_v61 = vmul.f32 0.03125, %v457_v59  ;;  %v465_v62 = vmul.f32 0.03125, %v460_v60 }
 0x493   : > { %v467_v63 = vadd.f32 1e-05, %v464_v61  ;;  %v468_v0 = vadd.f32 1e-05, %v465_v62 }
 0x494   : > { %v463_v1 = vpop.xlane.xlu1 %462 }
 0x495   : > { %8235 = vrsqrt.f32 %v467_v63  ;;  %v466_v2 = vmul.f32 0.03125, %v463_v1 }
 0x496   : > { %8237 = vrsqrt.f32 %v468_v0 }
 0x497   : > { %v469_v3 = vadd.f32 1e-05, %v466_v2 }
 0x499   : > { %8239 = vrsqrt.f32 %v469_v3 }
 0x49f   : > { %v8236_v4 = vpop.eup %8235 }
 0x4a0   : > { %v8238_v6 = vpop.eup %8237  ;;  %v473_v7 = vmul.f32 %v8236_v4, %v449_v41 }
 0x4a1   : > { %v474_v9 = vmul.f32 %v8238_v6, %v450_v40 }
 0x4a2   : > { %v480_v10 = vmul.f32 %v7231_v5, %v473_v7 }
 0x4a3   : > { %v8240_v11 = vpop.eup %8239  ;;  %v481_v13 = vmul.f32 %v7231_v5, %v474_v9 }
 0x4a4   : > { %v487_v12 = vadd.f32 %v7232_v8, %v480_v10  ;;  %v475_v14 = vmul.f32 %v8240_v11, %v451_v46 }
 0x4a5   : > { %v488_v15 = vadd.f32 %v7232_v8, %v481_v13 }
 0x4a6   : > { %7649 = vmatmul.mubr.msk.f32.vlgmr.msra.gmra.mrb[0].mxu1 %vm351_vm1, %v487_v12  ;;  %v482_v16 = vmul.f32 %v7231_v5, %v475_v14 }
 0x4a7   : > { %7651 = vmatprep.mubr.msk.f32.mxu1 %vm8468_vm9, %v8469_v57 }
 0x4a8   : > { %v489_v17 = vadd.f32 %v7232_v8, %v482_v16 }
 0x4aa   : > { %7652 = vmatmul.mubr.msk.f32.gmra.mrb[2].mxu1 %vm351_vm1, %v488_v15 }
 0x4ab   : > { %7654 = vmatprep.mubr.msk.f32.mxu1 %vm8468_vm9, %v8469_v57 }
 0x4ae   : > { %7655 = vmatmul.mubr.msk.f32.gmra.mrb[4].mxu1 %vm351_vm1, %v489_v17 }
 0x4af   : > { %7659 = vmatprep.mubr.msk.f32.mxu1 %vm8468_vm9, %v8469_v57 }
 0x579   : > { %v8669_v18 = vpop.f32.mrb[0].mxu1 }
 0x57a   : > { %584 = vrot.lane.b32.xlu0 %v8669_v18, %s8470_s14  ;;  %v7650_v19 = vpop.f32.mrb[1].mxu1  ;;  %586 = vrot.lane.b32.xlu1 %v8669_v18, %s8471_s20  ;;  %v591_v21 = vrot.slane %v8669_v18, 5 }
 0x57d   : > { %v574_v20 = vpop.f32.mrb[2].mxu1 }
 0x57e   : > { %v592_v22 = vrot.slane %v574_v20, 5  ;;  %588 = vrot.lane.b32.xlu1 %v8669_v18, %s8472_s22  ;;  %v7653_v23 = vpop.f32.mrb[3].mxu1  ;;  %v608_v26 = vrot.slane %v574_v20, 7  ;;  %v8685_v29 = vrot.slane %v574_v20, 2 }
 0x580   : > { %v8679_v24 = vsel %vm430_vm4, %v591_v21, %v592_v22 }
 0x581   : > { %596 = vrot.lane.b32.xlu0 %v8679_v24, %s8471_s20  ;;  %v579_v25 = vpop.f32.mrb[4].mxu1 }
 0x582   : > { %v609_v27 = vrot.slane %v579_v25, 7  ;;  %594 = vrot.lane.b32.xlu1 %v8679_v24, %s8470_s14  ;;  %v7656_v28 = vpop.f32.mrb[5].mxu1 }
 0x584   : > { %v8688_v32 = vsel %vm422_vm3, %v608_v26, %v609_v27 }
 0x585   : > { %601 = vrot.lane.b32.xlu0 %v8685_v29, %s8470_s14 }
 0x586   : > { %598 = vrot.lane.b32.xlu1 %v8679_v24, %s8472_s22 }
 0x589   : > { %605 = vrot.lane.b32.xlu0 %v8685_v29, %s8472_s22 }
 0x58a   : > { %603 = vrot.lane.b32.xlu1 %v8685_v29, %s8471_s20 }
 0x58d   : > { %613 = vrot.lane.b32.xlu0 %v8688_v32, %s8471_s20 }
 0x58e   : > { %611 = vrot.lane.b32.xlu1 %v8688_v32, %s8470_s14 }
 0x591   : > { %617 = vrot.lane.b32.xlu0 %v8669_v18, %s8473_s23 }
 0x592   : > { %615 = vrot.lane.b32.xlu1 %v8688_v32, %s8472_s22 }
 0x5ec   : > { %v587_v33 = vpop.permute.xlu1 %586  ;;  %v585_v35 = vpop.permute.xlu0 %584 }
 0x5ed   : > { %770 = vrot.lane.b32.xlu0 %v587_v33, %s8473_s23  ;;  %694 = vrot.lane.b32.xlu1 %v585_v35, %s8473_s23 }
 0x5f0   : > { %v589_v36 = vpop.permute.xlu1 %588 }
 0x5f1   : > { %922 = vrot.lane.b32.xlu0 %v8679_v24, %s8473_s23  ;;  %846 = vrot.lane.b32.xlu1 %v589_v36, %s8473_s23 }
 0x5f3   : > { %v8711_v37 = vpop.permute.xlu0 %596 }
 0x5f4   : > { %v8713_v38 = vpop.permute.xlu1 %594 }
 0x5f5   : > { %998 = vrot.lane.b32.xlu1 %v8713_v38, %s8473_s23  ;;  %1074 = vrot.lane.b32.xlu0 %v8711_v37, %s8473_s23 }
 0x5f7   : > { %v8719_v39 = vpop.permute.xlu0 %601 }
 0x5f8   : > { %v8721_v40 = vpop.permute.xlu1 %598 }
 0x5f9   : > { %1150 = vrot.lane.b32.xlu1 %v8721_v40, %s8473_s23  ;;  %1226 = vrot.lane.b32.xlu0 %v8685_v29, %s8473_s23 }
 0x5fb   : > { %v8727_v41 = vpop.permute.xlu0 %605 }
 0x5fc   : > { %v8729_v42 = vpop.permute.xlu1 %603 }
 0x5fd   : > { %1378 = vrot.lane.b32.xlu0 %v8729_v42, %s8473_s23  ;;  %1302 = vrot.lane.b32.xlu1 %v8719_v39, %s8473_s23 }
 0x5ff   : > { %v8735_v43 = vpop.permute.xlu0 %613 }
 0x600   : > { %v8741_v44 = vpop.permute.xlu1 %611 }
 0x601   : > { %1530 = vrot.lane.b32.xlu0 %v8688_v32, %s8473_s23  ;;  %1454 = vrot.lane.b32.xlu1 %v8727_v41, %s8473_s23 }
 0x603   : > { %v618_v45 = vpop.permute.xlu0 %617 }
 0x604   : > { %7658 = vmatpush3.xpose.msk.msra.mxu1 %vm619_vm10, %v618_v45  ;;  %v8751_v46 = vpop.permute.xlu1 %615 }
 0x605   : > { %1606 = vrot.lane.b32.xlu1 %v8741_v44, %s8473_s23  ;;  %1682 = vrot.lane.b32.xlu0 %v8735_v43, %s8473_s23 }
 0x606   : > { %7662 = vmatprep.subr.mxu1 %v8469_v57 }
 0x607   : > { %7660 = vmatmul.mubr.msk.f32.vlgmr.msra.gmra.mrb[6].mxu1 %vm619_vm10, %v8669_v18 }
 0x608   : > { %7664 = vmatprep.mubr.msk.f32.mxu1 %vm8468_vm9, %v8469_v57 }
 0x609   : > { %1758 = vrot.lane.b32.xlu1 %v8751_v46, %s8473_s23  ;;  %2027 = vrot.lane.b32.xlu0 %v8669_v18, %s8474_s27 }
 0x60d   : > { %2105 = vrot.lane.b32.xlu1 %v585_v35, %s8474_s27  ;;  %2182 = vrot.lane.b32.xlu0 %v587_v33, %s8474_s27 }
 0x611   : > { %2259 = vrot.lane.b32.xlu1 %v589_v36, %s8474_s27  ;;  %2490 = vrot.lane.b32.xlu0 %v8711_v37, %s8474_s27 }
 0x615   : > { %2336 = vrot.lane.b32.xlu1 %v8679_v24, %s8474_s27  ;;  %2644 = vrot.lane.b32.xlu0 %v8685_v29, %s8474_s27 }
 0x619   : > { %2413 = vrot.lane.b32.xlu1 %v8713_v38, %s8474_s27 }
 0x61d   : > { %2567 = vrot.lane.b32.xlu1 %v8721_v40, %s8474_s27 }
 0x621   : > { %2721 = vrot.lane.b32.xlu1 %v8719_v39, %s8474_s27 }
 0x65f   : > { %v695_v47 = vpop.permute.xlu1 %694  ;;  %v771_v48 = vpop.permute.xlu0 %770 }
 0x660   : > { %7663 = vmatpush3.xpose.msk.msra.mxu1 %vm619_vm10, %v695_v47  ;;  %7668 = vmatpush3.xpose.msk.msra.mxu0 %vm619_vm10, %v771_v48 }
 0x661   : > { %7672 = vmatprep.subr.mxu1 %v8469_v57  ;;  %7677 = vmatprep.subr.mxu0 %v8469_v57 }
 0x663   : > { %v847_v49 = vpop.permute.xlu1 %846  ;;  %7665 = vmatmul.mubr.msk.f32.vlgmr.msra.gmra.mrb[8].mxu1 %vm619_vm10, %v585_v35  ;;  %7670 = vmatmul.mubr.msk.f32.vlgmr.msra.gmra.mrb[2].mxu0 %vm619_vm10, %v587_v33  ;;  %v923_v50 = vpop.permute.xlu0 %922 }
 0x664   : > { %7673 = vmatpush3.xpose.msk.msra.mxu1 %vm619_vm10, %v847_v49  ;;  %7678 = vmatpush3.xpose.msk.msra.mxu0 %vm619_vm10, %v923_v50 }
 0x665   : > { %7674 = vmatprep.mubr.msk.f32.mxu1 %vm8468_vm9, %v8469_v57  ;;  %7679 = vmatprep.mubr.msk.f32.mxu0 %vm8468_vm9, %v8469_v57 }
 0x666   : > { %7682 = vmatprep.subr.mxu1 %v8469_v57  ;;  %7687 = vmatprep.subr.mxu0 %v8469_v57 }
 0x667   : > { %v999_v51 = vpop.permute.xlu1 %998  ;;  %7675 = vmatmul.mubr.msk.f32.vlgmr.msra.gmra.mrb[10].mxu1 %vm619_vm10, %v589_v36  ;;  %7680 = vmatmul.mubr.msk.f32.vlgmr.msra.gmra.mrb[4].mxu0 %vm619_vm10, %v8679_v24  ;;  %v1075_v52 = vpop.permute.xlu0 %1074 }
 0x668   : > { %7683 = vmatpush3.xpose.msk.msra.mxu1 %vm619_vm10, %v999_v51  ;;  %7688 = vmatpush3.xpose.msk.msra.mxu0 %vm619_vm10, %v1075_v52 }
 0x669   : > { %7684 = vmatprep.mubr.msk.f32.mxu1 %vm8468_vm9, %v8469_v57  ;;  %7689 = vmatprep.mubr.msk.f32.mxu0 %vm8468_vm9, %v8469_v57 }
 0x66a   : > { %7692 = vmatprep.subr.mxu1 %v8469_v57  ;;  %7697 = vmatprep.subr.mxu0 %v8469_v57 }
 0x66b   : > { %v1151_v53 = vpop.permute.xlu1 %1150  ;;  %7685 = vmatmul.mubr.msk.f32.vlgmr.msra.gmra.mrb[12].mxu1 %vm619_vm10, %v8713_v38  ;;  %7690 = vmatmul.mubr.msk.f32.vlgmr.msra.gmra.mrb[6].mxu0 %vm619_vm10, %v8711_v37  ;;  %v1227_v55 = vpop.permute.xlu0 %1226 }
 0x66c   : > { %7693 = vmatpush3.xpose.msk.msra.mxu1 %vm619_vm10, %v1151_v53  ;;  %7698 = vmatpush3.xpose.msk.msra.mxu0 %vm619_vm10, %v1227_v55 }
 0x66d   : > { %7694 = vmatprep.mubr.msk.f32.mxu1 %vm8468_vm9, %v8469_v57  ;;  %7699 = vmatprep.mubr.msk.f32.mxu0 %vm8468_vm9, %v8469_v57 }
 0x66e   : > { %7702 = vmatprep.subr.mxu1 %v8469_v57  ;;  %7707 = vmatprep.subr.mxu0 %v8469_v57 }
 0x66f   : > { %v1303_v56 = vpop.permute.xlu1 %1302  ;;  %7695 = vmatmul.mubr.msk.f32.vlgmr.msra.gmra.mrb[14].mxu1 %vm619_vm10, %v8721_v40  ;;  %7700 = vmatmul.mubr.msk.f32.vlgmr.msra.gmra.mrb[8].mxu0 %vm619_vm10, %v8685_v29  ;;  %v1379_v58 = vpop.permute.xlu0 %1378 }
 0x670   : > { %7703 = vmatpush3.xpose.msk.msra.mxu1 %vm619_vm10, %v1303_v56  ;;  %7708 = vmatpush3.xpose.msk.msra.mxu0 %vm619_vm10, %v1379_v58 }
 0x671   : > { %7704 = vmatprep.mubr.msk.f32.mxu1 %vm8468_vm9, %v8469_v57  ;;  %7709 = vmatprep.mubr.msk.f32.mxu0 %vm8468_vm9, %v8469_v57 }
 0x672   : > { %7712 = vmatprep.subr.mxu1 %v8469_v57  ;;  %7717 = vmatprep.subr.mxu0 %v8469_v57 }
 0x673   : > { %v1455_v59 = vpop.permute.xlu1 %1454  ;;  %7705 = vmatmul.mubr.msk.f32.vlgmr.msra.gmra.mrb[16].mxu1 %vm619_vm10, %v8719_v39  ;;  %7710 = vmatmul.mubr.msk.f32.vlgmr.msra.gmra.mrb[10].mxu0 %vm619_vm10, %v8729_v42  ;;  %v1531_v60 = vpop.permute.xlu0 %1530 }
 0x674   : > { %7713 = vmatpush3.xpose.msk.msra.mxu1 %vm619_vm10, %v1455_v59  ;;  %7718 = vmatpush3.xpose.msk.msra.mxu0 %vm619_vm10, %v1531_v60 }
 0x675   : > { %7714 = vmatprep.mubr.msk.f32.mxu1 %vm8468_vm9, %v8469_v57  ;;  %7719 = vmatprep.mubr.msk.f32.mxu0 %vm8468_vm9, %v8469_v57 }
 0x676   : > { %7722 = vmatprep.subr.mxu1 %v8469_v57  ;;  %7727 = vmatprep.subr.mxu0 %v8469_v57 }
 0x677   : > { %v1607_v61 = vpop.permute.xlu1 %1606  ;;  %7715 = vmatmul.mubr.msk.f32.vlgmr.msra.gmra.mrb[18].mxu1 %vm619_vm10, %v8727_v41  ;;  %7720 = vmatmul.mubr.msk.f32.vlgmr.msra.gmra.mrb[12].mxu0 %vm619_vm10, %v8688_v32  ;;  %v1683_v62 = vpop.permute.xlu0 %1682 }
 0x678   : > { %7723 = vmatpush3.xpose.msk.msra.mxu1 %vm619_vm10, %v1607_v61  ;;  %7728 = vmatpush3.xpose.msk.msra.mxu0 %vm619_vm10, %v1683_v62 }
 0x679   : > { %7724 = vmatprep.mubr.msk.f32.mxu1 %vm8468_vm9, %v8469_v57  ;;  %7729 = vmatprep.mubr.msk.f32.mxu0 %vm8468_vm9, %v8469_v57 }
 0x67a   : > { %7732 = vmatprep.subr.mxu1 %v8469_v57  ;;  %7737 = vmatprep.subr.mxu0 %v8469_v57 }
 0x67b   : > { %v1759_v63 = vpop.permute.xlu1 %1758  ;;  %7725 = vmatmul.mubr.msk.f32.vlgmr.msra.gmra.mrb[20].mxu1 %vm619_vm10, %v8741_v44  ;;  %7730 = vmatmul.mubr.msk.f32.vlgmr.msra.gmra.mrb[14].mxu0 %vm619_vm10, %v8735_v43  ;;  %v2028_v0 = vpop.permute.xlu0 %2027 }
 0x67c   : > { %7733 = vmatpush3.xpose.msk.msra.mxu1 %vm619_vm10, %v1759_v63  ;;  %7738 = vmatpush3.msk.msra.mxu0 %vm424_vm5, %v2028_v0 }
 0x67d   : > { %7734 = vmatprep.mubr.msk.f32.mxu1 %vm8468_vm9, %v8469_v57  ;;  %7742 = vmatprep.subr.mxu1 %v8469_v57 }
 0x67e   : > { %7739 = vmatprep.mubr.msk.f32.mxu0 %vm8468_vm9, %v8469_v57  ;;  %7747 = vmatprep.subr.mxu0 %v8469_v57 }
 0x67f   : > { %v2106_v1 = vpop.permute.xlu1 %2105  ;;  %7735 = vmatmul.mubr.msk.f32.vlgmr.msra.gmra.mrb[22].mxu1 %vm619_vm10, %v8751_v46  ;;  %v8929_v60 = vpop.permute.xlu0 %2182 }
 0x680   : > { %7743 = vmatpush3.msk.msra.mxu1 %vm424_vm5, %v2106_v1  ;;  %7744 = vmatprep.mubr.msk.f32.mxu1 %vm8468_vm9, %v8469_v57 }
 0x681   : > { %7752 = vmatprep.subr.mxu1 %v8469_v57 }
 0x683   : > { %v8931_v61 = vpop.permute.xlu0 %2490 }
 0x687   : > { %v8937_v62 = vpop.permute.xlu0 %2644 }
 0x6da   : > { %v8865_v2 = vpop.f32.mrb[6].mxu1 }
 0x6db   : > { %v7661_v3 = vpop.f32.mrb[7].mxu1  ;;  %v1835_v4 = vsel %vm1834_vm11, %v8865_v2, -inf }
 0x6dc   : > { %1836 = vmax.xlane.f32.xlu0 %v1835_v4 }
 0x736   : > { %v8869_v5 = vpop.f32.mrb[8].mxu1  ;;  %v8871_v6 = vpop.f32.mrb[2].mxu0 }
 0x737   : > { %v7666_v7 = vpop.f32.mrb[9].mxu1  ;;  %v7671_v8 = vpop.f32.mrb[3].mxu0  ;;  %v1838_v9 = vsel %vm1834_vm11, %v8869_v5, -inf  ;;  %v1841_v10 = vsel %vm1834_vm11, %v8871_v6, -inf }
 0x738   : > { %1839 = vmax.xlane.f32.xlu1 %v1838_v9  ;;  %1842 = vmax.xlane.f32.xlu0 %v1841_v10 }
 0x73a   : > { %v8877_v11 = vpop.f32.mrb[10].mxu1  ;;  %v8879_v12 = vpop.f32.mrb[4].mxu0 }
 0x73b   : > { %v7676_v13 = vpop.f32.mrb[11].mxu1  ;;  %v7681_v14 = vpop.f32.mrb[5].mxu0  ;;  %v1844_v15 = vsel %vm1834_vm11, %v8877_v11, -inf  ;;  %v1847_v21 = vsel %vm1834_vm11, %v8879_v12, -inf }
 0x73c   : > { %1845 = vmax.xlane.f32.xlu0 %v1844_v15 }
 0x73e   : > { %v8883_v16 = vpop.f32.mrb[12].mxu1  ;;  %v8885_v17 = vpop.f32.mrb[6].mxu0 }
 0x73f   : > { %v7686_v18 = vpop.f32.mrb[13].mxu1  ;;  %v7691_v19 = vpop.f32.mrb[7].mxu0  ;;  %v1850_v20 = vsel %vm1834_vm11, %v8883_v16, -inf  ;;  %v1853_v27 = vsel %vm1834_vm11, %v8885_v17, -inf }
 0x740   : > { %1851 = vmax.xlane.f32.xlu1 %v1850_v20  ;;  %1848 = vmax.xlane.f32.xlu0 %v1847_v21 }
 0x742   : > { %v8891_v22 = vpop.f32.mrb[14].mxu1  ;;  %v8893_v23 = vpop.f32.mrb[8].mxu0 }
 0x743   : > { %v7696_v24 = vpop.f32.mrb[15].mxu1  ;;  %v7701_v25 = vpop.f32.mrb[9].mxu0  ;;  %v1856_v26 = vsel %vm1834_vm11, %v8891_v22, -inf  ;;  %v1859_v37 = vsel %vm1834_vm11, %v8893_v23, -inf }
 0x744   : > { %1857 = vmax.xlane.f32.xlu1 %v1856_v26  ;;  %1854 = vmax.xlane.f32.xlu0 %v1853_v27 }
 0x746   : > { %v8899_v28 = vpop.f32.mrb[16].mxu1  ;;  %v8901_v29 = vpop.f32.mrb[10].mxu0 }
 0x747   : > { %v7706_v33 = vpop.f32.mrb[17].mxu1  ;;  %v7711_v35 = vpop.f32.mrb[11].mxu0  ;;  %v1862_v36 = vsel %vm1834_vm11, %v8899_v28, -inf  ;;  %v1865_v48 = vsel %vm1834_vm11, %v8901_v29, -inf }
 0x748   : > { %1863 = vmax.xlane.f32.xlu1 %v1862_v36  ;;  %1860 = vmax.xlane.f32.xlu0 %v1859_v37 }
 0x74a   : > { %v8907_v38 = vpop.f32.mrb[18].mxu1  ;;  %v8909_v39 = vpop.f32.mrb[12].mxu0 }
 0x74b   : > { %v7716_v40 = vpop.f32.mrb[19].mxu1  ;;  %v7721_v45 = vpop.f32.mrb[13].mxu0  ;;  %v1868_v47 = vsel %vm1834_vm11, %v8907_v38, -inf  ;;  %v1871_v55 = vsel %vm1834_vm11, %v8909_v39, -inf }
 0x74c   : > { %1869 = vmax.xlane.f32.xlu1 %v1868_v47  ;;  %1866 = vmax.xlane.f32.xlu0 %v1865_v48 }
 0x74e   : > { %v8915_v49 = vpop.f32.mrb[20].mxu1  ;;  %v8917_v50 = vpop.f32.mrb[14].mxu0 }
 0x74f   : > { %v7726_v51 = vpop.f32.mrb[21].mxu1  ;;  %v7731_v52 = vpop.f32.mrb[15].mxu0  ;;  %v1874_v53 = vsel %vm1834_vm11, %v8915_v49, -inf  ;;  %v1877_v59 = vsel %vm1834_vm11, %v8917_v50, -inf }
 0x750   : > { %1875 = vmax.xlane.f32.xlu1 %v1874_v53  ;;  %1872 = vmax.xlane.f32.xlu0 %v1871_v55 }
 0x752   : > { %v8923_v56 = vpop.f32.mrb[22].mxu1 }
 0x753   : > { %v7736_v58 = vpop.f32.mrb[23].mxu1 }
 0x754   : > { %1878 = vmax.xlane.f32.xlu0 %v1877_v59 }
 0x761   : > { %2875 = vrot.lane.b32.xlu1 %v8727_v41, %s8474_s27  ;;  %v1880_v41 = vsel %vm1834_vm11, %v8923_v56, -inf }
 0x769   : > { %v1837_v63 = vpop.xlane.xlu0 %1836 }
 0x76a   : > { %2798 = vrot.lane.b32.xlu0 %v8729_v42, %s8474_s27  ;;  %v1883_v0 = vsub.f32 %v8865_v2, %v1837_v63 }
 0x76c   : > { %v1899_v1 = vmul.f32 1.442695, %v1883_v0 }
 0x76e   : > { %2952 = vrot.lane.b32.xlu0 %v8688_v32, %s8474_s27  ;;  %8241 = vpow2.f32 %v1899_v1  ;;  %v8948_v32 = vpop.permute.xlu1 %2259 }
 0x772   : > { %v8950_v42 = vpop.permute.xlu1 %2336 }
 0x776   : > { %v8952_v2 = vpop.permute.xlu1 %2413 }
 0x778   : > { %v8942_v3 = vpop.eup %8241 }
 0x779   : > { %v1931_v4 = vsel %vm1834_vm11, %v8942_v3, 0.0 }
 0x77a   : > { %v8954_v7 = vpop.permute.xlu1 %2567 }
 0x77e   : > { %v8956_v8 = vpop.permute.xlu1 %2721 }
 0x785   : > { %1881 = vmax.xlane.f32.xlu1 %v1880_v41 }
 0x78d   : > { %1932 = vadd.xlane.f32.xlu0 %v1931_v4 }
 0x796   : > { %3029 = vrot.lane.b32.xlu1 %v8741_v44, %s8474_s27 }
 0x7c5   : > { %v1840_v9 = vpop.xlane.xlu1 %1839  ;;  %v1843_v10 = vpop.xlane.xlu0 %1842 }
 0x7c6   : > { %v1884_v13 = vsub.f32 %v8869_v5, %v1840_v9  ;;  %v1885_v14 = vsub.f32 %v8871_v6, %v1843_v10 }
 0x7c8   : > { %v1901_v15 = vmul.f32 1.442695, %v1884_v13  ;;  %v1903_v18 = vmul.f32 1.442695, %v1885_v14 }
 0x7c9   : > { %v1846_v19 = vpop.xlane.xlu0 %1845 }
 0x7ca   : > { %8243 = vpow2.f32 %v1901_v15  ;;  %v1886_v44 = vsub.f32 %v8877_v11, %v1846_v19 }
 0x7cb   : > { %8245 = vpow2.f32 %v1903_v18 }
 0x7cc   : > { %v1905_v20 = vmul.f32 1.442695, %v1886_v44 }
 0x7cd   : > { %v1852_v21 = vpop.xlane.xlu1 %1851  ;;  %v1849_v24 = vpop.xlane.xlu0 %1848 }
 0x7ce   : > { %8247 = vpow2.f32 %v1905_v20  ;;  %v1888_v25 = vsub.f32 %v8883_v16, %v1852_v21  ;;  %v1887_v26 = vsub.f32 %v8879_v12, %v1849_v24 }
 0x7d0   : > { %v1909_v27 = vmul.f32 1.442695, %v1888_v25  ;;  %v1907_v33 = vmul.f32 1.442695, %v1887_v26 }
 0x7d1   : > { %v1858_v5 = vpop.xlane.xlu1 %1857  ;;  %v1855_v35 = vpop.xlane.xlu0 %1854 }
 0x7d2   : > { %8249 = vpow2.f32 %v1909_v27  ;;  %v1890_v6 = vsub.f32 %v8891_v22, %v1858_v5  ;;  %v1889_v36 = vsub.f32 %v8885_v17, %v1855_v35 }
 0x7d3   : > { %8251 = vpow2.f32 %v1907_v33 }
 0x7d4   : > { %v8965_v11 = vpop.eup %8243  ;;  %v1913_v37 = vmul.f32 1.442695, %v1890_v6  ;;  %v1911_v40 = vmul.f32 1.442695, %v1889_v36 }
 0x7d5   : > { %v8967_v45 = vpop.eup %8245  ;;  %v1864_v47 = vpop.xlane.xlu1 %1863  ;;  %v1934_v12 = vsel %vm1834_vm11, %v8965_v11, 0.0 }
 0x7d6   : > { %v1861_v16 = vpop.xlane.xlu0 %1860  ;;  %8253 = vpow2.f32 %v1913_v37  ;;  %v1892_v48 = vsub.f32 %v8899_v28, %v1864_v47  ;;  %1935 = vadd.xlane.f32.xlu1 %v1934_v12  ;;  %v1937_v17 = vsel %vm1834_vm11, %v8967_v45, 0.0 }
 0x7d7   : > { %v1891_v51 = vsub.f32 %v8893_v23, %v1861_v16  ;;  %8255 = vpow2.f32 %v1911_v40  ;;  %1938 = vadd.xlane.f32.xlu0 %v1937_v17 }
 0x7d8   : > { %v8975_v22 = vpop.eup %8247  ;;  %v1917_v52 = vmul.f32 1.442695, %v1892_v48 }
 0x7d9   : > { %v1915_v53 = vmul.f32 1.442695, %v1891_v51  ;;  %v1870_v55 = vpop.xlane.xlu1 %1869  ;;  %v1940_v59 = vsel %vm1834_vm11, %v8975_v22, 0.0 }
 0x7da   : > { %v1867_v58 = vpop.xlane.xlu0 %1866  ;;  %8257 = vpow2.f32 %v1917_v52  ;;  %v1894_v28 = vsub.f32 %v8907_v38, %v1870_v55  ;;  %1941 = vadd.xlane.f32.xlu1 %v1940_v59 }
 0x7db   : > { %v1893_v23 = vsub.f32 %v8901_v29, %v1867_v58  ;;  %8259 = vpow2.f32 %v1915_v53 }
 0x7dc   : > { %v8981_v63 = vpop.eup %8249  ;;  %v1921_v0 = vmul.f32 1.442695, %v1894_v28 }
 0x7dd   : > { %v1919_v1 = vmul.f32 1.442695, %v1893_v23  ;;  %v8983_v41 = vpop.eup %8251  ;;  %v1876_v4 = vpop.xlane.xlu1 %1875  ;;  %v1946_v10 = vsel %vm1834_vm11, %v8981_v63, 0.0 }
 0x7de   : > { %v1873_v9 = vpop.xlane.xlu0 %1872  ;;  %8261 = vpow2.f32 %v1921_v0  ;;  %v1896_v13 = vsub.f32 %v8915_v49, %v1876_v4  ;;  %1947 = vadd.xlane.f32.xlu1 %v1946_v10  ;;  %v1943_v29 = vsel %vm1834_vm11, %v8983_v41, 0.0 }
 0x7df   : > { %v1895_v38 = vsub.f32 %v8909_v39, %v1873_v9  ;;  %8263 = vpow2.f32 %v1919_v1  ;;  %1944 = vadd.xlane.f32.xlu0 %v1943_v29 }
 0x7e0   : > { %v8991_v14 = vpop.eup %8253  ;;  %v1925_v15 = vmul.f32 1.442695, %v1896_v13 }
 0x7e1   : > { %v1923_v18 = vmul.f32 1.442695, %v1895_v38  ;;  %v8993_v19 = vpop.eup %8255  ;;  %v1952_v20 = vsel %vm1834_vm11, %v8991_v14, 0.0  ;;  %v9030_v12 = vpop.permute.xlu1 %2875 }
 0x7e2   : > { %v1879_v44 = vpop.xlane.xlu0 %1878  ;;  %8265 = vpow2.f32 %v1925_v15  ;;  %1953 = vadd.xlane.f32.xlu1 %v1952_v20  ;;  %v1949_v39 = vsel %vm1834_vm11, %v8993_v19, 0.0 }
 0x7e3   : > { %v1897_v49 = vsub.f32 %v8917_v50, %v1879_v44  ;;  %8267 = vpow2.f32 %v1923_v18  ;;  %1950 = vadd.xlane.f32.xlu0 %v1949_v39 }
 0x7e4   : > { %v9000_v21 = vpop.eup %8257 }
 0x7e5   : > { %v1927_v24 = vmul.f32 1.442695, %v1897_v49  ;;  %v9002_v25 = vpop.eup %8259  ;;  %v1958_v26 = vsel %vm1834_vm11, %v9000_v21, 0.0 }
 0x7e6   : > { %1959 = vadd.xlane.f32.xlu1 %v1958_v26  ;;  %v1955_v27 = vsel %vm1834_vm11, %v9002_v25, 0.0  ;;  %v9032_v48 = vpop.permute.xlu0 %2798 }
 0x7e7   : > { %8269 = vpow2.f32 %v1927_v24  ;;  %1956 = vadd.xlane.f32.xlu0 %v1955_v27 }
 0x7e8   : > { %v9008_v50 = vpop.eup %8261 }
 0x7e9   : > { %v9010_v33 = vpop.eup %8263  ;;  %v1964_v5 = vsel %vm1834_vm11, %v9008_v50, 0.0 }
 0x7ea   : > { %1965 = vadd.xlane.f32.xlu1 %v1964_v5  ;;  %v1961_v35 = vsel %vm1834_vm11, %v9010_v33, 0.0  ;;  %v9035_v53 = vpop.permute.xlu0 %2952 }
 0x7eb   : > { %1962 = vadd.xlane.f32.xlu0 %v1961_v35 }
 0x7ec   : > { %v9016_v6 = vpop.eup %8265 }
 0x7ed   : > { %v9018_v36 = vpop.eup %8267  ;;  %v1970_v37 = vsel %vm1834_vm11, %v9016_v6, 0.0 }
 0x7ee   : > { %1971 = vadd.xlane.f32.xlu1 %v1970_v37  ;;  %v1967_v40 = vsel %vm1834_vm11, %v9018_v36, 0.0 }
 0x7ef   : > { %1968 = vadd.xlane.f32.xlu0 %v1967_v40 }
 0x7f1   : > { %v9024_v47 = vpop.eup %8269 }
 0x7f2   : > { %v1973_v16 = vsel %vm1834_vm11, %v9024_v47, 0.0 }
 0x7f3   : > { %1974 = vadd.xlane.f32.xlu1 %v1973_v16 }
 0x804   : > { %3183 = vrot.lane.b32.xlu1 %v8751_v46, %s8474_s27 }
 0x812   : > { %v1882_v51 = vpop.xlane.xlu1 %1881 }
 0x813   : > { %v1898_v17 = vsub.f32 %v8923_v56, %v1882_v51 }
 0x815   : > { %v1929_v52 = vmul.f32 1.442695, %v1898_v17  ;;  %v3334_v17 = vld [vmem:[%s10075_s2 + $0x80] sm:$0xff] }
 0x816   : > { %v9059_v28 = vpop.permute.xlu1 %3029 }
 0x817   : > { %8271 = vpow2.f32 %v1929_v52  ;;  %v3335_v52 = vld [vmem:[%s10075_s2 + $0x88] sm:$0xff] }
 0x81a   : > { %v1933_v55 = vpop.xlane.xlu0 %1932 }
 0x81b   : > { %8273 = vrcp.f32 %v1933_v55 }
 0x821   : > { %v9039_v58 = vpop.eup %8271 }
 0x822   : > { %v1976_v46 = vsel %vm1834_vm11, %v9039_v58, 0.0 }
 0x823   : > { %1977 = vadd.xlane.f32.xlu0 %v1976_v46 }
 0x825   : > { %v8274_v59 = vpop.eup %8273 }
 0x826   : > { %v1995_v56 = vmul.f32 %v8274_v59, %v8942_v3 }
 0x828   : > { %2011 = vst.msk [vmem:[%s9046_s6] sm:$0x1f] %vm1834_vm11, %v1995_v56  ;;  %7740 = vmatmul.mubr.msk.f32.vlgmr.msra.gmra.mrb[16].mxu0 %vm2029_vm12, %v1995_v56  ;;  %v3336_v56 = vld [vmem:[%s10075_s2 + $0x90] sm:$0xff] }
 0x829   : > { %7748 = vmatpush3.msk.msra.mxu0 %vm424_vm5, %v8929_v60  ;;  %7749 = vmatprep.mubr.msk.f32.mxu0 %vm8468_vm9, %v8469_v57 }
 0x82a   : > { %7757 = vmatprep.subr.mxu0 %v8469_v57 }
 0x839   : > { %3106 = vrot.lane.b32.xlu0 %v8735_v43, %s8474_s27 }
 0x863   : > { %v1936_v23 = vpop.xlane.xlu1 %1935 }
 0x864   : > { %8275 = vrcp.f32 %v1936_v23  ;;  %v1939_v3 = vpop.xlane.xlu0 %1938 }
 0x865   : > { %8277 = vrcp.f32 %v1939_v3 }
 0x867   : > { %v1942_v0 = vpop.xlane.xlu1 %1941 }
 0x868   : > { %8279 = vrcp.f32 %v1942_v0 }
 0x86b   : > { %v1948_v1 = vpop.xlane.xlu1 %1947 }
 0x86c   : > { %8281 = vrcp.f32 %v1948_v1  ;;  %v1945_v60 = vpop.xlane.xlu0 %1944 }
 0x86d   : > { %8283 = vrcp.f32 %v1945_v60 }
 0x86e   : > { %v8276_v4 = vpop.eup %8275 }
 0x86f   : > { %v8278_v9 = vpop.eup %8277  ;;  %v1954_v10 = vpop.xlane.xlu1 %1953  ;;  %v1996_v13 = vmul.f32 %v8276_v4, %v8965_v11 }
 0x870   : > { %8285 = vrcp.f32 %v1954_v10  ;;  %v1951_v43 = vpop.xlane.xlu0 %1950  ;;  %v1997_v38 = vmul.f32 %v8278_v9, %v8967_v45 }
 0x871   : > { %8287 = vrcp.f32 %v1951_v43  ;;  %2012 = vst.msk [vmem:[%s9046_s6 + $0x8] sm:$0x1f] %vm1834_vm11, %v1996_v13  ;;  %7745 = vmatmul.mubr.msk.f32.vlgmr.msra.gmra.mrb[24].mxu1 %vm2029_vm12, %v1996_v13 }
 0x872   : > { %v8280_v29 = vpop.eup %8279  ;;  %2013 = vst.msk [vmem:[%s9046_s6 + $0x10] sm:$0x1f] %vm1834_vm11, %v1997_v38  ;;  %7750 = vmatmul.mubr.msk.f32.vlgmr.msra.gmra.mrb[18].mxu0 %vm2029_vm12, %v1997_v38  ;;  %7753 = vmatpush3.msk.msra.mxu1 %vm424_vm5, %v8948_v32 }
 0x873   : > { %7758 = vmatpush3.msk.msra.mxu0 %vm424_vm5, %v8950_v42  ;;  %v1960_v11 = vpop.xlane.xlu1 %1959  ;;  %7754 = vmatprep.mubr.msk.f32.mxu1 %vm8468_vm9, %v8469_v57  ;;  %v1998_v45 = vmul.f32 %v8280_v29, %v8975_v22 }
 0x874   : > { %8289 = vrcp.f32 %v1960_v11  ;;  %v1957_v15 = vpop.xlane.xlu0 %1956  ;;  %7762 = vmatprep.subr.mxu1 %v8469_v57  ;;  %7759 = vmatprep.mubr.msk.f32.mxu0 %vm8468_vm9, %v8469_v57 }
 0x875   : > { %8291 = vrcp.f32 %v1957_v15  ;;  %2014 = vst.msk [vmem:[%s9046_s6 + $0x18] sm:$0x1f] %vm1834_vm11, %v1998_v45  ;;  %7755 = vmatmul.mubr.msk.f32.vlgmr.msra.gmra.mrb[26].mxu1 %vm2029_vm12, %v1998_v45  ;;  %7767 = vmatprep.subr.mxu0 %v8469_v57 }
 0x876   : > { %v8282_v32 = vpop.eup %8281  ;;  %7763 = vmatpush3.msk.msra.mxu1 %vm424_vm5, %v8952_v2  ;;  %7764 = vmatprep.mubr.msk.f32.mxu1 %vm8468_vm9, %v8469_v57 }
 0x877   : > { %v8284_v42 = vpop.eup %8283  ;;  %v1966_v22 = vpop.xlane.xlu1 %1965  ;;  %7772 = vmatprep.subr.mxu1 %v8469_v57  ;;  %v2000_v18 = vmul.f32 %v8282_v32, %v8981_v63 }
 0x878   : > { %8293 = vrcp.f32 %v1966_v22  ;;  %v1963_v44 = vpop.xlane.xlu0 %1962  ;;  %v1999_v20 = vmul.f32 %v8284_v42, %v8983_v41 }
 0x879   : > { %8295 = vrcp.f32 %v1963_v44  ;;  %2016 = vst.msk [vmem:[%s9046_s6 + $0x28] sm:$0x1f] %vm1834_vm11, %v2000_v18  ;;  %7765 = vmatmul.mubr.msk.f32.vlgmr.msra.gmra.mrb[28].mxu1 %vm2029_vm12, %v2000_v18 }
 0x87a   : > { %v8286_v49 = vpop.eup %8285  ;;  %2015 = vst.msk [vmem:[%s9046_s6 + $0x20] sm:$0x1f] %vm1834_vm11, %v1999_v20  ;;  %7760 = vmatmul.mubr.msk.f32.vlgmr.msra.gmra.mrb[20].mxu0 %vm2029_vm12, %v1999_v20  ;;  %7773 = vmatpush3.msk.msra.mxu1 %vm424_vm5, %v8954_v7 }
 0x87b   : > { %v8288_v2 = vpop.eup %8287  ;;  %7768 = vmatpush3.msk.msra.mxu0 %vm424_vm5, %v8931_v61  ;;  %v1972_v63 = vpop.xlane.xlu1 %1971  ;;  %7769 = vmatprep.mubr.msk.f32.mxu0 %vm8468_vm9, %v8469_v57  ;;  %v2002_v41 = vmul.f32 %v8286_v49, %v8991_v14 }
 0x87c   : > { %8297 = vrcp.f32 %v1972_v63  ;;  %v1969_v39 = vpop.xlane.xlu0 %1968  ;;  %7774 = vmatprep.mubr.msk.f32.mxu1 %vm8468_vm9, %v8469_v57  ;;  %7777 = vmatprep.subr.mxu0 %v8469_v57  ;;  %v2001_v7 = vmul.f32 %v8288_v2, %v8993_v19 }
 0x87d   : > { %8299 = vrcp.f32 %v1969_v39  ;;  %7782 = vmatprep.subr.mxu1 %v8469_v57  ;;  %2018 = vst.msk [vmem:[%s9046_s6 + $0x38] sm:$0x1f] %vm1834_vm11, %v2002_v41  ;;  %7775 = vmatmul.mubr.msk.f32.vlgmr.msra.gmra.mrb[30].mxu1 %vm2029_vm12, %v2002_v41 }
 0x87e   : > { %v8290_v61 = vpop.eup %8289  ;;  %2017 = vst.msk [vmem:[%s9046_s6 + $0x30] sm:$0x1f] %vm1834_vm11, %v2001_v7  ;;  %7770 = vmatmul.mubr.msk.f32.vlgmr.msra.gmra.mrb[22].mxu0 %vm2029_vm12, %v2001_v7  ;;  %7783 = vmatpush3.msk.msra.mxu1 %vm424_vm5, %v8956_v8 }
 0x87f   : > { %v8292_v14 = vpop.eup %8291  ;;  %7778 = vmatpush3.msk.msra.mxu0 %vm424_vm5, %v8937_v62  ;;  %7779 = vmatprep.mubr.msk.f32.mxu0 %vm8468_vm9, %v8469_v57  ;;  %v2004_v24 = vmul.f32 %v8290_v61, %v9000_v21 }
 0x880   : > { %v1975_v19 = vpop.xlane.xlu1 %1974  ;;  %7784 = vmatprep.mubr.msk.f32.mxu1 %vm8468_vm9, %v8469_v57  ;;  %7787 = vmatprep.subr.mxu0 %v8469_v57  ;;  %v2003_v26 = vmul.f32 %v8292_v14, %v9002_v25 }
 0x881   : > { %8301 = vrcp.f32 %v1975_v19  ;;  %7792 = vmatprep.subr.mxu1 %v8469_v57  ;;  %2020 = vst.msk [vmem:[%s9046_s6 + $0x48] sm:$0x1f] %vm1834_vm11, %v2004_v24  ;;  %7785 = vmatmul.mubr.msk.f32.vlgmr.msra.gmra.mrb[32].mxu1 %vm2029_vm12, %v2004_v24 }
 0x882   : > { %v8294_v62 = vpop.eup %8293  ;;  %2019 = vst.msk [vmem:[%s9046_s6 + $0x40] sm:$0x1f] %vm1834_vm11, %v2003_v26  ;;  %7780 = vmatmul.mubr.msk.f32.vlgmr.msra.gmra.mrb[24].mxu0 %vm2029_vm12, %v2003_v26  ;;  %7793 = vmatpush3.msk.msra.mxu1 %vm424_vm5, %v9030_v12 }
 0x883   : > { %v8296_v8 = vpop.eup %8295  ;;  %7788 = vmatpush3.msk.msra.mxu0 %vm424_vm5, %v9032_v48  ;;  %7789 = vmatprep.mubr.msk.f32.mxu0 %vm8468_vm9, %v8469_v57  ;;  %v2006_v21 = vmul.f32 %v8294_v62, %v9008_v50 }
 0x884   : > { %7794 = vmatprep.mubr.msk.f32.mxu1 %vm8468_vm9, %v8469_v57  ;;  %7797 = vmatprep.subr.mxu0 %v8469_v57  ;;  %v2005_v25 = vmul.f32 %v8296_v8, %v9010_v33  ;;  %v3184_v35 = vpop.permute.xlu1 %3183 }
 0x885   : > { %7802 = vmatprep.subr.mxu1 %v8469_v57  ;;  %2022 = vst.msk [vmem:[%s9046_s6 + $0x58] sm:$0x1f] %vm1834_vm11, %v2006_v21  ;;  %7795 = vmatmul.mubr.msk.f32.vlgmr.msra.gmra.mrb[34].mxu1 %vm2029_vm12, %v2006_v21 }
 0x886   : > { %v8298_v27 = vpop.eup %8297  ;;  %2021 = vst.msk [vmem:[%s9046_s6 + $0x50] sm:$0x1f] %vm1834_vm11, %v2005_v25  ;;  %7790 = vmatmul.mubr.msk.f32.vlgmr.msra.gmra.mrb[26].mxu0 %vm2029_vm12, %v2005_v25  ;;  %7803 = vmatpush3.msk.msra.mxu1 %vm424_vm5, %v9059_v28  ;;  %v3337_v28 = vld [vmem:[%s10075_s2 + $0x98] sm:$0xff] }
 0x887   : > { %v8300_v50 = vpop.eup %8299  ;;  %7798 = vmatpush3.msk.msra.mxu0 %vm424_vm5, %v9035_v53  ;;  %7799 = vmatprep.mubr.msk.f32.mxu0 %vm8468_vm9, %v8469_v57  ;;  %v2008_v33 = vmul.f32 %v8298_v27, %v9016_v6  ;;  %v8133_v3 = vpack.c.bf16 %v3337_v28, %v3336_v56  ;;  %v7303_v56 = vld [vmem:[%s10074_s1 + $0x10] ss:$0 sm:$0xff] }
 0x888   : > { %7804 = vmatprep.mubr.msk.f32.mxu1 %vm8468_vm9, %v8469_v57  ;;  %7812 = vmatprep.subr.mxu1 %v8469_v57  ;;  %v2007_v5 = vmul.f32 %v8300_v50, %v9018_v36 }
 0x889   : > { %2024 = vst.msk [vmem:[%s9046_s6 + $0x68] sm:$0x1f] %vm1834_vm11, %v2008_v33  ;;  %7805 = vmatmul.mubr.msk.f32.vlgmr.msra.gmra.mrb[36].mxu1 %vm2029_vm12, %v2008_v33  ;;  %7807 = vmatprep.subr.mxu0 %v8469_v57 }
 0x88a   : > { %2023 = vst.msk [vmem:[%s9046_s6 + $0x60] sm:$0x1f] %vm1834_vm11, %v2007_v5  ;;  %7800 = vmatmul.mubr.msk.f32.vlgmr.msra.gmra.mrb[28].mxu0 %vm2029_vm12, %v2007_v5  ;;  %7813 = vmatpush3.msk.msra.mxu1 %vm424_vm5, %v3184_v35 }
 0x88b   : > { %v8302_v37 = vpop.eup %8301  ;;  %7809 = vmatprep.mubr.msk.f32.mxu0 %vm8468_vm9, %v8469_v57  ;;  %7814 = vmatprep.mubr.msk.f32.mxu1 %vm8468_vm9, %v8469_v57 }
 0x88c   : > { %v2009_v6 = vmul.f32 %v8302_v37, %v9024_v47  ;;  %8135 = vmatprep.subr.bf16.mxu1 %v8467_v54 }
 0x88e   : > { %2025 = vst.msk [vmem:[%s9046_s6 + $0x70] sm:$0x1f] %vm1834_vm11, %v2009_v6 }
 0x8b0   : > { %v1978_v36 = vpop.xlane.xlu0 %1977 }
 0x8b1   : > { %8303 = vrcp.f32 %v1978_v36 }
 0x8b4   : > { %v3107_v40 = vpop.permute.xlu0 %3106 }
 0x8b5   : > { %7808 = vmatpush3.msk.msra.mxu0 %vm424_vm5, %v3107_v40 }
 0x8b6   : > { %7810 = vmatmul.mubr.msk.f32.vlgmr.msra.gmra.mrb[30].mxu0 %vm2029_vm12, %v2009_v6  ;;  %8129 = vmatprep.subr.bf16.mxu0 %v8467_v54 }
 0x8b7   : > { %7825 = vmatprep.mubr.msk.f32.mxu0 %vm8468_vm9, %v8469_v57 }
 0x8bb   : > { %v8304_v47 = vpop.eup %8303 }
 0x8bc   : > { %v2010_v16 = vmul.f32 %v8304_v47, %v9039_v58  ;;  %v8130_v58 = vpack.c.bf16 %v3335_v52, %v3334_v17 }
 0x8be   : > { %2026 = vst.msk [vmem:[%s9046_s6 + $0x78] sm:$0x1f] %vm1834_vm11, %v2010_v16  ;;  %7815 = vmatmul.mubr.msk.f32.vlgmr.msra.gmra.mrb[38].mxu1 %vm2029_vm12, %v2010_v16  ;;  %8131 = vmatpush3.bf16.msra.mxu0 %v8130_v58 }
 0x8bf   : > { %7842 = vmatprep.mubr.msk.f32.mxu1 %vm8468_vm9, %v8469_v57  ;;  %8132 = vmatprep.subr.bf16.mxu0 %v8467_v54 }
 0x8c2   : > { %8134 = vmatpush3.bf16.msra.mxu0 %v8133_v3 }
 0x8c3   : > { %8141 = vmatprep.subr.bf16.mxu0 %v8467_v54 }
 0x8fb   : > { %v9188_v12 = vpop.f32.mrb[16].mxu0 }
 0x8fc   : > { %v7741_v48 = vpop.f32.mrb[17].mxu0 }
 0x944   : > { %v2178_v51 = vpop.f32.mrb[24].mxu1 }
 0x945   : > { %v2255_v53 = vpop.f32.mrb[18].mxu0  ;;  %v7746_v55 = vpop.f32.mrb[25].mxu1  ;;  %3261 = vrot.lane.b32.xlu0 %v2178_v51, %s8475_s11 }
 0x946   : > { %v7751_v46 = vpop.f32.mrb[19].mxu0 }
 0x948   : > { %v2332_v59 = vpop.f32.mrb[26].mxu1 }
 0x949   : > { %v7756_v23 = vpop.f32.mrb[27].mxu1  ;;  %3269 = vrot.lane.b32.xlu1 %v2332_v59, %s8476_s30  ;;  %3265 = vrot.lane.b32.xlu0 %v2255_v53, %s8477_s5 }
 0x94c   : > { %v2486_v0 = vpop.f32.mrb[28].mxu1 }
 0x94d   : > { %v2409_v1 = vpop.f32.mrb[20].mxu0  ;;  %v7766_v60 = vpop.f32.mrb[29].mxu1  ;;  %3278 = vrot.lane.b32.xlu0 %v2486_v0, %s8475_s11 }
 0x94e   : > { %v7761_v4 = vpop.f32.mrb[21].mxu0 }
 0x950   : > { %v2640_v9 = vpop.f32.mrb[30].mxu1 }
 0x951   : > { %v2563_v10 = vpop.f32.mrb[22].mxu0  ;;  %v7776_v13 = vpop.f32.mrb[31].mxu1 }
 0x952   : > { %3282 = vrot.lane.b32.xlu1 %v2563_v10, %s8477_s5  ;;  %v7771_v43 = vpop.f32.mrb[23].mxu0 }
 0x954   : > { %v2794_v38 = vpop.f32.mrb[32].mxu1 }
 0x955   : > { %v2717_v29 = vpop.f32.mrb[24].mxu0  ;;  %v7786_v11 = vpop.f32.mrb[33].mxu1  ;;  %3293 = vrot.lane.b32.xlu0 %v2794_v38, %s8475_s11 }
 0x956   : > { %3286 = vrot.lane.b32.xlu1 %v2640_v9, %s8476_s30  ;;  %v7781_v45 = vpop.f32.mrb[25].mxu0 }
 0x958   : > { %v2948_v15 = vpop.f32.mrb[34].mxu1 }
 0x959   : > { %v2871_v32 = vpop.f32.mrb[26].mxu0  ;;  %v7796_v42 = vpop.f32.mrb[35].mxu1 }
 0x95a   : > { %3297 = vrot.lane.b32.xlu1 %v2871_v32, %s8477_s5  ;;  %v7791_v22 = vpop.f32.mrb[27].mxu0  ;;  %v3493_v42 = vld [vmem:[%s10075_s2 + $0xa8] sm:$0xff] }
 0x95c   : > { %v3102_v18 = vpop.f32.mrb[36].mxu1 }
 0x95d   : > { %v3025_v44 = vpop.f32.mrb[28].mxu0  ;;  %v7806_v20 = vpop.f32.mrb[37].mxu1  ;;  %3308 = vrot.lane.b32.xlu0 %v3102_v18, %s8475_s11  ;;  %v3494_v18 = vld [vmem:[%s10075_s2 + $0xb0] sm:$0xff] }
 0x95e   : > { %3301 = vrot.lane.b32.xlu1 %v2948_v15, %s8476_s30  ;;  %v7801_v49 = vpop.f32.mrb[29].mxu0 }
 0x989   : > { %v3179_v2 = vpop.f32.mrb[30].mxu0 }
 0x98a   : > { %3312 = vrot.lane.b32.xlu0 %v3179_v2, %s8477_s5  ;;  %v7811_v63 = vpop.f32.mrb[31].mxu0 }
 0x991   : > { %v3256_v41 = vpop.f32.mrb[38].mxu1 }
 0x992   : > { %3316 = vrot.lane.b32.xlu1 %v3256_v41, %s8476_s30  ;;  %v7816_v39 = vpop.f32.mrb[39].mxu1 }
 0x9b7   : > { %v3262_v7 = vpop.permute.xlu0 %3261 }
 0x9b8   : > { %v3272_v26 = vsel %vm619_vm10, %v9188_v12, %v3262_v7 }
 0x9bb   : > { %v3266_v61 = vpop.permute.xlu0 %3265  ;;  %v3270_v14 = vpop.permute.xlu1 %3269 }
 0x9bc   : > { %v3274_v8 = vsel %vm3273_vm13, %v3272_v26, %v3266_v61 }
 0x9bd   : > { %v3276_v33 = vsel %vm3275_vm14, %v3274_v8, %v3270_v14 }
 0x9bf   : > { %v3279_v19 = vpop.permute.xlu0 %3278 }
 0x9c0   : > { %v3289_v62 = vsel %vm619_vm10, %v2409_v1, %v3279_v19 }
 0x9c4   : > { %v3283_v24 = vpop.permute.xlu1 %3282 }
 0x9c5   : > { %v3290_v21 = vsel %vm3273_vm13, %v3289_v62, %v3283_v24 }
 0x9c7   : > { %v3294_v5 = vpop.permute.xlu0 %3293 }
 0x9c8   : > { %v3287_v25 = vpop.permute.xlu1 %3286  ;;  %v3304_v6 = vsel %vm619_vm10, %v2717_v29, %v3294_v5 }
 0x9c9   : > { %v3291_v27 = vsel %vm3275_vm14, %v3290_v21, %v3287_v25  ;;  %v7304_v25 = vld [vmem:[%s10074_s1 + $0x11] ss:$0 sm:$0xff] }
 0x9ca   : > { %v3323_v50 = vrot.slane %v3291_v27, 3 }
 0x9cc   : > { %v3298_v35 = vpop.permute.xlu1 %3297  ;;  %v3331_v37 = vsel %vm424_vm5, %v3276_v33, %v3323_v50 }
 0x9cd   : > { %7826 = vmatmul.mubr.msk.f32.vlgmr.msra.gmra.mrb[32].mxu0 %vm351_vm1, %v3331_v37  ;;  %v3305_v36 = vsel %vm3273_vm13, %v3304_v6, %v3298_v35 }
 0x9ce   : > { %7828 = vmatprep.mubr.msk.f32.mxu0 %vm8468_vm9, %v8469_v57 }
 0x9cf   : > { %v3309_v48 = vpop.permute.xlu0 %3308 }
 0x9d0   : > { %v3302_v40 = vpop.permute.xlu1 %3301  ;;  %v3319_v17 = vsel %vm619_vm10, %v3025_v44, %v3309_v48  ;;  %v3495_v44 = vld [vmem:[%s10075_s2 + $0xb8] sm:$0xff] }
 0x9d1   : > { %v3306_v47 = vsel %vm3275_vm14, %v3305_v36, %v3302_v40  ;;  %v8139_v20 = vpack.c.bf16 %v3495_v44, %v3494_v18 }
 0x9d2   : > { %v3326_v16 = vrot.slane %v3306_v47, 6 }
 0x9d4   : > { %v3332_v12 = vsel %vm428_vm2, %v3323_v50, %v3326_v16  ;;  %v7305_v50 = vld [vmem:[%s10074_s1 + $0x12] ss:$0 sm:$0xff] }
 0x9fc   : > { %v3313_v51 = vpop.permute.xlu0 %3312 }
 0x9fd   : > { %v3320_v52 = vsel %vm3273_vm13, %v3319_v17, %v3313_v51 }
 0xa04   : > { %v3317_v53 = vpop.permute.xlu1 %3316 }
 0xa05   : > { %v3321_v55 = vsel %vm3275_vm14, %v3320_v52, %v3317_v53 }
 0xa06   : > { %v3329_v58 = vrot.slane %v3321_v55, 1 }
 0xa08   : > { %v3333_v46 = vsel %vm432_vm6, %v3332_v12, %v3329_v58 }
 0xa09   : > { %7829 = vmatmul.mubr.msk.f32.gmra.mrb[34].mxu0 %vm351_vm1, %v3333_v46  ;;  %v3606_v46 = vld [vmem:[%s10075_s2 + $0xc8] sm:$0xff] }
 0xa0a   : > { %7831 = vmatprep.mubr.msk.f32.mxu0 %vm8468_vm9, %v8469_v57 }
 0xa0d   : > { %7832 = vmatmul.mubr.msk.f32.gmra.mrb[36].mxu0 %vm351_vm1, %v3329_v58  ;;  %v3605_v58 = vld [vmem:[%s10075_s2 + $0xc0] sm:$0xff] }
 0xa0e   : > { %7859 = vmatprep.mubr.msk.f32.mxu0 %vm8468_vm9, %v8469_v57 }
 0xaa0   : > { %v3412_v59 = vpop.f32.mrb[32].mxu0 }
 0xaa1   : > { %v3426_v28 = vadd.f32 %v3412_v59, %v8618_v31  ;;  %v7827_v23 = vpop.f32.mrb[33].mxu0  ;;  %v8142_v59 = vpack.c.bf16 %v3606_v46, %v3605_v58 }
 0xaa3   : > { %v9245_v3 = vadd.f32 %v7303_v56, %v3426_v28  ;;  %8143 = vmatpush3.bf16.msra.mxu0 %v8142_v59  ;;  %v3608_v28 = vld [vmem:[%s10075_s2 + $0xd8] sm:$0xff] }
 0xaa4   : > { %8144 = vmatprep.subr.bf16.mxu0 %v8467_v54 }
 0xaa5   : > { %v3439_v0 = vsel %vm351_vm1, %v9245_v3, 0.0 }
 0xaa6   : > { %3440 = vadd.xlane.f32.xlu0 %v3439_v0  ;;  %v7306_v0 = vld [vmem:[%s10074_s1 + $0x13] ss:$0 sm:$0xff] }
 0xadc   : > { %v3417_v1 = vpop.f32.mrb[34].mxu0 }
 0xadd   : > { %v3427_v60 = vadd.f32 %v3417_v1, %v8616_v30  ;;  %v7830_v4 = vpop.f32.mrb[35].mxu0 }
 0xadf   : > { %v9250_v9 = vadd.f32 %v7303_v56, %v3427_v60 }
 0xae0   : > { %v3422_v10 = vpop.f32.mrb[36].mxu0 }
 0xae1   : > { %v3428_v13 = vadd.f32 %v3422_v10, %v8624_v34  ;;  %v7833_v43 = vpop.f32.mrb[37].mxu0  ;;  %v3442_v31 = vsel %vm351_vm1, %v9250_v9, 0.0  ;;  %v3492_v34 = vld [vmem:[%s10075_s2 + $0xa0] sm:$0xff] }
 0xae2   : > { %3443 = vadd.xlane.f32.xlu1 %v3442_v31  ;;  %v8136_v22 = vpack.c.bf16 %v3493_v42, %v3492_v34 }
 0xae3   : > { %v9255_v38 = vadd.f32 %v7303_v56, %v3428_v13  ;;  %v3607_v56 = vld [vmem:[%s10075_s2 + $0xd0] sm:$0xff] }
 0xae4   : > { %8137 = vmatpush3.bf16.msra.mxu1 %v8136_v22  ;;  %v8145_v23 = vpack.c.bf16 %v3608_v28, %v3607_v56 }
 0xae5   : > { %v3445_v29 = vsel %vm442_vm8, %v9255_v38, 0.0  ;;  %8138 = vmatprep.subr.bf16.mxu1 %v8467_v54 }
 0xae6   : > { %3446 = vadd.xlane.f32.xlu0 %v3445_v29  ;;  %8146 = vmatpush3.bf16.msra.mxu0 %v8145_v23 }
 0xae7   : > { %7885 = vmatprep.subr.mxu0 %v8469_v57 }
 0xae8   : > { %8140 = vmatpush3.bf16.msra.mxu1 %v8139_v20 }
 0xae9   : > { %8147 = vmatprep.subr.bf16.mxu1 %v8467_v54 }
 0xb33   : > { %v3441_v11 = vpop.xlane.xlu0 %3440 }
 0xb34   : > { %v3448_v45 = vmul.f32 0.03125, %v3441_v11 }
 0xb36   : > { %v3451_v30 = vsub.f32 %v9245_v3, %v3448_v45 }
 0xb38   : > { %v3454_v15 = vmul.f32 %v3451_v30, %v3451_v30 }
 0xb3a   : > { %v3457_v32 = vsel %vm351_vm1, %v3454_v15, 0.0 }
 0xb3b   : > { %3458 = vadd.xlane.f32.xlu0 %v3457_v32 }
 0xb6f   : > { %v3444_v49 = vpop.xlane.xlu1 %3443 }
 0xb70   : > { %v3449_v2 = vmul.f32 0.03125, %v3444_v49 }
 0xb72   : > { %v3452_v63 = vsub.f32 %v9250_v9, %v3449_v2 }
 0xb73   : > { %v3447_v41 = vpop.xlane.xlu0 %3446 }
 0xb74   : > { %v3450_v39 = vmul.f32 0.03125, %v3447_v41  ;;  %v3455_v7 = vmul.f32 %v3452_v63, %v3452_v63 }
 0xb76   : > { %v3453_v61 = vsub.f32 %v9255_v38, %v3450_v39  ;;  %v3460_v14 = vsel %vm351_vm1, %v3455_v7, 0.0 }
 0xb77   : > { %3461 = vadd.xlane.f32.xlu0 %v3460_v14 }
 0xb78   : > { %v3456_v19 = vmul.f32 %v3453_v61, %v3453_v61 }
 0xb7a   : > { %v3463_v24 = vsel %vm442_vm8, %v3456_v19, 0.0 }
 0xb7b   : > { %3464 = vadd.xlane.f32.xlu1 %v3463_v24 }
 0xbc8   : > { %v3459_v26 = vpop.xlane.xlu0 %3458 }
 0xbc9   : > { %v3466_v62 = vmul.f32 0.03125, %v3459_v26 }
 0xbcb   : > { %v3469_v8 = vadd.f32 1e-05, %v3466_v62 }
 0xbcd   : > { %8305 = vrsqrt.f32 %v3469_v8 }
 0xbd7   : > { %v8306_v21 = vpop.eup %8305 }
 0xbd8   : > { %v3475_v27 = vmul.f32 %v8306_v21, %v3451_v30 }
 0xbda   : > { %v3482_v33 = vmul.f32 %v7304_v25, %v3475_v27 }
 0xbdc   : > { %v3489_v5 = vadd.f32 %v7305_v50, %v3482_v33 }
 0xbde   : > { %7843 = vmatmul.mubr.msk.f32.vlgmr.msra.gmra.mrb[40].mxu1 %vm351_vm1, %v3489_v5 }
 0xbdf   : > { %7845 = vmatprep.mubr.msk.f32.mxu1 %vm8468_vm9, %v8469_v57 }
 0xc04   : > { %v3462_v35 = vpop.xlane.xlu0 %3461 }
 0xc05   : > { %v3467_v37 = vmul.f32 0.03125, %v3462_v35 }
 0xc07   : > { %v3470_v6 = vadd.f32 1e-05, %v3467_v37 }
 0xc08   : > { %v3465_v36 = vpop.xlane.xlu1 %3464 }
 0xc09   : > { %8307 = vrsqrt.f32 %v3470_v6  ;;  %v3468_v40 = vmul.f32 0.03125, %v3465_v36 }
 0xc0b   : > { %v3471_v47 = vadd.f32 1e-05, %v3468_v40 }
 0xc0d   : > { %8309 = vrsqrt.f32 %v3471_v47  ;;  %v3765_v47 = vld [vmem:[%s10075_s2 + $0xe8] sm:$0xff] }
 0xc13   : > { %v8308_v16 = vpop.eup %8307 }
 0xc14   : > { %v3476_v12 = vmul.f32 %v8308_v16, %v3452_v63 }
 0xc16   : > { %v3483_v48 = vmul.f32 %v7304_v25, %v3476_v12  ;;  %v3766_v12 = vld [vmem:[%s10075_s2 + $0xf0] sm:$0xff] }
 0xc17   : > { %v8310_v51 = vpop.eup %8309 }
 0xc18   : > { %v3490_v17 = vadd.f32 %v7305_v50, %v3483_v48  ;;  %v3477_v52 = vmul.f32 %v8310_v51, %v3453_v61  ;;  %v7313_v61 = vld [vmem:[%s10074_s1 + $0x14] ss:$0 sm:$0xff]  ;;  %v3767_v48 = vld [vmem:[%s10075_s2 + $0xf8] sm:$0xff] }
 0xc19   : > { %v8151_v51 = vpack.c.bf16 %v3767_v48, %v3766_v12 }
 0xc1a   : > { %7846 = vmatmul.mubr.msk.f32.gmra.mrb[42].mxu1 %vm351_vm1, %v3490_v17  ;;  %v3484_v53 = vmul.f32 %v7304_v25, %v3477_v52 }
 0xc1b   : > { %7848 = vmatprep.mubr.msk.f32.mxu1 %vm8468_vm9, %v8469_v57 }
 0xc1c   : > { %v3491_v55 = vadd.f32 %v7305_v50, %v3484_v53 }
 0xc1e   : > { %7849 = vmatmul.mubr.msk.f32.gmra.mrb[44].mxu1 %vm351_vm1, %v3491_v55 }
 0xc1f   : > { %7876 = vmatprep.mubr.msk.f32.mxu1 %vm8468_vm9, %v8469_v57 }
 0xcb1   : > { %v3576_v1 = vpop.f32.mrb[40].mxu1 }
 0xcb2   : > { %v3577_v60 = vadd.f32 %v7306_v0, %v3576_v1  ;;  %v7844_v4 = vpop.f32.mrb[41].mxu1 }
 0xcb4   : > { %v3593_v10 = vmul.f32 0.70710677, %v3577_v60  ;;  %v3590_v43 = vmul.f32 0.5, %v3577_v60 }
 0xcb6   : > { %8311 = verf.f32 %v3593_v10  ;;  %v7314_v10 = vld [vmem:[%s10074_s1 + $0x15] ss:$0 sm:$0xff] }
 0xcc0   : > { %v8312_v13 = vpop.eup %8311 }
 0xcc1   : > { %v3599_v31 = vadd.f32 1.0, %v8312_v13 }
 0xcc3   : > { %v3602_v29 = vmul.f32 %v3599_v31, %v3590_v43  ;;  %v7315_v43 = vld [vmem:[%s10074_s1 + $0x16] ss:$0 sm:$0xff] }
 0xcc5   : > { %7860 = vmatmul.mubr.msk.f32.vlgmr.msra.gmra.mrb[38].mxu0 %vm351_vm1, %v3602_v29 }
 0xcc6   : > { %7862 = vmatprep.mubr.msk.f32.mxu0 %vm8468_vm9, %v8469_v57 }
 0xced   : > { %v3581_v11 = vpop.f32.mrb[42].mxu1 }
 0xcee   : > { %v3582_v45 = vadd.f32 %v7306_v0, %v3581_v11  ;;  %v7847_v30 = vpop.f32.mrb[43].mxu1 }
 0xcf0   : > { %v3594_v15 = vmul.f32 0.70710677, %v3582_v45  ;;  %v3591_v44 = vmul.f32 0.5, %v3582_v45 }
 0xcf1   : > { %v3586_v32 = vpop.f32.mrb[44].mxu1 }
 0xcf2   : > { %8313 = verf.f32 %v3594_v15  ;;  %v3587_v34 = vadd.f32 %v7306_v0, %v3586_v32  ;;  %v7850_v42 = vpop.f32.mrb[45].mxu1 }
 0xcf4   : > { %v3595_v22 = vmul.f32 0.70710677, %v3587_v34  ;;  %v3592_v63 = vmul.f32 0.5, %v3587_v34 }
 0xcf6   : > { %8315 = verf.f32 %v3595_v22 }
 0xcfc   : > { %v8314_v18 = vpop.eup %8313 }
 0xcfd   : > { %v3600_v20 = vadd.f32 1.0, %v8314_v18 }
 0xcff   : > { %v3603_v49 = vmul.f32 %v3600_v20, %v3591_v44 }
 0xd00   : > { %v8316_v2 = vpop.eup %8315 }
 0xd01   : > { %v3601_v41 = vadd.f32 1.0, %v8316_v2  ;;  %7863 = vmatmul.mubr.msk.f32.gmra.mrb[40].mxu0 %vm351_vm1, %v3603_v49 }
 0xd02   : > { %7865 = vmatprep.mubr.msk.f32.mxu0 %vm8468_vm9, %v8469_v57 }
 0xd03   : > { %v3604_v39 = vmul.f32 %v3601_v41, %v3592_v63 }
 0xd05   : > { %7866 = vmatmul.mubr.msk.f32.gmra.mrb[42].mxu0 %vm351_vm1, %v3604_v39 }
 0xd06   : > { %7887 = vmatprep.mubr.msk.f32.mxu0 %vm8468_vm9, %v8469_v57 }
 0xd98   : > { %v3684_v7 = vpop.f32.mrb[38].mxu0 }
 0xd99   : > { %v3698_v14 = vadd.f32 %v3684_v7, %v9245_v3  ;;  %v7861_v19 = vpop.f32.mrb[39].mxu0 }
 0xd9b   : > { %v9324_v24 = vadd.f32 %v7313_v61, %v3698_v14 }
 0xd9d   : > { %v3711_v26 = vsel %vm351_vm1, %v9324_v24, 0.0 }
 0xd9e   : > { %3712 = vadd.xlane.f32.xlu0 %v3711_v26 }
 0xdd4   : > { %v3689_v62 = vpop.f32.mrb[40].mxu0 }
 0xdd5   : > { %v3699_v8 = vadd.f32 %v3689_v62, %v9250_v9  ;;  %v7864_v21 = vpop.f32.mrb[41].mxu0 }
 0xdd7   : > { %v9329_v25 = vadd.f32 %v7313_v61, %v3699_v8 }
 0xdd8   : > { %v3694_v27 = vpop.f32.mrb[42].mxu0 }
 0xdd9   : > { %v3700_v50 = vadd.f32 %v3694_v27, %v9255_v38  ;;  %v7867_v33 = vpop.f32.mrb[43].mxu0  ;;  %v3714_v3 = vsel %vm351_vm1, %v9329_v25, 0.0  ;;  %v3764_v38 = vld [vmem:[%s10075_s2 + $0xe0] sm:$0xff] }
 0xdda   : > { %3715 = vadd.xlane.f32.xlu1 %v3714_v3  ;;  %v8148_v16 = vpack.c.bf16 %v3765_v47, %v3764_v38 }
 0xddb   : > { %v9334_v5 = vadd.f32 %v7313_v61, %v3700_v50 }
 0xddc   : > { %8149 = vmatpush3.bf16.msra.mxu1 %v8148_v16 }
 0xddd   : > { %v3717_v35 = vsel %vm442_vm8, %v9334_v5, 0.0  ;;  %8150 = vmatprep.subr.bf16.mxu1 %v8467_v54 }
 0xdde   : > { %3718 = vadd.xlane.f32.xlu0 %v3717_v35 }
 0xde0   : > { %8152 = vmatpush3.bf16.msra.mxu1 %v8151_v51 }
 0xde1   : > { %7890 = vmatprep.subr.mxu1 %v8469_v57 }
 0xe2b   : > { %v3713_v37 = vpop.xlane.xlu0 %3712 }
 0xe2c   : > { %v3720_v6 = vmul.f32 0.03125, %v3713_v37 }
 0xe2e   : > { %v3723_v9 = vsub.f32 %v9324_v24, %v3720_v6 }
 0xe30   : > { %v3726_v36 = vmul.f32 %v3723_v9, %v3723_v9 }
 0xe32   : > { %v3729_v40 = vsel %vm351_vm1, %v3726_v36, 0.0 }
 0xe33   : > { %3730 = vadd.xlane.f32.xlu1 %v3729_v40 }
 0xe67   : > { %v3716_v17 = vpop.xlane.xlu1 %3715 }
 0xe68   : > { %v3721_v52 = vmul.f32 0.03125, %v3716_v17 }
 0xe6a   : > { %v3724_v53 = vsub.f32 %v9329_v25, %v3721_v52 }
 0xe6b   : > { %v3719_v55 = vpop.xlane.xlu0 %3718 }
 0xe6c   : > { %v3722_v58 = vmul.f32 0.03125, %v3719_v55  ;;  %v3727_v46 = vmul.f32 %v3724_v53, %v3724_v53 }
 0xe6e   : > { %v3725_v59 = vsub.f32 %v9334_v5, %v3722_v58  ;;  %v3732_v56 = vsel %vm351_vm1, %v3727_v46, 0.0 }
 0xe6f   : > { %3733 = vadd.xlane.f32.xlu0 %v3732_v56 }
 0xe70   : > { %v3728_v28 = vmul.f32 %v3725_v59, %v3725_v59 }
 0xe72   : > { %v3735_v23 = vsel %vm442_vm8, %v3728_v28, 0.0 }
 0xe73   : > { %3736 = vadd.xlane.f32.xlu1 %v3735_v23 }
 0xec0   : > { %v3731_v0 = vpop.xlane.xlu1 %3730 }
 0xec1   : > { %v3738_v1 = vmul.f32 0.03125, %v3731_v0 }
 0xec3   : > { %v3741_v60 = vadd.f32 1e-05, %v3738_v1 }
 0xec5   : > { %8317 = vrsqrt.f32 %v3741_v60 }
 0xecf   : > { %v8318_v4 = vpop.eup %8317 }
 0xed0   : > { %v3747_v13 = vmul.f32 %v8318_v4, %v3723_v9 }
 0xed2   : > { %v3754_v31 = vmul.f32 %v7314_v10, %v3747_v13 }
 0xed4   : > { %v3761_v29 = vadd.f32 %v7315_v43, %v3754_v31 }
 0xed6   : > { %7877 = vmatmul.mubr.msk.f32.vlgmr.msra.gmra.mrb[46].mxu1 %vm351_vm1, %v3761_v29 }
 0xed7   : > { %7879 = vmatprep.mubr.msk.f32.mxu1 %vm8468_vm9, %v8469_v57 }
 0xefc   : > { %v3734_v11 = vpop.xlane.xlu0 %3733 }
 0xefd   : > { %v3739_v45 = vmul.f32 0.03125, %v3734_v11 }
 0xeff   : > { %v3742_v30 = vadd.f32 1e-05, %v3739_v45 }
 0xf00   : > { %v3737_v15 = vpop.xlane.xlu1 %3736 }
 0xf01   : > { %8319 = vrsqrt.f32 %v3742_v30  ;;  %v3740_v32 = vmul.f32 0.03125, %v3737_v15 }
 0xf03   : > { %v3743_v34 = vadd.f32 1e-05, %v3740_v32 }
 0xf05   : > { %8321 = vrsqrt.f32 %v3743_v34 }
 0xf0b   : > { %v8320_v42 = vpop.eup %8319 }
 0xf0c   : > { %v3748_v22 = vmul.f32 %v8320_v42, %v3724_v53 }
 0xf0e   : > { %v3755_v18 = vmul.f32 %v7314_v10, %v3748_v22 }
 0xf0f   : > { %v8322_v44 = vpop.eup %8321 }
 0xf10   : > { %v3762_v20 = vadd.f32 %v7315_v43, %v3755_v18  ;;  %v3749_v49 = vmul.f32 %v8322_v44, %v3725_v59 }
 0xf12   : > { %7880 = vmatmul.mubr.msk.f32.gmra.mrb[48].mxu1 %vm351_vm1, %v3762_v20  ;;  %v3756_v2 = vmul.f32 %v7314_v10, %v3749_v49 }
 0xf13   : > { %7882 = vmatprep.mubr.msk.f32.mxu1 %vm8468_vm9, %v8469_v57 }
 0xf14   : > { %v3763_v63 = vadd.f32 %v7315_v43, %v3756_v2 }
 0xf16   : > { %7883 = vmatmul.mubr.msk.f32.gmra.mrb[50].mxu1 %vm351_vm1, %v3763_v63 }
 0xf17   : > { %7892 = vmatprep.mubr.msk.f32.mxu1 %vm8468_vm9, %v8469_v57 }
 0xfa9   : > { %v3843_v41 = vpop.f32.mrb[46].mxu1 }
 0xfaa   : > { %3858 = vrot.lane.b32.xlu0 %v3843_v41, %s8470_s14  ;;  %v7878_v39 = vpop.f32.mrb[47].mxu1  ;;  %3860 = vrot.lane.b32.xlu1 %v3843_v41, %s8471_s20  ;;  %v3865_v61 = vrot.slane %v3843_v41, 5 }
 0xfae   : > { %3862 = vrot.lane.b32.xlu1 %v3843_v41, %s8472_s22 }
 0xfe5   : > { %v3848_v7 = vpop.f32.mrb[48].mxu1 }
 0xfe6   : > { %v3866_v14 = vrot.slane %v3848_v7, 5  ;;  %v7881_v19 = vpop.f32.mrb[49].mxu1  ;;  %v3882_v8 = vrot.slane %v3848_v7, 7  ;;  %v9383_v50 = vrot.slane %v3848_v7, 2 }
 0xfe8   : > { %v9377_v26 = vsel %vm430_vm4, %v3865_v61, %v3866_v14 }
 0xfe9   : > { %3870 = vrot.lane.b32.xlu0 %v9377_v26, %s8471_s20  ;;  %3868 = vrot.lane.b32.xlu1 %v9377_v26, %s8470_s14  ;;  %v3853_v62 = vpop.f32.mrb[50].mxu1 }
 0xfea   : > { %v3883_v21 = vrot.slane %v3853_v62, 7  ;;  %v7884_v27 = vpop.f32.mrb[51].mxu1 }
 0xfec   : > { %v9386_v33 = vsel %vm422_vm3, %v3882_v8, %v3883_v21 }
 0xfed   : > { %3875 = vrot.lane.b32.xlu0 %v9383_v50, %s8470_s14  ;;  %3872 = vrot.lane.b32.xlu1 %v9377_v26, %s8472_s22 }
 0xff1   : > { %3879 = vrot.lane.b32.xlu0 %v9383_v50, %s8472_s22  ;;  %3877 = vrot.lane.b32.xlu1 %v9383_v50, %s8471_s20 }
 0xff5   : > { %3887 = vrot.lane.b32.xlu0 %v9386_v33, %s8471_s20  ;;  %3885 = vrot.lane.b32.xlu1 %v9386_v33, %s8470_s14  ;;  %s192_s14 = scalar_lea.vmem [#allocation2], %s7219_s9 }
 0xff6   : > { %s7128_s20 = sshll.u32 %s192_s14, 4  ;;  %s10033_s20 = int_to_ptr.vmem [resolvable:$true] %s7128_s20 }
 0xff7   : > { %s8403_s28 = scalar_lea.vmem %s10033_s20, 64  ;;  %p8410_p1 = scmp.lt.s32.totalorder %s10033_s20, %s8408_s29 }
 0xff8   : > { %p8404_p12 = scmp.ne.s32.totalorder %s10033_s20, %s8403_s28 }
 0xff9   : > { %3891 = vrot.lane.b32.xlu0 %v3843_v41, %s8473_s23  ;;  %3889 = vrot.lane.b32.xlu1 %v9386_v33, %s8472_s22 }
 0xffa   : > { %p8405_p13 = pnand %p8404_p12, %p8542_p5 }
 0xffc   : > { %p8406_p0 = pneg %p8405_p13 }
0x101c   : > { %v3861_v3 = vpop.permute.xlu1 %3860  ;;  %v3859_v35 = vpop.permute.xlu0 %3858 }
0x101d   : > { %4043 = vrot.lane.b32.xlu0 %v3861_v3, %s8473_s23  ;;  %3967 = vrot.lane.b32.xlu1 %v3859_v35, %s8473_s23 }
0x1020   : > { %v3863_v37 = vpop.permute.xlu1 %3862 }
0x1021   : > { %4195 = vrot.lane.b32.xlu0 %v9377_v26, %s8473_s23  ;;  %4119 = vrot.lane.b32.xlu1 %v3863_v37, %s8473_s23 }
0x105b   : > { %v3869_v6 = vpop.permute.xlu1 %3868  ;;  %v3871_v9 = vpop.permute.xlu0 %3870 }
0x105c   : > { %4271 = vrot.lane.b32.xlu1 %v3869_v6, %s8473_s23  ;;  %4347 = vrot.lane.b32.xlu0 %v3871_v9, %s8473_s23 }
0x105f   : > { %v9410_v36 = vpop.permute.xlu1 %3872  ;;  %v9412_v40 = vpop.permute.xlu0 %3875 }
0x1060   : > { %4423 = vrot.lane.b32.xlu1 %v9410_v36, %s8473_s23  ;;  %4499 = vrot.lane.b32.xlu0 %v9383_v50, %s8473_s23 }
0x1063   : > { %v9418_v38 = vpop.permute.xlu1 %3877  ;;  %v9420_v47 = vpop.permute.xlu0 %3879 }
0x1064   : > { %4651 = vrot.lane.b32.xlu0 %v9418_v38, %s8473_s23  ;;  %4575 = vrot.lane.b32.xlu1 %v9412_v40, %s8473_s23 }
0x1067   : > { %v9426_v16 = vpop.permute.xlu0 %3887  ;;  %v9432_v12 = vpop.permute.xlu1 %3885 }
0x1068   : > { %4803 = vrot.lane.b32.xlu0 %v9386_v33, %s8473_s23  ;;  %4727 = vrot.lane.b32.xlu1 %v9420_v47, %s8473_s23 }
0x106b   : > { %v3892_v48 = vpop.permute.xlu0 %3891  ;;  %v9440_v51 = vpop.permute.xlu1 %3889 }
0x106c   : > { %4879 = vrot.lane.b32.xlu1 %v9432_v12, %s8473_s23  ;;  %4955 = vrot.lane.b32.xlu0 %v9426_v16, %s8473_s23 }
0x106d   : > { %7886 = vmatpush3.xpose.msk.msra.mxu0 %vm619_vm10, %v3892_v48 }
0x106e   : > { %7895 = vmatprep.subr.mxu0 %v8469_v57 }
0x1070   : > { %7888 = vmatmul.mubr.msk.f32.vlgmr.msra.gmra.mrb[44].mxu0 %vm619_vm10, %v3843_v41  ;;  %5031 = vrot.lane.b32.xlu1 %v9440_v51, %s8473_s23 }
0x1071   : > { %5300 = vrot.lane.b32.xlu0 %v3843_v41, %s8474_s27  ;;  %7897 = vmatprep.mubr.msk.f32.mxu0 %vm8468_vm9, %v8469_v57 }
0x1074   : > { %5377 = vrot.lane.b32.xlu1 %v3859_v35, %s8474_s27 }
0x1075   : > { %5454 = vrot.lane.b32.xlu0 %v3861_v3, %s8474_s27 }
0x1078   : > { %5531 = vrot.lane.b32.xlu1 %v3863_v37, %s8474_s27 }
0x1079   : > { %5762 = vrot.lane.b32.xlu0 %v3871_v9, %s8474_s27 }
0x107c   : > { %5608 = vrot.lane.b32.xlu1 %v9377_v26, %s8474_s27 }
0x107d   : > { %5916 = vrot.lane.b32.xlu0 %v9383_v50, %s8474_s27 }
0x1080   : > { %5685 = vrot.lane.b32.xlu1 %v3869_v6, %s8474_s27 }
0x1084   : > { %5839 = vrot.lane.b32.xlu1 %v9410_v36, %s8474_s27 }
0x1088   : > { %5993 = vrot.lane.b32.xlu1 %v9412_v40, %s8474_s27 }
0x108f   : > { %v3968_v17 = vpop.permute.xlu1 %3967  ;;  %v4044_v52 = vpop.permute.xlu0 %4043 }
0x1090   : > { %7891 = vmatpush3.xpose.msk.msra.mxu1 %vm619_vm10, %v3968_v17  ;;  %7896 = vmatpush3.xpose.msk.msra.mxu0 %vm619_vm10, %v4044_v52 }
0x1091   : > { %7900 = vmatprep.subr.mxu1 %v8469_v57  ;;  %7905 = vmatprep.subr.mxu0 %v8469_v57 }
0x1093   : > { %7893 = vmatmul.mubr.msk.f32.vlgmr.msra.gmra.mrb[52].mxu1 %vm619_vm10, %v3859_v35  ;;  %v4120_v53 = vpop.permute.xlu1 %4119  ;;  %7898 = vmatmul.mubr.msk.f32.vlgmr.msra.gmra.mrb[46].mxu0 %vm619_vm10, %v3861_v3  ;;  %v4196_v55 = vpop.permute.xlu0 %4195 }
0x1094   : > { %7901 = vmatpush3.xpose.msk.msra.mxu1 %vm619_vm10, %v4120_v53  ;;  %7906 = vmatpush3.xpose.msk.msra.mxu0 %vm619_vm10, %v4196_v55 }
0x1095   : > { %7902 = vmatprep.mubr.msk.f32.mxu1 %vm8468_vm9, %v8469_v57  ;;  %7907 = vmatprep.mubr.msk.f32.mxu0 %vm8468_vm9, %v8469_v57 }
0x1096   : > { %7910 = vmatprep.subr.mxu1 %v8469_v57  ;;  %7915 = vmatprep.subr.mxu0 %v8469_v57 }
0x1097   : > { %7903 = vmatmul.mubr.msk.f32.vlgmr.msra.gmra.mrb[54].mxu1 %vm619_vm10, %v3863_v37  ;;  %7908 = vmatmul.mubr.msk.f32.vlgmr.msra.gmra.mrb[48].mxu0 %vm619_vm10, %v9377_v26 }
0x1098   : > { %7912 = vmatprep.mubr.msk.f32.mxu1 %vm8468_vm9, %v8469_v57  ;;  %7917 = vmatprep.mubr.msk.f32.mxu0 %vm8468_vm9, %v8469_v57 }
0x10ce   : > { %v4272_v58 = vpop.permute.xlu1 %4271  ;;  %v4348_v46 = vpop.permute.xlu0 %4347 }
0x10cf   : > { %7911 = vmatpush3.xpose.msk.msra.mxu1 %vm619_vm10, %v4272_v58  ;;  %7916 = vmatpush3.xpose.msk.msra.mxu0 %vm619_vm10, %v4348_v46 }
0x10d0   : > { %7920 = vmatprep.subr.mxu1 %v8469_v57  ;;  %7925 = vmatprep.subr.mxu0 %v8469_v57 }
0x10d2   : > { %7913 = vmatmul.mubr.msk.f32.vlgmr.msra.gmra.mrb[56].mxu1 %vm619_vm10, %v3869_v6  ;;  %v4424_v59 = vpop.permute.xlu1 %4423  ;;  %7918 = vmatmul.mubr.msk.f32.vlgmr.msra.gmra.mrb[50].mxu0 %vm619_vm10, %v3871_v9  ;;  %v4500_v56 = vpop.permute.xlu0 %4499 }
0x10d3   : > { %7921 = vmatpush3.xpose.msk.msra.mxu1 %vm619_vm10, %v4424_v59  ;;  %7926 = vmatpush3.xpose.msk.msra.mxu0 %vm619_vm10, %v4500_v56 }
0x10d4   : > { %7922 = vmatprep.mubr.msk.f32.mxu1 %vm8468_vm9, %v8469_v57  ;;  %7927 = vmatprep.mubr.msk.f32.mxu0 %vm8468_vm9, %v8469_v57 }
0x10d5   : > { %7930 = vmatprep.subr.mxu1 %v8469_v57  ;;  %7935 = vmatprep.subr.mxu0 %v8469_v57 }
0x10d6   : > { %7923 = vmatmul.mubr.msk.f32.vlgmr.msra.gmra.mrb[58].mxu1 %vm619_vm10, %v9410_v36  ;;  %v4576_v28 = vpop.permute.xlu1 %4575  ;;  %7928 = vmatmul.mubr.msk.f32.vlgmr.msra.gmra.mrb[52].mxu0 %vm619_vm10, %v9383_v50  ;;  %v4652_v23 = vpop.permute.xlu0 %4651 }
0x10d7   : > { %7931 = vmatpush3.xpose.msk.msra.mxu1 %vm619_vm10, %v4576_v28  ;;  %7936 = vmatpush3.xpose.msk.msra.mxu0 %vm619_vm10, %v4652_v23 }
0x10d8   : > { %7932 = vmatprep.mubr.msk.f32.mxu1 %vm8468_vm9, %v8469_v57  ;;  %7937 = vmatprep.mubr.msk.f32.mxu0 %vm8468_vm9, %v8469_v57 }
0x10d9   : > { %7940 = vmatprep.subr.mxu1 %v8469_v57  ;;  %7945 = vmatprep.subr.mxu0 %v8469_v57 }
0x10da   : > { %7933 = vmatmul.mubr.msk.f32.vlgmr.msra.gmra.mrb[60].mxu1 %vm619_vm10, %v9412_v40  ;;  %v4728_v0 = vpop.permute.xlu1 %4727  ;;  %7938 = vmatmul.mubr.msk.f32.vlgmr.msra.gmra.mrb[54].mxu0 %vm619_vm10, %v9418_v38  ;;  %v4804_v1 = vpop.permute.xlu0 %4803 }
0x10db   : > { %7941 = vmatpush3.xpose.msk.msra.mxu1 %vm619_vm10, %v4728_v0  ;;  %7946 = vmatpush3.xpose.msk.msra.mxu0 %vm619_vm10, %v4804_v1 }
0x10dc   : > { %7942 = vmatprep.mubr.msk.f32.mxu1 %vm8468_vm9, %v8469_v57  ;;  %7947 = vmatprep.mubr.msk.f32.mxu0 %vm8468_vm9, %v8469_v57 }
0x10dd   : > { %7950 = vmatprep.subr.mxu1 %v8469_v57  ;;  %7955 = vmatprep.subr.mxu0 %v8469_v57 }
0x10de   : > { %7943 = vmatmul.mubr.msk.f32.vlgmr.msra.gmra.mrb[62].mxu1 %vm619_vm10, %v9420_v47  ;;  %v4880_v60 = vpop.permute.xlu1 %4879  ;;  %7948 = vmatmul.mubr.msk.f32.vlgmr.msra.gmra.mrb[56].mxu0 %vm619_vm10, %v9386_v33  ;;  %v4956_v4 = vpop.permute.xlu0 %4955 }
0x10df   : > { %7951 = vmatpush3.xpose.msk.msra.mxu1 %vm619_vm10, %v4880_v60  ;;  %7956 = vmatpush3.xpose.msk.msra.mxu0 %vm619_vm10, %v4956_v4 }
0x10e0   : > { %7952 = vmatprep.mubr.msk.f32.mxu1 %vm8468_vm9, %v8469_v57  ;;  %7957 = vmatprep.mubr.msk.f32.mxu0 %vm8468_vm9, %v8469_v57 }
0x10e1   : > { %7960 = vmatprep.subr.mxu1 %v8469_v57  ;;  %7965 = vmatprep.subr.mxu0 %v8469_v57 }
0x10e2   : > { %7953 = vmatmul.mubr.msk.f32.vlgmr.msra.gmra.mrb[64].mxu1 %vm619_vm10, %v9432_v12  ;;  %v5032_v10 = vpop.permute.xlu1 %5031  ;;  %7958 = vmatmul.mubr.msk.f32.vlgmr.msra.gmra.mrb[58].mxu0 %vm619_vm10, %v9426_v16 }
0x10e3   : > { %v5301_v13 = vpop.permute.xlu0 %5300  ;;  %7961 = vmatpush3.xpose.msk.msra.mxu1 %vm619_vm10, %v5032_v10  ;;  %7962 = vmatprep.mubr.msk.f32.mxu1 %vm8468_vm9, %v8469_v57 }
0x10e4   : > { %7966 = vmatpush3.msk.msra.mxu0 %vm424_vm5, %v5301_v13  ;;  %7970 = vmatprep.subr.mxu1 %v8469_v57 }
0x10e5   : > { %7967 = vmatprep.mubr.msk.f32.mxu0 %vm8468_vm9, %v8469_v57  ;;  %7975 = vmatprep.subr.mxu0 %v8469_v57 }
0x10e6   : > { %7963 = vmatmul.mubr.msk.f32.vlgmr.msra.gmra.mrb[66].mxu1 %vm619_vm10, %v9440_v51  ;;  %v5378_v43 = vpop.permute.xlu1 %5377 }
0x10e7   : > { %7971 = vmatpush3.msk.msra.mxu1 %vm424_vm5, %v5378_v43  ;;  %7972 = vmatprep.mubr.msk.f32.mxu1 %vm8468_vm9, %v8469_v57  ;;  %v9612_v1 = vpop.permute.xlu0 %5454 }
0x10e8   : > { %7980 = vmatprep.subr.mxu1 %v8469_v57 }
0x10eb   : > { %v9616_v60 = vpop.permute.xlu0 %5762 }
0x10ef   : > { %v9622_v4 = vpop.permute.xlu0 %5916 }
0x1143   : > { %v9550_v31 = vpop.f32.mrb[44].mxu0 }
0x1144   : > { %v7889_v29 = vpop.f32.mrb[45].mxu0  ;;  %v5107_v11 = vsel %vm1834_vm11, %v9550_v31, -inf }
0x1145   : > { %5108 = vmax.xlane.f32.xlu0 %v5107_v11 }
0x1166   : > { %v9554_v45 = vpop.f32.mrb[52].mxu1  ;;  %v9556_v30 = vpop.f32.mrb[46].mxu0 }
0x1167   : > { %v7894_v15 = vpop.f32.mrb[53].mxu1  ;;  %v7899_v32 = vpop.f32.mrb[47].mxu0  ;;  %v5110_v34 = vsel %vm1834_vm11, %v9554_v45, -inf  ;;  %v5113_v42 = vsel %vm1834_vm11, %v9556_v30, -inf }
0x1168   : > { %5111 = vmax.xlane.f32.xlu1 %v5110_v34  ;;  %5114 = vmax.xlane.f32.xlu0 %v5113_v42 }
0x116a   : > { %v9562_v22 = vpop.f32.mrb[54].mxu1  ;;  %v9564_v18 = vpop.f32.mrb[48].mxu0 }
0x116b   : > { %v7904_v44 = vpop.f32.mrb[55].mxu1  ;;  %v7909_v20 = vpop.f32.mrb[49].mxu0  ;;  %v5116_v49 = vsel %vm1834_vm11, %v9562_v22, -inf  ;;  %v5119_v2 = vsel %vm1834_vm11, %v9564_v18, -inf }
0x116c   : > { %5117 = vmax.xlane.f32.xlu0 %v5116_v49 }
0x1170   : > { %5120 = vmax.xlane.f32.xlu0 %v5119_v2 }
0x11a5   : > { %v9570_v63 = vpop.f32.mrb[56].mxu1  ;;  %v9572_v41 = vpop.f32.mrb[50].mxu0 }
0x11a6   : > { %v7914_v39 = vpop.f32.mrb[57].mxu1  ;;  %v7919_v7 = vpop.f32.mrb[51].mxu0  ;;  %v5122_v61 = vsel %vm1834_vm11, %v9570_v63, -inf  ;;  %v5125_v14 = vsel %vm1834_vm11, %v9572_v41, -inf }
0x11a7   : > { %5123 = vmax.xlane.f32.xlu1 %v5122_v61  ;;  %5126 = vmax.xlane.f32.xlu0 %v5125_v14 }
0x11a9   : > { %v9578_v19 = vpop.f32.mrb[58].mxu1  ;;  %v9580_v26 = vpop.f32.mrb[52].mxu0 }
0x11aa   : > { %v7924_v62 = vpop.f32.mrb[59].mxu1  ;;  %v7929_v8 = vpop.f32.mrb[53].mxu0  ;;  %v5128_v21 = vsel %vm1834_vm11, %v9578_v19, -inf  ;;  %v5131_v27 = vsel %vm1834_vm11, %v9580_v26, -inf }
0x11ab   : > { %5129 = vmax.xlane.f32.xlu1 %v5128_v21  ;;  %5132 = vmax.xlane.f32.xlu0 %v5131_v27 }
0x11ad   : > { %v9586_v50 = vpop.f32.mrb[60].mxu1  ;;  %v9588_v3 = vpop.f32.mrb[54].mxu0 }
0x11ae   : > { %v7934_v35 = vpop.f32.mrb[61].mxu1  ;;  %v7939_v37 = vpop.f32.mrb[55].mxu0  ;;  %v5134_v6 = vsel %vm1834_vm11, %v9586_v50, -inf  ;;  %v5137_v9 = vsel %vm1834_vm11, %v9588_v3, -inf }
0x11af   : > { %5135 = vmax.xlane.f32.xlu1 %v5134_v6  ;;  %5138 = vmax.xlane.f32.xlu0 %v5137_v9 }
0x11b1   : > { %v9594_v36 = vpop.f32.mrb[62].mxu1  ;;  %v9596_v40 = vpop.f32.mrb[56].mxu0 }
0x11b2   : > { %v7944_v48 = vpop.f32.mrb[63].mxu1  ;;  %v7949_v17 = vpop.f32.mrb[57].mxu0  ;;  %v5140_v52 = vsel %vm1834_vm11, %v9594_v36, -inf  ;;  %v5143_v53 = vsel %vm1834_vm11, %v9596_v40, -inf }
0x11b3   : > { %5141 = vmax.xlane.f32.xlu1 %v5140_v52  ;;  %5144 = vmax.xlane.f32.xlu0 %v5143_v53 }
0x11b5   : > { %v9602_v55 = vpop.f32.mrb[64].mxu1  ;;  %v9604_v58 = vpop.f32.mrb[58].mxu0 }
0x11b6   : > { %v7954_v46 = vpop.f32.mrb[65].mxu1  ;;  %v7959_v59 = vpop.f32.mrb[59].mxu0  ;;  %v5146_v56 = vsel %vm1834_vm11, %v9602_v55, -inf  ;;  %v5149_v28 = vsel %vm1834_vm11, %v9604_v58, -inf }
0x11b7   : > { %5147 = vmax.xlane.f32.xlu1 %v5146_v56  ;;  %5150 = vmax.xlane.f32.xlu0 %v5149_v28 }
0x11b9   : > { %v9610_v23 = vpop.f32.mrb[66].mxu1 }
0x11ba   : > { %v7964_v0 = vpop.f32.mrb[67].mxu1  ;;  %v5152_v29 = vsel %vm1834_vm11, %v9610_v23, -inf }
0x11c8   : > { %6147 = vrot.lane.b32.xlu1 %v9420_v47, %s8474_s27  ;;  %v9629_v47 = vpop.permute.xlu1 %5531 }
0x11cd   : > { %6070 = vrot.lane.b32.xlu0 %v9418_v38, %s8474_s27 }
0x11d1   : > { %6224 = vrot.lane.b32.xlu0 %v9386_v33, %s8474_s27  ;;  %v9633_v33 = vpop.permute.xlu1 %5608 }
0x11d2   : > { %v5109_v10 = vpop.xlane.xlu0 %5108 }
0x11d3   : > { %v5155_v13 = vsub.f32 %v9550_v31, %v5109_v10 }
0x11d5   : > { %v5171_v43 = vmul.f32 1.442695, %v5155_v13  ;;  %v9636_v31 = vpop.permute.xlu1 %5685 }
0x11d7   : > { %8323 = vpow2.f32 %v5171_v43 }
0x11d9   : > { %v9640_v20 = vpop.permute.xlu1 %5839 }
0x11dd   : > { %v9643_v39 = vpop.permute.xlu1 %5993 }
0x11e1   : > { %v9627_v11 = vpop.eup %8323 }
0x11e2   : > { %v5203_v38 = vsel %vm1834_vm11, %v9627_v11, 0.0 }
0x11ec   : > { %5153 = vmax.xlane.f32.xlu1 %v5152_v29 }
0x11f0   : > { %5204 = vadd.xlane.f32.xlu0 %v5203_v38 }
0x11f5   : > { %v5115_v15 = vpop.xlane.xlu0 %5114  ;;  %v5112_v61 = vpop.xlane.xlu1 %5111 }
0x11f6   : > { %v5157_v32 = vsub.f32 %v9556_v30, %v5115_v15  ;;  %v5156_v14 = vsub.f32 %v9554_v45, %v5112_v61 }
0x11f8   : > { %v5175_v34 = vmul.f32 1.442695, %v5157_v32 }
0x11f9   : > { %v5118_v42 = vpop.xlane.xlu0 %5117 }
0x11fa   : > { %8325 = vpow2.f32 %v5175_v34  ;;  %v5158_v8 = vsub.f32 %v9562_v22, %v5118_v42 }
0x11fc   : > { %v5177_v21 = vmul.f32 1.442695, %v5158_v8 }
0x11fd   : > { %v5121_v44 = vpop.xlane.xlu0 %5120  ;;  %6301 = vrot.lane.b32.xlu1 %v9432_v12, %s8474_s27 }
0x11fe   : > { %v5159_v49 = vsub.f32 %v9564_v18, %v5121_v44  ;;  %v5173_v18 = vmul.f32 1.442695, %v5156_v14 }
0x1200   : > { %v5179_v2 = vmul.f32 1.442695, %v5159_v49 }
0x1202   : > { %8327 = vpow2.f32 %v5179_v2 }
0x1203   : > { %8329 = vpow2.f32 %v5173_v18 }
0x1204   : > { %v9645_v7 = vpop.eup %8325  ;;  %8331 = vpow2.f32 %v5177_v21 }
0x1205   : > { %v5209_v30 = vsel %vm1834_vm11, %v9645_v7, 0.0 }
0x1206   : > { %5210 = vadd.xlane.f32.xlu0 %v5209_v30 }
0x120c   : > { %v9650_v62 = vpop.eup %8327 }
0x120d   : > { %v5215_v12 = vsel %vm1834_vm11, %v9650_v62, 0.0  ;;  %v9655_v27 = vpop.eup %8329 }
0x120e   : > { %5216 = vadd.xlane.f32.xlu0 %v5215_v12  ;;  %v5206_v35 = vsel %vm1834_vm11, %v9655_v27, 0.0  ;;  %v9659_v37 = vpop.eup %8331 }
0x120f   : > { %v5212_v45 = vsel %vm1834_vm11, %v9659_v37, 0.0 }
0x1221   : > { %5207 = vadd.xlane.f32.xlu1 %v5206_v35 }
0x1225   : > { %5213 = vadd.xlane.f32.xlu1 %v5212_v45 }
0x1234   : > { %v5124_v6 = vpop.xlane.xlu1 %5123  ;;  %v5127_v9 = vpop.xlane.xlu0 %5126 }
0x1235   : > { %v5160_v48 = vsub.f32 %v9570_v63, %v5124_v6  ;;  %v5161_v22 = vsub.f32 %v9572_v41, %v5127_v9 }
0x1237   : > { %v5181_v17 = vmul.f32 1.442695, %v5160_v48  ;;  %v5183_v52 = vmul.f32 1.442695, %v5161_v22 }
0x1238   : > { %v5130_v53 = vpop.xlane.xlu1 %5129  ;;  %v5133_v46 = vpop.xlane.xlu0 %5132 }
0x1239   : > { %8333 = vpow2.f32 %v5181_v17  ;;  %v5162_v59 = vsub.f32 %v9578_v19, %v5130_v53  ;;  %v5163_v56 = vsub.f32 %v9580_v26, %v5133_v46 }
0x123a   : > { %8335 = vpow2.f32 %v5183_v52 }
0x123b   : > { %v5185_v28 = vmul.f32 1.442695, %v5162_v59  ;;  %v5187_v0 = vmul.f32 1.442695, %v5163_v56 }
0x123c   : > { %v5136_v10 = vpop.xlane.xlu1 %5135  ;;  %v5139_v13 = vpop.xlane.xlu0 %5138 }
0x123d   : > { %8337 = vpow2.f32 %v5185_v28  ;;  %v5164_v43 = vsub.f32 %v9586_v50, %v5136_v10  ;;  %v5165_v63 = vsub.f32 %v9588_v3, %v5139_v13 }
0x123e   : > { %8339 = vpow2.f32 %v5187_v0 }
0x123f   : > { %v5189_v41 = vmul.f32 1.442695, %v5164_v43  ;;  %v5191_v29 = vmul.f32 1.442695, %v5165_v63 }
0x1240   : > { %v5142_v38 = vpop.xlane.xlu1 %5141  ;;  %v5145_v15 = vpop.xlane.xlu0 %5144 }
0x1241   : > { %8341 = vpow2.f32 %v5189_v41  ;;  %v5166_v19 = vsub.f32 %v9594_v36, %v5142_v38  ;;  %v5167_v26 = vsub.f32 %v9596_v40, %v5145_v15 }
0x1242   : > { %8343 = vpow2.f32 %v5191_v29 }
0x1243   : > { %v9671_v32 = vpop.eup %8333  ;;  %v5193_v34 = vmul.f32 1.442695, %v5166_v19  ;;  %v5195_v42 = vmul.f32 1.442695, %v5167_v26 }
0x1244   : > { %v9673_v44 = vpop.eup %8335  ;;  %v5148_v50 = vpop.xlane.xlu1 %5147  ;;  %v5218_v3 = vsel %vm1834_vm11, %v9671_v32, 0.0 }
0x1245   : > { %v5151_v49 = vpop.xlane.xlu0 %5150  ;;  %8345 = vpow2.f32 %v5193_v34  ;;  %v5168_v2 = vsub.f32 %v9602_v55, %v5148_v50  ;;  %5219 = vadd.xlane.f32.xlu1 %v5218_v3  ;;  %v5221_v36 = vsel %vm1834_vm11, %v9673_v44, 0.0 }
0x1246   : > { %v5169_v30 = vsub.f32 %v9604_v58, %v5151_v49  ;;  %8347 = vpow2.f32 %v5195_v42  ;;  %5222 = vadd.xlane.f32.xlu0 %v5221_v36 }
0x1247   : > { %v9681_v40 = vpop.eup %8337  ;;  %v5197_v61 = vmul.f32 1.442695, %v5168_v2 }
0x1248   : > { %v5199_v14 = vmul.f32 1.442695, %v5169_v30  ;;  %v9683_v12 = vpop.eup %8339  ;;  %v5224_v18 = vsel %vm1834_vm11, %v9681_v40, 0.0  ;;  %v9717_v59 = vpop.permute.xlu1 %6147 }
0x1249   : > { %8349 = vpow2.f32 %v5197_v61  ;;  %5225 = vadd.xlane.f32.xlu1 %v5224_v18  ;;  %v5227_v55 = vsel %vm1834_vm11, %v9683_v12, 0.0  ;;  %v9715_v46 = vpop.permute.xlu0 %6070 }
0x124a   : > { %5228 = vadd.xlane.f32.xlu0 %v5227_v55  ;;  %8351 = vpow2.f32 %v5199_v14 }
0x124b   : > { %v9689_v58 = vpop.eup %8341 }
0x124c   : > { %v9691_v8 = vpop.eup %8343  ;;  %v5230_v21 = vsel %vm1834_vm11, %v9689_v58, 0.0 }
0x124d   : > { %5231 = vadd.xlane.f32.xlu1 %v5230_v21  ;;  %v5233_v35 = vsel %vm1834_vm11, %v9691_v8, 0.0  ;;  %v9719_v56 = vpop.permute.xlu0 %6224 }
0x124e   : > { %5234 = vadd.xlane.f32.xlu0 %v5233_v35 }
0x124f   : > { %v9697_v45 = vpop.eup %8345 }
0x1250   : > { %v9699_v6 = vpop.eup %8347  ;;  %v5236_v9 = vsel %vm1834_vm11, %v9697_v45, 0.0 }
0x1251   : > { %5237 = vadd.xlane.f32.xlu1 %v5236_v9  ;;  %v5239_v48 = vsel %vm1834_vm11, %v9699_v6, 0.0 }
0x1252   : > { %5240 = vadd.xlane.f32.xlu0 %v5239_v48 }
0x1253   : > { %v9705_v22 = vpop.eup %8349 }
0x1254   : > { %v5242_v17 = vsel %vm1834_vm11, %v9705_v22, 0.0  ;;  %v9709_v52 = vpop.eup %8351 }
0x1255   : > { %5243 = vadd.xlane.f32.xlu1 %v5242_v17  ;;  %v5245_v53 = vsel %vm1834_vm11, %v9709_v52, 0.0 }
0x1259   : > { %5246 = vadd.xlane.f32.xlu1 %v5245_v53 }
0x126a   : > { %6455 = vrot.lane.b32.xlu1 %v9440_v51, %s8474_s27 }
0x1279   : > { %v5154_v28 = vpop.xlane.xlu1 %5153 }
0x127a   : > { %v5170_v0 = vsub.f32 %v9610_v23, %v5154_v28 }
0x127c   : > { %v5201_v10 = vmul.f32 1.442695, %v5170_v0 }
0x127d   : > { %v5205_v13 = vpop.xlane.xlu0 %5204 }
0x127e   : > { %8353 = vpow2.f32 %v5201_v10 }
0x127f   : > { %8355 = vrcp.f32 %v5205_v13 }
0x1288   : > { %v9722_v43 = vpop.eup %8353 }
0x1289   : > { %v8356_v63 = vpop.eup %8355  ;;  %v5248_v51 = vsel %vm1834_vm11, %v9722_v43, 0.0 }
0x128a   : > { %v5267_v41 = vmul.f32 %v8356_v63, %v9627_v11  ;;  %5249 = vadd.xlane.f32.xlu0 %v5248_v51 }
0x128c   : > { %7351 = vst.msk [vmem:[%s9046_s6 + $0x80] sm:$0x1f] %vm1834_vm11, %v5267_v41  ;;  %7968 = vmatmul.mubr.msk.f32.vlgmr.msra.gmra.mrb[60].mxu0 %vm2029_vm12, %v5267_v41  ;;  %v6604_v41 = vld [vmem:[%s10075_s2 + $0x100] sm:$0xff] }
0x128d   : > { %7976 = vmatpush3.msk.msra.mxu0 %vm424_vm5, %v9612_v1  ;;  %7977 = vmatprep.mubr.msk.f32.mxu0 %vm8468_vm9, %v8469_v57 }
0x128e   : > { %7985 = vmatprep.subr.mxu0 %v8469_v57 }
0x1293   : > { %v5211_v23 = vpop.xlane.xlu0 %5210 }
0x1294   : > { %8357 = vrcp.f32 %v5211_v23  ;;  %v6605_v23 = vld [vmem:[%s10075_s2 + $0x108] sm:$0xff] }
0x129b   : > { %v5217_v29 = vpop.xlane.xlu0 %5216 }
0x129c   : > { %8359 = vrcp.f32 %v5217_v29  ;;  %v8154_v29 = vpack.c.bf16 %v6605_v23, %v6604_v41  ;;  %v7402_v41 = vld [vmem:[%s10074_s1 + $0x17] ss:$0 sm:$0xff] }
0x129e   : > { %v8358_v38 = vpop.eup %8357 }
0x129f   : > { %v5269_v11 = vmul.f32 %v8358_v38, %v9645_v7  ;;  %v6606_v38 = vld [vmem:[%s10075_s2 + $0x110] sm:$0xff] }
0x12a0   : > { %6378 = vrot.lane.b32.xlu0 %v9426_v16, %s8474_s27  ;;  %v9750_v16 = vpop.permute.xlu1 %6301  ;;  %s10031_s27 = scalar_lea.hbm %s10076_s3, %s7418_s13 }
0x12a1   : > { %7353 = vst.msk [vmem:[%s9046_s6 + $0x90] sm:$0x1f] %vm1834_vm11, %v5269_v11  ;;  %7978 = vmatmul.mubr.msk.f32.vlgmr.msra.gmra.mrb[62].mxu0 %vm2029_vm12, %v5269_v11  ;;  %v6607_v11 = vld [vmem:[%s10075_s2 + $0x118] sm:$0xff] }
0x12a2   : > { %7986 = vmatpush3.msk.msra.mxu0 %vm424_vm5, %v9633_v33  ;;  %7987 = vmatprep.mubr.msk.f32.mxu0 %vm8468_vm9, %v8469_v57 }
0x12a3   : > { %7995 = vmatprep.subr.mxu0 %v8469_v57 }
0x12a6   : > { %v8360_v1 = vpop.eup %8359 }
0x12a7   : > { %v5271_v15 = vmul.f32 %v8360_v1, %v9650_v62  ;;  %v8157_v1 = vpack.c.bf16 %v6607_v11, %v6606_v38 }
0x12a9   : > { %7355 = vst.msk [vmem:[%s9046_s6 + $0xa0] sm:$0x1f] %vm1834_vm11, %v5271_v15  ;;  %7988 = vmatmul.mubr.msk.f32.vlgmr.msra.gmra.mrb[64].mxu0 %vm2029_vm12, %v5271_v15 }
0x12aa   : > { %7996 = vmatpush3.msk.msra.mxu0 %vm424_vm5, %v9616_v60  ;;  %7997 = vmatprep.mubr.msk.f32.mxu0 %vm8468_vm9, %v8469_v57 }
0x12ab   : > { %8005 = vmatprep.subr.mxu0 %v8469_v57 }
0x12ae   : > { %v5208_v33 = vpop.xlane.xlu1 %5207 }
0x12af   : > { %8361 = vrcp.f32 %v5208_v33 }
0x12b2   : > { %v5214_v7 = vpop.xlane.xlu1 %5213 }
0x12b3   : > { %8363 = vrcp.f32 %v5214_v7 }
0x12b9   : > { %v8362_v62 = vpop.eup %8361 }
0x12ba   : > { %v5268_v19 = vmul.f32 %v8362_v62, %v9655_v27 }
0x12bc   : > { %7352 = vst.msk [vmem:[%s9046_s6 + $0x88] sm:$0x1f] %vm1834_vm11, %v5268_v19  ;;  %7973 = vmatmul.mubr.msk.f32.vlgmr.msra.gmra.mrb[68].mxu1 %vm2029_vm12, %v5268_v19 }
0x12bd   : > { %v8364_v26 = vpop.eup %8363  ;;  %7981 = vmatpush3.msk.msra.mxu1 %vm424_vm5, %v9629_v47  ;;  %7982 = vmatprep.mubr.msk.f32.mxu1 %vm8468_vm9, %v8469_v57 }
0x12be   : > { %v5270_v60 = vmul.f32 %v8364_v26, %v9659_v37  ;;  %7990 = vmatprep.subr.mxu1 %v8469_v57 }
0x12c0   : > { %7354 = vst.msk [vmem:[%s9046_s6 + $0x98] sm:$0x1f] %vm1834_vm11, %v5270_v60  ;;  %7983 = vmatmul.mubr.msk.f32.vlgmr.msra.gmra.mrb[70].mxu1 %vm2029_vm12, %v5270_v60 }
0x12c1   : > { %7991 = vmatpush3.msk.msra.mxu1 %vm424_vm5, %v9636_v31  ;;  %7992 = vmatprep.mubr.msk.f32.mxu1 %vm8468_vm9, %v8469_v57 }
0x12c2   : > { %8000 = vmatprep.subr.mxu1 %v8469_v57 }
0x12d2   : > { %v5220_v47 = vpop.xlane.xlu1 %5219 }
0x12d3   : > { %8365 = vrcp.f32 %v5220_v47  ;;  %v5223_v27 = vpop.xlane.xlu0 %5222 }
0x12d4   : > { %8367 = vrcp.f32 %v5223_v27 }
0x12d6   : > { %v5226_v37 = vpop.xlane.xlu1 %5225 }
0x12d7   : > { %8369 = vrcp.f32 %v5226_v37  ;;  %v5229_v34 = vpop.xlane.xlu0 %5228 }
0x12d8   : > { %8371 = vrcp.f32 %v5229_v34 }
0x12da   : > { %v5232_v42 = vpop.xlane.xlu1 %5231 }
0x12db   : > { %8373 = vrcp.f32 %v5232_v42  ;;  %v5235_v50 = vpop.xlane.xlu0 %5234 }
0x12dc   : > { %8375 = vrcp.f32 %v5235_v50 }
0x12dd   : > { %v8366_v31 = vpop.eup %8365 }
0x12de   : > { %v8368_v49 = vpop.eup %8367  ;;  %v5272_v3 = vmul.f32 %v8366_v31, %v9671_v32  ;;  %v5238_v2 = vpop.xlane.xlu1 %5237 }
0x12df   : > { %v5273_v30 = vmul.f32 %v8368_v49, %v9673_v44  ;;  %8377 = vrcp.f32 %v5238_v2  ;;  %v5241_v36 = vpop.xlane.xlu0 %5240 }
0x12e0   : > { %7356 = vst.msk [vmem:[%s9046_s6 + $0xa8] sm:$0x1f] %vm1834_vm11, %v5272_v3  ;;  %8379 = vrcp.f32 %v5241_v36  ;;  %7993 = vmatmul.mubr.msk.f32.vlgmr.msra.gmra.mrb[72].mxu1 %vm2029_vm12, %v5272_v3 }
0x12e1   : > { %v8370_v61 = vpop.eup %8369  ;;  %7357 = vst.msk [vmem:[%s9046_s6 + $0xb0] sm:$0x1f] %vm1834_vm11, %v5273_v30  ;;  %7998 = vmatmul.mubr.msk.f32.vlgmr.msra.gmra.mrb[66].mxu0 %vm2029_vm12, %v5273_v30  ;;  %8001 = vmatpush3.msk.msra.mxu1 %vm424_vm5, %v9640_v20 }
0x12e2   : > { %v8372_v32 = vpop.eup %8371  ;;  %v5274_v44 = vmul.f32 %v8370_v61, %v9681_v40  ;;  %8006 = vmatpush3.msk.msra.mxu0 %vm424_vm5, %v9622_v4  ;;  %v5244_v14 = vpop.xlane.xlu1 %5243  ;;  %8002 = vmatprep.mubr.msk.f32.mxu1 %vm8468_vm9, %v8469_v57 }
0x12e3   : > { %v5275_v18 = vmul.f32 %v8372_v32, %v9683_v12  ;;  %8381 = vrcp.f32 %v5244_v14  ;;  %8007 = vmatprep.mubr.msk.f32.mxu0 %vm8468_vm9, %v8469_v57  ;;  %8010 = vmatprep.subr.mxu1 %v8469_v57 }
0x12e4   : > { %7358 = vst.msk [vmem:[%s9046_s6 + $0xb8] sm:$0x1f] %vm1834_vm11, %v5274_v44  ;;  %8015 = vmatprep.subr.mxu0 %v8469_v57  ;;  %8003 = vmatmul.mubr.msk.f32.vlgmr.msra.gmra.mrb[74].mxu1 %vm2029_vm12, %v5274_v44 }
0x12e5   : > { %v8374_v4 = vpop.eup %8373  ;;  %7359 = vst.msk [vmem:[%s9046_s6 + $0xc0] sm:$0x1f] %vm1834_vm11, %v5275_v18  ;;  %8008 = vmatmul.mubr.msk.f32.vlgmr.msra.gmra.mrb[68].mxu0 %vm2029_vm12, %v5275_v18  ;;  %8011 = vmatpush3.msk.msra.mxu1 %vm424_vm5, %v9643_v39 }
0x12e6   : > { %v8376_v20 = vpop.eup %8375  ;;  %v5276_v40 = vmul.f32 %v8374_v4, %v9689_v58  ;;  %8016 = vmatpush3.msk.msra.mxu0 %vm424_vm5, %v9715_v46  ;;  %v5247_v12 = vpop.xlane.xlu1 %5246  ;;  %8012 = vmatprep.mubr.msk.f32.mxu1 %vm8468_vm9, %v8469_v57 }
0x12e7   : > { %v5277_v55 = vmul.f32 %v8376_v20, %v9691_v8  ;;  %8383 = vrcp.f32 %v5247_v12  ;;  %8017 = vmatprep.mubr.msk.f32.mxu0 %vm8468_vm9, %v8469_v57  ;;  %8020 = vmatprep.subr.mxu1 %v8469_v57 }
0x12e8   : > { %7360 = vst.msk [vmem:[%s9046_s6 + $0xc8] sm:$0x1f] %vm1834_vm11, %v5276_v40  ;;  %8025 = vmatprep.subr.mxu0 %v8469_v57  ;;  %8013 = vmatmul.mubr.msk.f32.vlgmr.msra.gmra.mrb[76].mxu1 %vm2029_vm12, %v5276_v40 }
0x12e9   : > { %v8378_v39 = vpop.eup %8377  ;;  %7361 = vst.msk [vmem:[%s9046_s6 + $0xd0] sm:$0x1f] %vm1834_vm11, %v5277_v55  ;;  %8018 = vmatmul.mubr.msk.f32.vlgmr.msra.gmra.mrb[70].mxu0 %vm2029_vm12, %v5277_v55  ;;  %8021 = vmatpush3.msk.msra.mxu1 %vm424_vm5, %v9717_v59 }
0x12ea   : > { %v8380_v58 = vpop.eup %8379  ;;  %v5278_v8 = vmul.f32 %v8378_v39, %v9697_v45  ;;  %8026 = vmatpush3.msk.msra.mxu0 %vm424_vm5, %v9719_v56  ;;  %8022 = vmatprep.mubr.msk.f32.mxu1 %vm8468_vm9, %v8469_v57 }
0x12eb   : > { %v5279_v21 = vmul.f32 %v8380_v58, %v9699_v6  ;;  %8027 = vmatprep.mubr.msk.f32.mxu0 %vm8468_vm9, %v8469_v57  ;;  %8030 = vmatprep.subr.mxu1 %v8469_v57  ;;  %v6456_v6 = vpop.permute.xlu1 %6455 }
0x12ec   : > { %7362 = vst.msk [vmem:[%s9046_s6 + $0xd8] sm:$0x1f] %vm1834_vm11, %v5278_v8  ;;  %8023 = vmatmul.mubr.msk.f32.vlgmr.msra.gmra.mrb[78].mxu1 %vm2029_vm12, %v5278_v8  ;;  %8035 = vmatprep.subr.mxu0 %v8469_v57 }
0x12ed   : > { %v8382_v35 = vpop.eup %8381  ;;  %7363 = vst.msk [vmem:[%s9046_s6 + $0xe0] sm:$0x1f] %vm1834_vm11, %v5279_v21  ;;  %8028 = vmatmul.mubr.msk.f32.vlgmr.msra.gmra.mrb[72].mxu0 %vm2029_vm12, %v5279_v21  ;;  %8031 = vmatpush3.msk.msra.mxu1 %vm424_vm5, %v9750_v16 }
0x12ee   : > { %v5280_v45 = vmul.f32 %v8382_v35, %v9705_v22  ;;  %8032 = vmatprep.mubr.msk.f32.mxu1 %vm8468_vm9, %v8469_v57  ;;  %8040 = vmatprep.subr.mxu1 %v8469_v57 }
0x12ef   : > { %8037 = vmatprep.mubr.msk.f32.mxu0 %vm8468_vm9, %v8469_v57 }
0x12f0   : > { %7364 = vst.msk [vmem:[%s9046_s6 + $0xe8] sm:$0x1f] %vm1834_vm11, %v5280_v45  ;;  %8033 = vmatmul.mubr.msk.f32.vlgmr.msra.gmra.mrb[80].mxu1 %vm2029_vm12, %v5280_v45 }
0x12f1   : > { %v8384_v9 = vpop.eup %8383  ;;  %8041 = vmatpush3.msk.msra.mxu1 %vm424_vm5, %v6456_v6  ;;  %8042 = vmatprep.mubr.msk.f32.mxu1 %vm8468_vm9, %v8469_v57 }
0x12f2   : > { %v5281_v48 = vmul.f32 %v8384_v9, %v9709_v52  ;;  %8159 = vmatprep.subr.bf16.mxu1 %v8467_v54 }
0x12f4   : > { %7365 = vst.msk [vmem:[%s9046_s6 + $0xf0] sm:$0x1f] %vm1834_vm11, %v5281_v48 }
0x1317   : > { %v5250_v22 = vpop.xlane.xlu0 %5249 }
0x1318   : > { %8385 = vrcp.f32 %v5250_v22 }
0x131b   : > { %v6379_v17 = vpop.permute.xlu0 %6378 }
0x131c   : > { %8036 = vmatpush3.msk.msra.mxu0 %vm424_vm5, %v6379_v17 }
0x131d   : > { %8038 = vmatmul.mubr.msk.f32.vlgmr.msra.gmra.mrb[74].mxu0 %vm2029_vm12, %v5281_v48  ;;  %8153 = vmatprep.subr.bf16.mxu0 %v8467_v54 }
0x131e   : > { %8053 = vmatprep.mubr.msk.f32.mxu0 %vm8468_vm9, %v8469_v57  ;;  %8155 = vmatpush3.bf16.msra.mxu0 %v8154_v29 }
0x131f   : > { %8156 = vmatprep.subr.bf16.mxu0 %v8467_v54 }
0x1322   : > { %v8386_v53 = vpop.eup %8385  ;;  %8158 = vmatpush3.bf16.msra.mxu0 %v8157_v1 }
0x1323   : > { %v5282_v46 = vmul.f32 %v8386_v53, %v9722_v43  ;;  %8165 = vmatprep.subr.bf16.mxu0 %v8467_v54 }
0x1325   : > { %7366 = vst.msk [vmem:[%s9046_s6 + $0xf8] sm:$0x1f] %vm1834_vm11, %v5282_v46  ;;  %8043 = vmatmul.mubr.msk.f32.vlgmr.msra.gmra.mrb[82].mxu1 %vm2029_vm12, %v5282_v46  ;;  %s7110_s6 = scalar_lea.sflag [#allocation3], %s190_s8 }
0x1326   : > { %8070 = vmatprep.mubr.msk.f32.mxu1 %vm8468_vm9, %v8469_v57 }
0x135f   : > { %v9866_v52 = vpop.f32.mrb[60].mxu0 }
0x1360   : > { %v7969_v59 = vpop.f32.mrb[61].mxu0 }
0x1374   : > { %v5527_v56 = vpop.f32.mrb[62].mxu0 }
0x1375   : > { %v7979_v28 = vpop.f32.mrb[63].mxu0 }
0x137c   : > { %v5681_v0 = vpop.f32.mrb[64].mxu0 }
0x137d   : > { %v7989_v10 = vpop.f32.mrb[65].mxu0 }
0x138f   : > { %v5450_v13 = vpop.f32.mrb[68].mxu1 }
0x1390   : > { %v7974_v63 = vpop.f32.mrb[69].mxu1  ;;  %6533 = vrot.lane.b32.xlu0 %v5450_v13, %s8475_s11 }
0x1393   : > { %v5604_v51 = vpop.f32.mrb[70].mxu1 }
0x1394   : > { %v7984_v43 = vpop.f32.mrb[71].mxu1  ;;  %6537 = vrot.lane.b32.xlu0 %v5527_v56, %s8477_s5 }
0x1398   : > { %6541 = vrot.lane.b32.xlu0 %v5604_v51, %s8476_s30 }
0x13b3   : > { %v5758_v15 = vpop.f32.mrb[72].mxu1 }
0x13b4   : > { %v5835_v16 = vpop.f32.mrb[66].mxu0  ;;  %v7994_v33 = vpop.f32.mrb[73].mxu1  ;;  %6548 = vrot.lane.b32.xlu0 %v5758_v15, %s8475_s11 }
0x13b5   : > { %6552 = vrot.lane.b32.xlu1 %v5835_v16, %s8477_s5  ;;  %v7999_v7 = vpop.f32.mrb[67].mxu0 }
0x13b7   : > { %v5912_v62 = vpop.f32.mrb[74].mxu1 }
0x13b8   : > { %v5989_v19 = vpop.f32.mrb[68].mxu0  ;;  %v8004_v26 = vpop.f32.mrb[75].mxu1 }
0x13b9   : > { %6556 = vrot.lane.b32.xlu1 %v5912_v62, %s8476_s30  ;;  %v8009_v60 = vpop.f32.mrb[69].mxu0 }
0x13bb   : > { %v6066_v47 = vpop.f32.mrb[76].mxu1 }
0x13bc   : > { %v6143_v27 = vpop.f32.mrb[70].mxu0  ;;  %v8014_v37 = vpop.f32.mrb[77].mxu1 }
0x13bd   : > { %6563 = vrot.lane.b32.xlu1 %v6066_v47, %s8475_s11  ;;  %v8019_v34 = vpop.f32.mrb[71].mxu0  ;;  %v6763_v37 = vld [vmem:[%s10075_s2 + $0x128] sm:$0xff] }
0x13bf   : > { %v6220_v42 = vpop.f32.mrb[78].mxu1 }
0x13c0   : > { %v6297_v50 = vpop.f32.mrb[72].mxu0  ;;  %v8024_v31 = vpop.f32.mrb[79].mxu1 }
0x13c1   : > { %6567 = vrot.lane.b32.xlu1 %v6143_v27, %s8477_s5  ;;  %v8029_v49 = vpop.f32.mrb[73].mxu0 }
0x13c3   : > { %v6374_v3 = vpop.f32.mrb[80].mxu1 }
0x13c4   : > { %v8034_v2 = vpop.f32.mrb[81].mxu1  ;;  %6578 = vrot.lane.b32.xlu0 %v6374_v3, %s8475_s11  ;;  %s8409_s11 = scalar_lea.vmem %s8408_s29, 128 }
0x13c5   : > { %6571 = vrot.lane.b32.xlu1 %v6220_v42, %s8476_s30  ;;  %v6764_v42 = vld [vmem:[%s10075_s2 + $0x130] sm:$0xff]  ;;  %p8411_p2 = scmp.lt.s32.totalorder %s8409_s11, %s8403_s28 }
0x13c7   : > { %p8412_p3 = por %p8411_p2, %p8410_p1 }
0x13c9   : > { %p8413_p4 = pnand %p8412_p3, %p8406_p0 }
0x13f0   : > { %v6451_v30 = vpop.f32.mrb[74].mxu0 }
0x13f1   : > { %6582 = vrot.lane.b32.xlu0 %v6451_v30, %s8477_s5  ;;  %v8039_v36 = vpop.f32.mrb[75].mxu0 }
0x13f8   : > { %v6528_v61 = vpop.f32.mrb[82].mxu1 }
0x13f9   : > { %6586 = vrot.lane.b32.xlu1 %v6528_v61, %s8476_s30  ;;  %v8044_v32 = vpop.f32.mrb[83].mxu1 }
0x1402   : > { %v6534_v44 = vpop.permute.xlu0 %6533 }
0x1403   : > { %v6544_v39 = vsel %vm619_vm10, %v9866_v52, %v6534_v44 }
0x1406   : > { %v6538_v14 = vpop.permute.xlu0 %6537 }
0x1407   : > { %v6545_v8 = vsel %vm3273_vm13, %v6544_v39, %v6538_v14 }
0x140a   : > { %v6542_v18 = vpop.permute.xlu0 %6541 }
0x140b   : > { %v6546_v35 = vsel %vm3275_vm14, %v6545_v8, %v6542_v18 }
0x1426   : > { %v6549_v4 = vpop.permute.xlu0 %6548 }
0x1427   : > { %v6553_v20 = vpop.permute.xlu1 %6552  ;;  %v6559_v40 = vsel %vm619_vm10, %v5681_v0, %v6549_v4 }
0x1428   : > { %v6560_v55 = vsel %vm3273_vm13, %v6559_v40, %v6553_v20  ;;  %v7403_v40 = vld [vmem:[%s10074_s1 + $0x18] ss:$0 sm:$0xff] }
0x142b   : > { %v6557_v12 = vpop.permute.xlu1 %6556 }
0x142c   : > { %v6561_v58 = vsel %vm3275_vm14, %v6560_v55, %v6557_v12  ;;  %v7404_v12 = vld [vmem:[%s10074_s1 + $0x19] ss:$0 sm:$0xff] }
0x142d   : > { %v6593_v21 = vrot.slane %v6561_v58, 3 }
0x142f   : > { %v6564_v45 = vpop.permute.xlu1 %6563  ;;  %v6601_v6 = vsel %vm424_vm5, %v6546_v35, %v6593_v21 }
0x1430   : > { %8054 = vmatmul.mubr.msk.f32.vlgmr.msra.gmra.mrb[76].mxu0 %vm351_vm1, %v6601_v6  ;;  %v6574_v48 = vsel %vm619_vm10, %v5989_v19, %v6564_v45 }
0x1431   : > { %8056 = vmatprep.mubr.msk.f32.mxu0 %vm8468_vm9, %v8469_v57 }
0x1433   : > { %v6568_v9 = vpop.permute.xlu1 %6567 }
0x1434   : > { %v6575_v22 = vsel %vm3273_vm13, %v6574_v48, %v6568_v9 }
0x1436   : > { %v6579_v59 = vpop.permute.xlu0 %6578 }
0x1437   : > { %v6572_v17 = vpop.permute.xlu1 %6571  ;;  %v6589_v28 = vsel %vm619_vm10, %v6297_v50, %v6579_v59  ;;  %v6765_v50 = vld [vmem:[%s10075_s2 + $0x138] sm:$0xff]  ;;  %v6876_v59 = vld [vmem:[%s10075_s2 + $0x148] sm:$0xff] }
0x1438   : > { %v6576_v53 = vsel %vm3275_vm14, %v6575_v22, %v6572_v17  ;;  %v8163_v31 = vpack.c.bf16 %v6765_v50, %v6764_v42 }
0x1439   : > { %v6596_v46 = vrot.slane %v6576_v53, 6 }
0x143b   : > { %v6602_v52 = vsel %vm428_vm2, %v6593_v21, %v6596_v46 }
0x1463   : > { %v6583_v56 = vpop.permute.xlu0 %6582 }
0x1464   : > { %v6590_v0 = vsel %vm3273_vm13, %v6589_v28, %v6583_v56  ;;  %v6877_v28 = vld [vmem:[%s10075_s2 + $0x150] sm:$0xff] }
0x146b   : > { %v6587_v10 = vpop.permute.xlu1 %6586 }
0x146c   : > { %v6591_v13 = vsel %vm3275_vm14, %v6590_v0, %v6587_v10  ;;  %v6878_v0 = vld [vmem:[%s10075_s2 + $0x158] sm:$0xff] }
0x146d   : > { %v6599_v63 = vrot.slane %v6591_v13, 1  ;;  %v8169_v10 = vpack.c.bf16 %v6878_v0, %v6877_v28 }
0x146f   : > { %v6603_v51 = vsel %vm432_vm6, %v6602_v52, %v6599_v63  ;;  %v6875_v52 = vld [vmem:[%s10075_s2 + $0x140] sm:$0xff] }
0x1470   : > { %8057 = vmatmul.mubr.msk.f32.gmra.mrb[78].mxu0 %vm351_vm1, %v6603_v51  ;;  %v8166_v56 = vpack.c.bf16 %v6876_v59, %v6875_v52  ;;  %v7027_v52 = vld [vmem:[%s10075_s2 + $0x50] sm:$0xff] }
0x1471   : > { %8059 = vmatprep.mubr.msk.f32.mxu0 %vm8468_vm9, %v8469_v57 }
0x1472   : > { %8167 = vmatpush3.bf16.msra.mxu0 %v8166_v56  ;;  %v7028_v56 = vld [vmem:[%s10075_s2 + $0x58] sm:$0xff] }
0x1473   : > { %8168 = vmatprep.subr.bf16.mxu0 %v8467_v54  ;;  %v8175_v28 = vpack.c.bf16 %v7028_v56, %v7027_v52 }
0x1474   : > { %8060 = vmatmul.mubr.msk.f32.gmra.mrb[80].mxu0 %vm351_vm1, %v6599_v63 }
0x1475   : > { %8087 = vmatprep.mubr.msk.f32.mxu0 %vm8468_vm9, %v8469_v57 }
0x1476   : > { %8170 = vmatpush3.bf16.msra.mxu0 %v8169_v10 }
0x1503   : > { %v6682_v43 = vpop.f32.mrb[76].mxu0 }
0x1504   : > { %v6696_v23 = vadd.f32 %v6682_v43, %v9324_v24  ;;  %v8055_v29 = vpop.f32.mrb[77].mxu0  ;;  %v7405_v43 = vld [vmem:[%s10074_s1 + $0x1a] ss:$0 sm:$0xff] }
0x1506   : > { %v9923_v38 = vadd.f32 %v7402_v41, %v6696_v23 }
0x1508   : > { %v6709_v11 = vsel %vm351_vm1, %v9923_v38, 0.0 }
0x1509   : > { %6710 = vadd.xlane.f32.xlu0 %v6709_v11 }
0x1543   : > { %v6687_v1 = vpop.f32.mrb[78].mxu0 }
0x1544   : > { %v6697_v15 = vadd.f32 %v6687_v1, %v9329_v25  ;;  %v8058_v16 = vpop.f32.mrb[79].mxu0  ;;  %v6762_v25 = vld [vmem:[%s10075_s2 + $0x120] sm:$0xff] }
0x1545   : > { %v8160_v34 = vpack.c.bf16 %v6763_v37, %v6762_v25 }
0x1546   : > { %v9928_v33 = vadd.f32 %v7402_v41, %v6697_v15 }
0x1547   : > { %v6692_v7 = vpop.f32.mrb[80].mxu0  ;;  %8161 = vmatpush3.bf16.msra.mxu1 %v8160_v34 }
0x1548   : > { %v8061_v62 = vpop.f32.mrb[81].mxu0  ;;  %v6712_v19 = vsel %vm351_vm1, %v9928_v33, 0.0  ;;  %8162 = vmatprep.subr.bf16.mxu1 %v8467_v54  ;;  %v6698_v2 = vadd.f32 %v6692_v7, %v9334_v5 }
0x1549   : > { %6713 = vadd.xlane.f32.xlu1 %v6712_v19 }
0x154a   : > { %v6706_v61 = vadd.f32 %v7402_v41, %v6698_v2 }
0x154b   : > { %8164 = vmatpush3.bf16.msra.mxu1 %v8163_v31 }
0x154c   : > { %8171 = vmatprep.subr.bf16.mxu1 %v8467_v54  ;;  %v6715_v44 = vsel %vm442_vm8, %v6706_v61, 0.0 }
0x1596   : > { %v6711_v24 = vpop.xlane.xlu0 %6710 }
0x1597   : > { %v6718_v26 = vmul.f32 0.03125, %v6711_v24 }
0x1599   : > { %v6721_v60 = vsub.f32 %v9923_v38, %v6718_v26 }
0x159b   : > { %v6724_v47 = vmul.f32 %v6721_v60, %v6721_v60 }
0x159d   : > { %v6727_v27 = vsel %vm351_vm1, %v6724_v47, 0.0 }
0x159e   : > { %6728 = vadd.xlane.f32.xlu0 %v6727_v27 }
0x15d6   : > { %v6714_v49 = vpop.xlane.xlu1 %6713 }
0x15d7   : > { %v6719_v3 = vmul.f32 0.03125, %v6714_v49 }
0x15d9   : > { %v6722_v30 = vsub.f32 %v9928_v33, %v6719_v3 }
0x15db   : > { %v6725_v36 = vmul.f32 %v6722_v30, %v6722_v30 }
0x15dd   : > { %v6730_v32 = vsel %vm351_vm1, %v6725_v36, 0.0  ;;  %v7412_v36 = vld [vmem:[%s10074_s1 + $0x1b] ss:$0 sm:$0xff] }
0x15de   : > { %6731 = vadd.xlane.f32.xlu0 %v6730_v32 }
0x15e2   : > { %6716 = vadd.xlane.f32.xlu0 %v6715_v44 }
0x162b   : > { %v6729_v14 = vpop.xlane.xlu0 %6728 }
0x162c   : > { %v6736_v18 = vmul.f32 0.03125, %v6729_v14 }
0x162e   : > { %v6739_v4 = vadd.f32 1e-05, %v6736_v18 }
0x1630   : > { %8387 = vrsqrt.f32 %v6739_v4 }
0x163a   : > { %v8388_v20 = vpop.eup %8387 }
0x163b   : > { %v6745_v5 = vmul.f32 %v8388_v20, %v6721_v60 }
0x163d   : > { %v6752_v55 = vmul.f32 %v7403_v40, %v6745_v5 }
0x163f   : > { %v6759_v39 = vadd.f32 %v7404_v12, %v6752_v55 }
0x1641   : > { %8071 = vmatmul.mubr.msk.f32.vlgmr.msra.gmra.mrb[84].mxu1 %vm351_vm1, %v6759_v39 }
0x1642   : > { %8073 = vmatprep.mubr.msk.f32.mxu1 %vm8468_vm9, %v8469_v57 }
0x166b   : > { %v6732_v58 = vpop.xlane.xlu0 %6731 }
0x166c   : > { %v6737_v8 = vmul.f32 0.03125, %v6732_v58 }
0x166e   : > { %v6740_v21 = vadd.f32 1e-05, %v6737_v8 }
0x166f   : > { %v6717_v35 = vpop.xlane.xlu0 %6716 }
0x1670   : > { %8389 = vrsqrt.f32 %v6740_v21  ;;  %v6720_v45 = vmul.f32 0.03125, %v6717_v35 }
0x1672   : > { %v6723_v6 = vsub.f32 %v6706_v61, %v6720_v45 }
0x1674   : > { %v6726_v9 = vmul.f32 %v6723_v6, %v6723_v6 }
0x1676   : > { %v6733_v48 = vsel %vm442_vm8, %v6726_v9, 0.0 }
0x1677   : > { %6734 = vadd.xlane.f32.xlu1 %v6733_v48 }
0x167a   : > { %v8390_v22 = vpop.eup %8389 }
0x167b   : > { %v6746_v17 = vmul.f32 %v8390_v22, %v6722_v30 }
0x167d   : > { %v6753_v53 = vmul.f32 %v7403_v40, %v6746_v17 }
0x167f   : > { %v6760_v46 = vadd.f32 %v7404_v12, %v6753_v53  ;;  %v7025_v53 = vld [vmem:[%s10075_s2 + $0x40] sm:$0xff] }
0x1681   : > { %8074 = vmatmul.mubr.msk.f32.gmra.mrb[86].mxu1 %vm351_vm1, %v6760_v46  ;;  %v7026_v46 = vld [vmem:[%s10075_s2 + $0x48] sm:$0xff] }
0x1682   : > { %8076 = vmatprep.mubr.msk.f32.mxu1 %vm8468_vm9, %v8469_v57  ;;  %v8172_v59 = vpack.c.bf16 %v7026_v46, %v7025_v53 }
0x1684   : > { %8173 = vmatpush3.bf16.msra.mxu1 %v8172_v59 }
0x1685   : > { %8174 = vmatprep.subr.bf16.mxu1 %v8467_v54  ;;  %v7414_v54 = vld [vmem:[%s10074_s1 + $0xc] ss:$0 sm:$0xff] }
0x1688   : > { %8176 = vmatpush3.bf16.msra.mxu1 %v8175_v28 }
0x1704   : > { %v6735_v13 = vpop.xlane.xlu1 %6734 }
0x1705   : > { %v6738_v63 = vmul.f32 0.03125, %v6735_v13 }
0x1707   : > { %v6741_v51 = vadd.f32 1e-05, %v6738_v63 }
0x1709   : > { %8391 = vrsqrt.f32 %v6741_v51 }
0x1713   : > { %v8392_v41 = vpop.eup %8391 }
0x1714   : > { %v6846_v23 = vpop.f32.mrb[84].mxu1  ;;  %v6747_v29 = vmul.f32 %v8392_v41, %v6723_v6 }
0x1715   : > { %v6847_v11 = vadd.f32 %v7405_v43, %v6846_v23  ;;  %v8072_v1 = vpop.f32.mrb[85].mxu1 }
0x1716   : > { %v6754_v15 = vmul.f32 %v7403_v40, %v6747_v29  ;;  %v7413_v29 = vld [vmem:[%s10074_s1 + $0xb] ss:$0 sm:$0xff] }
0x1717   : > { %v6863_v16 = vmul.f32 0.70710677, %v6847_v11  ;;  %v6860_v19 = vmul.f32 0.5, %v6847_v11 }
0x1718   : > { %v6761_v7 = vadd.f32 %v7404_v12, %v6754_v15 }
0x1719   : > { %8393 = verf.f32 %v6863_v16 }
0x171a   : > { %8077 = vmatmul.mubr.msk.f32.gmra.mrb[88].mxu1 %vm351_vm1, %v6761_v7 }
0x171b   : > { %8104 = vmatprep.mubr.msk.f32.mxu1 %vm8468_vm9, %v8469_v57 }
0x1723   : > { %v8394_v62 = vpop.eup %8393 }
0x1724   : > { %v6869_v24 = vadd.f32 1.0, %v8394_v62 }
0x1726   : > { %v6872_v26 = vmul.f32 %v6869_v24, %v6860_v19 }
0x1728   : > { %8088 = vmatmul.mubr.msk.f32.vlgmr.msra.gmra.mrb[82].mxu0 %vm351_vm1, %v6872_v26 }
0x1729   : > { %8090 = vmatprep.mubr.msk.f32.mxu0 %vm8468_vm9, %v8469_v57 }
0x1754   : > { %v6851_v60 = vpop.f32.mrb[86].mxu1 }
0x1755   : > { %v6852_v47 = vadd.f32 %v7405_v43, %v6851_v60  ;;  %v8075_v27 = vpop.f32.mrb[87].mxu1 }
0x1756   : > { %v7415_v27 = vld [vmem:[%s10074_s1 + $0xd] ss:$0 sm:$0xff] }
0x1757   : > { %v6864_v25 = vmul.f32 0.70710677, %v6852_v47  ;;  %v6861_v34 = vmul.f32 0.5, %v6852_v47 }
0x1759   : > { %8395 = verf.f32 %v6864_v25 }
0x1763   : > { %v8396_v37 = vpop.eup %8395 }
0x1764   : > { %v6870_v42 = vadd.f32 1.0, %v8396_v37 }
0x1766   : > { %v6873_v50 = vmul.f32 %v6870_v42, %v6861_v34 }
0x1768   : > { %8091 = vmatmul.mubr.msk.f32.gmra.mrb[84].mxu0 %vm351_vm1, %v6873_v50 }
0x1769   : > { %8093 = vmatprep.mubr.msk.f32.mxu0 %vm8468_vm9, %v8469_v57 }
0x17ed   : > { %v6856_v31 = vpop.f32.mrb[88].mxu1 }
0x17ee   : > { %v6857_v49 = vadd.f32 %v7405_v43, %v6856_v31  ;;  %v8078_v3 = vpop.f32.mrb[89].mxu1 }
0x17f0   : > { %v6865_v2 = vmul.f32 0.70710677, %v6857_v49  ;;  %v6862_v14 = vmul.f32 0.5, %v6857_v49 }
0x17f2   : > { %8397 = verf.f32 %v6865_v2 }
0x17fb   : > { %v6954_v30 = vpop.f32.mrb[82].mxu0 }
0x17fc   : > { %v8398_v61 = vpop.eup %8397  ;;  %v6967_v32 = vadd.f32 %v6954_v30, %v9923_v38  ;;  %v8089_v44 = vpop.f32.mrb[83].mxu0 }
0x17fd   : > { %v6871_v18 = vadd.f32 1.0, %v8398_v61 }
0x17fe   : > { %v6974_v4 = vadd.f32 %v7412_v36, %v6967_v32 }
0x17ff   : > { %v6874_v20 = vmul.f32 %v6871_v18, %v6862_v14 }
0x1800   : > { %v6978_v57 = vsel %vm351_vm1, %v6974_v4, 0.0 }
0x1801   : > { %6979 = vadd.xlane.f32.xlu0 %v6978_v57  ;;  %8094 = vmatmul.mubr.msk.f32.gmra.mrb[86].mxu0 %vm351_vm1, %v6874_v20 }
0x183b   : > { %v6959_v40 = vpop.f32.mrb[84].mxu0 }
0x183c   : > { %v6968_v5 = vadd.f32 %v6959_v40, %v9928_v33  ;;  %v8092_v12 = vpop.f32.mrb[85].mxu0 }
0x183e   : > { %v6975_v55 = vadd.f32 %v7412_v36, %v6968_v5 }
0x1840   : > { %v6981_v39 = vsel %vm351_vm1, %v6975_v55, 0.0 }
0x1841   : > { %6982 = vadd.xlane.f32.xlu1 %v6981_v39 }
0x188e   : > { %v6980_v58 = vpop.xlane.xlu0 %6979 }
0x188f   : > { %v6984_v38 = vmul.f32 0.03125, %v6980_v58 }
0x1891   : > { %v6986_v8 = vsub.f32 %v6974_v4, %v6984_v38 }
0x1893   : > { %v6988_v21 = vmul.f32 %v6986_v8, %v6986_v8 }
0x1895   : > { %v6990_v35 = vsel %vm351_vm1, %v6988_v21, 0.0 }
0x1896   : > { %6991 = vadd.xlane.f32.xlu0 %v6990_v35 }
0x18ce   : > { %v6983_v45 = vpop.xlane.xlu1 %6982 }
0x18cf   : > { %v6985_v6 = vmul.f32 0.03125, %v6983_v45 }
0x18d1   : > { %v6987_v9 = vsub.f32 %v6975_v55, %v6985_v6 }
0x18d3   : > { %v6989_v48 = vmul.f32 %v6987_v9, %v6987_v9 }
0x18d4   : > { %v6964_v22 = vpop.f32.mrb[86].mxu0 }
0x18d5   : > { %v8095_v17 = vpop.f32.mrb[87].mxu0  ;;  %v6993_v33 = vsel %vm351_vm1, %v6989_v48, 0.0 }
0x18d6   : > { %6994 = vadd.xlane.f32.xlu1 %v6993_v33 }
0x1923   : > { %v6992_v0 = vpop.xlane.xlu0 %6991 }
0x1924   : > { %v6996_v10 = vmul.f32 0.03125, %v6992_v0 }
0x1926   : > { %v6998_v13 = vadd.f32 1e-05, %v6996_v10 }
0x1928   : > { %8399 = vrsqrt.f32 %v6998_v13 }
0x1932   : > { %v8400_v43 = vpop.eup %8399 }
0x1933   : > { %v7002_v23 = vmul.f32 %v8400_v43, %v6986_v8 }
0x1935   : > { %v7008_v11 = vmul.f32 %v7413_v29, %v7002_v23 }
0x1937   : > { %v7014_v1 = vadd.f32 %v7414_v54, %v7008_v11 }
0x1939   : > { %v7017_v7 = vrot.slane %v7014_v1, 4 }
0x193b   : > { %v7022_v24 = vsel %vm422_vm3, %v7014_v1, %v7017_v7 }
0x1963   : > { %v6995_v63 = vpop.xlane.xlu1 %6994 }
0x1964   : > { %v6997_v51 = vmul.f32 0.03125, %v6995_v63 }
0x1966   : > { %v6999_v41 = vadd.f32 1e-05, %v6997_v51 }
0x1968   : > { %8401 = vrsqrt.f32 %v6999_v41 }
0x1972   : > { %v8402_v15 = vpop.eup %8401 }
0x1973   : > { %v7003_v16 = vmul.f32 %v8402_v15, %v6987_v9 }
0x1975   : > { %v7009_v62 = vmul.f32 %v7413_v29, %v7003_v16 }
0x1977   : > { %v7015_v19 = vadd.f32 %v7414_v54, %v7009_v62 }
0x1979   : > { %v7020_v26 = vrot.slane %v7015_v19, 4  ;;  %v7023_v60 = vsel %vm428_vm2, %v7022_v24, %v7015_v19 }
0x197b   : > { %v7024_v47 = vsel %vm430_vm4, %v7023_v60, %v7020_v26 }
0x197c   : > { %8105 = vmatmul.mubr.msk.f32.vlgmr.msra.gmra.mrb[90].mxu1 %vm351_vm1, %v7024_v47 }
0x1a4f   : > { %v7103_v25 = vpop.f32.mrb[90].mxu1 }
0x1a50   : > { %v7104_v37 = vadd.f32 %v7415_v27, %v7103_v25  ;;  %v8106_v34 = vpop.f32.mrb[91].mxu1 }
0x1a52   : > { %7108 = vst.msk [vmem:[%s192_s14] sm:$0xf] %vm7107_vm15, %v7104_v37 }
0x1a53   : > { %8416 = shalt.err (!%p8413_p4)
}
0x1a54   : > { %s8417_s30 = scalar_lea.hbm %s10031_s27, 64  ;;  %s8421_s8 = scalar_lea.hbm %s10076_s3, 128 }
0x1a55   : > { %p8418_p7 = scmp.ne.s32.totalorder %s10031_s27, %s8417_s30  ;;  %p8422_p10 = scmp.lt.u32.totalorder %s10031_s27, %s10076_s3 }
0x1a56   : > { %p8423_p11 = scmp.lt.u32.totalorder %s8421_s8, %s8417_s30  ;;  %p8425_p13 = scmp.lt.u32.totalorder %s8417_s30, %s10031_s27 }
0x1a57   : > { %p8419_p8 = pnand %p8418_p7, %p8542_p5 }
0x1a58   : > { %p8424_p12 = por %p8423_p11, %p8422_p10 }
0x1a59   : > { %p8420_p9 = pneg %p8419_p8 }
0x1a5a   : > { %p8426_p0 = por %p8425_p13, %p8424_p12 }
0x1a5c   : > { %p8427_p1 = pnand %p8426_p0, %p8420_p9 }
0x1a5e   : > { %8430 = shalt.err (!%p8427_p1)
}
0x1a5f   : > { %8177 = dma.vmem_to_hbm [thread:$0]  (%p8542_p5), %s10033_s20, 64, %s10031_s27, %s7110_s6  }
0x1a60 PF: > { %p8183_p2 = scmp.ge.s32.totalorder %s8465_s18, 2  ;;  %s7143_s12 = sand.u32 1, %s8453_s15  }
0x1a61   : > { %s7144_s13 = scalar_lea.sflag [#allocation3], %s7143_s12 }
0x1a62   : > { %p8180_p3 = pnand %p8183_p2, %p8546_p6 }
0x1a64   : > { %8448 = dma.done.wait (!%p8180_p3), %s7144_s13, 64  }
0x1a65   : > { %8450 = vsyncadd (!%p8180_p3), %s7144_s13, 4294967232  ;;  %p15_p4 = scmp.ge.s32.totalorder %s8529_s21, 4   ;;  %s10080_s15 = smov %s8457_s16 }
0x1a66   : > { %s10081_s16 = smov %s8461_s17  ;;  %s10082_s17 = smov %s8540_s24 }
0x1a67   : > { %s10083_s18 = smov %s8529_s21  ;;  %17 = sbr.rel (!%p15_p4) target bundleno = 3 (0x3), region = 80 }
0x1a6e   :  { %7157 = vsyncpa [#allocation3], 1 }
0x1a6f   :  { %7159 = vsyncpa [#allocation3 + $0x1], 1 }

</bundles_post_ra>
